<compile_context>
chip_gen: v5e
topology: v5e:2x2
jax: 0.10.0
libtpu: 0.0.40
codegen_flags: <defaults>
</compile_context>

<pallas_src>
import math

import jax
import jax.numpy as jnp
from jax import lax
from jax.experimental import pallas as pl
from jax.experimental.pallas import tpu as pltpu

# ----------------------------- model configuration ---------------------------
MIN_V, MAX_V = 0, 127           # NumEmbeddingConfig.min/max_value
VOCAB = MAX_V - MIN_V + 1       # 128
EMB_D = 32                      # embedding_dim
ENC_H = 64                      # feedforward_backbone hidden width
MODEL_D = 32                    # transformer_config.model_dim
FF_D = 64                       # transformer_config.ff_dim
NUM_BLOCKS = 2                  # transformer_config.num_blocks
NUM_HEADS = 4                   # transformer_config.num_heads
HEAD_D = MODEL_D // NUM_HEADS   # 8
NORM_CONST = 10000.0
USE_L2_NORM = True
LN_EPS = 1e-5
SEQ = 3                         # two operands + output token
NEG_INF = -1e30

# ------------------------- packed-slab static offsets ------------------------
# w32 slab: every weight matrix with 32 columns, stacked along rows
# (all offsets are multiples of 8 sublanes).
W32_EMB = 0                                   # VOCAB rows
W32_ENCW2 = W32_EMB + VOCAB                   # 128
W32_TOW = W32_ENCW2 + ENC_H                   # 192
W32_FROMW = W32_TOW + EMB_D                   # 224
W32_W2 = W32_FROMW + MODEL_D                  # 256  (+ l * FF_D)
W32_WO = W32_W2 + NUM_BLOCKS * FF_D           # 384  (+ l * MODEL_D)
W32_ROWS = W32_WO + NUM_BLOCKS * MODEL_D      # 448

# w64 slab: every weight matrix with 64 columns.
W64_ENCW1 = 0                                 # EMB_D rows
W64_W1 = W64_ENCW1 + EMB_D                    # 32   (+ l * MODEL_D)
W64_ROWS = W64_W1 + NUM_BLOCKS * MODEL_D      # 96

# bias slab: one (1, 128) zero-padded row per bias / LN / token parameter.
ROW_ENC_B1 = 0
ROW_ENC_B2 = 1
ROW_TO_B = 2
ROW_TOK = 3
ROW_FROM_B = 4
ROW_L_BASE = 5
ROWS_PER_LAYER = 8   # bqkv, bo, b1, b2, ln1_g, ln1_b, ln2_g, ln2_b
BIAS_ROWS = ROW_L_BASE + NUM_BLOCKS * ROWS_PER_LAYER      # 21


# ------------------------- glue: frozen sinusoidal table ---------------------
def sinusoidal_encode(values, embedding_dim, norm_const, use_l2_norm):
    pos = values.astype(jnp.float32)
    half = embedding_dim // 2
    i = jnp.arange(half, dtype=jnp.float32)
    freq = jnp.power(norm_const, -2.0 * i / embedding_dim)
    ang = pos[:, None] * freq[None, :]
    emb = jnp.concatenate([jnp.sin(ang), jnp.cos(ang)], axis=-1)
    if use_l2_norm:
        emb = emb / jnp.sqrt(jnp.sum(emb * emb, axis=-1, keepdims=True))
    return emb.astype(jnp.float32)


# ------------------- single fused Pallas kernel: full forward ----------------
def addition_fused_kernel(xvals_ref, bias_ref, w32_ref, w64_ref, wqkv_ref,
                          logits_ref, lat_sc, mask_sc):
    B = xvals_ref.shape[0] // 2
    V, D, M, F = VOCAB, EMB_D, MODEL_D, FF_D
    H, Dh, S = NUM_HEADS, HEAD_D, SEQ
    N = B * S                    # residual-stream rows (token-major: pos, then batch)
    NH = N * H                   # flattened attention rows: (head, pos, batch)
    scale = 1.0 / math.sqrt(Dh)

    def bias(row, width):        # static (1, width) view into the bias slab
        return bias_ref[row:row + 1, 0:width]

    # (1) LatentEmbedding.build_latents(): encoder MLP over the whole vocab.
    h0 = jnp.dot(w32_ref[W32_EMB:W32_EMB + V, :],
                 w64_ref[W64_ENCW1:W64_ENCW1 + D, :],
                 preferred_element_type=jnp.float32) + bias(ROW_ENC_B1, ENC_H)
    h0 = jnp.maximum(h0, 0.0)                                       # ReLU backbone
    latents = jnp.dot(h0, w32_ref[W32_ENCW2:W32_ENCW2 + ENC_H, :],
                      preferred_element_type=jnp.float32) + bias(ROW_ENC_B2, D)  # (V, D)

    # (2) encode(value_to_idx(x)): gather latent rows with a one-hot matmul
    #     (full 128-lane contraction over the vocab).
    idx = xvals_ref[...] - MIN_V                                    # (2B, 1) int32
    vocab_iota = lax.broadcasted_iota(jnp.int32, (2 * B, V), 1)
    onehot = (vocab_iota == idx).astype(jnp.float32)                # (2B, V)
    e = jnp.dot(onehot, latents, preferred_element_type=jnp.float32)  # (2B, D)

    # Park the codebook in VMEM: it is only needed again at decode, so don't
    # keep a (128, 32) f32 value live in vregs across both transformer layers.
    lat_sc[...] = latents

    # (3) to_model_dim + output_token_embedding.  Token-major row order: the
    #     sequence is one leading-axis (sublane) concat, no scratch stores.
    ops = jnp.dot(e, w32_ref[W32_TOW:W32_TOW + D, :],
                  preferred_element_type=jnp.float32) + bias(ROW_TO_B, M)  # (2B, M)
    tok = jnp.broadcast_to(bias(ROW_TOK, M), (B, M))
    x2d = jnp.concatenate([ops, tok], axis=0)                       # (N, M)
    # input_dropout: eval mode -> identity

    # Block-diagonal additive attention mask over the flattened (head, pos, b)
    # rows: r and c may attend iff same head AND same batch element.  Constant
    # across layers -> built once and parked in VMEM (not held in vregs).
    ri = lax.broadcasted_iota(jnp.int32, (NH, NH), 0)
    ci = lax.broadcasted_iota(jnp.int32, (NH, NH), 1)

    def head_of(i):              # i // N without a vector integer divide
        h = jnp.zeros_like(i)
        for t in range(1, H):
            h = h + (i >= t * N).astype(jnp.int32)
        return h

    same_head = head_of(ri) == head_of(ci)
    diff = ri - ci               # within a head block row = pos*B + b, so equal
    same_b = diff == 0           # b  <=>  diff in {0, +-B, ..., +-(S-1)*B}
    for t in range(1, S):
        same_b = jnp.logical_or(same_b, diff == t * B)
        same_b = jnp.logical_or(same_b, diff == -t * B)
    mask_sc[...] = jnp.where(jnp.logical_and(same_head, same_b),
                             jnp.float32(0.0), jnp.float32(NEG_INF))

    def layer_norm(h2d, g, b):
        # var = E[x^2] - E[x]^2: both cross-lane reductions depend only on h2d
        # so they can issue back-to-back on the XLU (shorter dependency chain).
        mu = jnp.mean(h2d, axis=-1, keepdims=True)
        ms = jnp.mean(h2d * h2d, axis=-1, keepdims=True)
        var = ms - mu * mu
        return (h2d - mu) * lax.rsqrt(var + LN_EPS) * g + b

    # (4) TransformerEncoder: post-norm layers (PyTorch norm_first=False).
    for l in range(NUM_BLOCKS):
        r0 = ROW_L_BASE + l * ROWS_PER_LAYER

        # Fused QKV projection (one lane-dense MXU push).  Columns were
        # re-ordered at trace time to (head, {q,k,v}, head_dim), so folding
        # heads into the sublane axis is 4 head-block slices + 1 leading-axis
        # concat (instead of 12 per-head 8-lane slices + 4 concats).
        qkv = jnp.dot(x2d, wqkv_ref[l],
                      preferred_element_type=jnp.float32) + bias(r0 + 0, 3 * M)  # (N, 3M)
        qkvf = jnp.concatenate(
            [qkv[:, 3 * Dh * h:3 * Dh * (h + 1)] for h in range(H)], axis=0)     # (NH, 3Dh)
        qf = qkvf[:, 0:Dh]
        kf = qkvf[:, Dh:2 * Dh]
        vf = qkvf[:, 2 * Dh:3 * Dh]

        # Flattened attention: one (NH,Dh)@(NH,Dh)^T scores push and one
        # (NH,NH)@(NH,Dh) PV push per layer (instead of 32 micro matmuls).
        s = lax.dot_general(qf, kf, (((1,), (1,)), ((), ())),
                            preferred_element_type=jnp.float32)     # (NH, NH)
        s = s + mask_sc[...]                    # mask BEFORE the row max
        m = jnp.max(s, axis=-1, keepdims=True)
        p = jnp.exp((s - m) * scale)            # 1/sqrt(head_dim) folded into exp
        denom = jnp.sum(p, axis=-1, keepdims=True)
        # EUP approximate reciprocal: ~1e-4 relative error in the softmax
        # normalisation (not bit-exact vs. PyTorch; fine for inference).
        p = p * pl.reciprocal(denom, approx=True)
        o = jnp.dot(p, vf, preferred_element_type=jnp.float32)      # (NH, Dh)

        # Merge heads back into lanes (4 sublane slices + 1 lane concat) and
        # apply the output projection.
        attn = jnp.concatenate([o[N * h:N * (h + 1), :] for h in range(H)],
                               axis=-1)                              # (N, M)
        attn = jnp.dot(attn, w32_ref[W32_WO + l * M:W32_WO + (l + 1) * M, :],
                       preferred_element_type=jnp.float32) + bias(r0 + 1, M)
        x2d = layer_norm(x2d + attn, bias(r0 + 4, M), bias(r0 + 5, M))

        ff = jnp.dot(x2d, w64_ref[W64_W1 + l * M:W64_W1 + (l + 1) * M, :],
                     preferred_element_type=jnp.float32) + bias(r0 + 2, F)
        ff = jnp.maximum(ff, 0.0)                                    # ReLU activation
        ff = jnp.dot(ff, w32_ref[W32_W2 + l * F:W32_W2 + (l + 1) * F, :],
                     preferred_element_type=jnp.float32) + bias(r0 + 3, M)
        x2d = layer_norm(x2d + ff, bias(r0 + 6, M), bias(r0 + 7, M))

    # (5) last token (contiguous sublane rows 2B:3B) -> from_model_dim ->
    #     decode against the parked codebook.  No transposed codebook is ever
    #     materialized (contract dim 1 of both operands); (B, 128) is lane-dense.
    x_last = x2d[2 * B:3 * B, :]                                     # (B, M)
    y = jnp.dot(x_last, w32_ref[W32_FROMW:W32_FROMW + M, :],
                preferred_element_type=jnp.float32) + bias(ROW_FROM_B, D)   # (B, D)
    logits_ref[...] = lax.dot_general(
        y, lat_sc[...], (((1,), (1,)), ((), ())),
        preferred_element_type=jnp.float32)                          # (B, V)


def fused_forward(xvals, packed):
    B = xvals.shape[0] // 2
    NH = B * SEQ * NUM_HEADS
    inputs = (xvals, packed["bias"], packed["w32"], packed["w64"], packed["wqkv"])
    return pl.pallas_call(
        addition_fused_kernel,
        out_shape=jax.ShapeDtypeStruct((B, VOCAB), jnp.float32),
        in_specs=[pl.BlockSpec(memory_space=pltpu.MemorySpace.VMEM)] * len(inputs),
        out_specs=pl.BlockSpec(memory_space=pltpu.MemorySpace.VMEM),
        scratch_shapes=[pltpu.VMEM((VOCAB, EMB_D), jnp.float32),    # parked codebook
                        pltpu.VMEM((NH, NH), jnp.float32)],         # attention mask
    )(*inputs)


# ----------------------------- parameters (synthetic) ------------------------
def init_params(key):
    ks = jax.random.split(key, 17)

    def nrm(k, shape, std=0.05):
        return (std * jax.random.normal(k, shape)).astype(jnp.float32)

    L, M, D, F, H = NUM_BLOCKS, MODEL_D, EMB_D, FF_D, ENC_H
    p = {
        # feedforward_backbone num_encoder (LatentEmbedding.encoder)
        "enc_w1": nrm(ks[0], (D, H)), "enc_b1": nrm(ks[1], (1, H)),
        "enc_w2": nrm(ks[2], (H, D)), "enc_b2": nrm(ks[3], (1, D)),
        # glue projections (stored as (in, out), i.e. nn.Linear weight^T)
        "to_w": nrm(ks[4], (D, M)), "to_b": nrm(ks[5], (1, M)),
        "from_w": nrm(ks[6], (M, D)), "from_b": nrm(ks[7], (1, D)),
        # output_token_embedding ~ N(0, 0.01)  (reset_parameters)
        "out_tok": nrm(ks[8], (1, M), std=0.01),
        # transformer layers; wqkv packs [Wq|Wk|Wv] with columns (head, head_dim)
        "wqkv": nrm(ks[9], (L, M, 3 * M)), "bqkv": nrm(ks[10], (L, 1, 3 * M)),
        "wo": nrm(ks[11], (L, M, M)), "bo": nrm(ks[12], (L, 1, M)),
        "w1": nrm(ks[13], (L, M, F)), "b1": nrm(ks[14], (L, 1, F)),
        "w2": nrm(ks[15], (L, F, M)), "b2": nrm(ks[16], (L, 1, M)),
        "ln1_g": jnp.ones((L, 1, M), jnp.float32),
        "ln1_b": jnp.zeros((L, 1, M), jnp.float32),
        "ln2_g": jnp.ones((L, 1, M), jnp.float32),
        "ln2_b": jnp.zeros((L, 1, M), jnp.float32),
    }
    return p


def pack_params(p):
    """One-time host/trace-time restructuring of the parameters into a few
    DMA-friendly slabs (5 kernel inputs instead of 23), with the packed QKV
    projection columns re-ordered to (head, {q,k,v}, head_dim)."""
    L, M, F, H, Dh = NUM_BLOCKS, MODEL_D, FF_D, NUM_HEADS, HEAD_D

    def interleave_qkv(w):   # column order (qkv, head, d) -> (head, qkv, d)
        lead = w.shape[:-1]
        w = w.reshape(*lead, 3, H, Dh)
        w = jnp.swapaxes(w, -3, -2)
        return w.reshape(*lead, 3 * M)

    wqkv = interleave_qkv(p["wqkv"])                  # (L, M, 3M)
    bqkv = interleave_qkv(p["bqkv"])                  # (L, 1, 3M)

    # Frozen sinusoidal input-embedding table over [min_value, max_value].
    values = jnp.arange(MIN_V, MAX_V + 1)
    emb_table = sinusoidal_encode(values, EMB_D, NORM_CONST, USE_L2_NORM)   # (V, D)

    w32 = jnp.concatenate([
        emb_table,                                    # W32_EMB
        p["enc_w2"],                                  # W32_ENCW2
        p["to_w"],                                    # W32_TOW
        p["from_w"],                                  # W32_FROMW
        p["w2"].reshape(L * F, M),                    # W32_W2
        p["wo"].reshape(L * M, M),                    # W32_WO
    ], axis=0).astype(jnp.float32)                    # (448, 32)

    w64 = jnp.concatenate([
        p["enc_w1"],                                  # W64_ENCW1
        p["w1"].reshape(L * M, F),                    # W64_W1
    ], axis=0).astype(jnp.float32)                    # (96, 64)

    def row128(v):
        v = v.reshape(1, -1)
        return jnp.pad(v, ((0, 0), (0, 128 - v.shape[-1])))

    rows = [row128(p["enc_b1"]), row128(p["enc_b2"]), row128(p["to_b"]),
            row128(p["out_tok"]), row128(p["from_b"])]
    for l in range(L):
        rows += [row128(bqkv[l]), row128(p["bo"][l]), row128(p["b1"][l]),
                 row128(p["b2"][l]), row128(p["ln1_g"][l]), row128(p["ln1_b"][l]),
                 row128(p["ln2_g"][l]), row128(p["ln2_b"][l])]
    bias_slab = jnp.concatenate(rows, axis=0).astype(jnp.float32)   # (21, 128)

    return {"bias": bias_slab, "w32": w32, "w64": w64,
            "wqkv": wqkv.astype(jnp.float32)}


# --------------------------------- full forward ------------------------------
def latent_embedding_addition_forward(x1, x2, packed):
    B = x1.shape[0]
    # x = stack([x1, x2], -1); value_to_idx, encode, to_model_dim, transformer,
    # from_model_dim and decode all happen inside the single fused kernel.
    # Token-major operand order: rows [x1 ; x2].
    xvals = jnp.concatenate([x1, x2], axis=0).reshape(2 * B, 1).astype(jnp.int32)
    return fused_forward(xvals, packed)


# ------------------------------------ main ------------------------------------
if __name__ == "__main__":
    key = jax.random.PRNGKey(0)
    kp, k1, k2 = jax.random.split(key, 3)
    params = init_params(kp)
    packed = pack_params(params)      # one-time weight restructuring (outside jit)

    B = 8
    x1 = jax.random.randint(k1, (B,), MIN_V, MAX_V // 2 + 1, dtype=jnp.int32)
    x2 = jax.random.randint(k2, (B,), MIN_V, MAX_V // 2 + 1, dtype=jnp.int32)

    fwd = jax.jit(latent_embedding_addition_forward)
    logits = fwd(x1, x2, packed)
    logits = jax.block_until_ready(logits)

    assert logits.shape == (B, VOCAB), logits.shape
    assert bool(jnp.all(jnp.isfinite(logits)))
    print("KERNEL_OK")
</pallas_src>

<mosaic_0001>
module attributes {stable_mosaic.version = 11 : i64} {
  func.func @addition_fused_kernel(%arg0: memref<16x1xi32, #tpu.memory_space<vmem>>, %arg1: memref<21x128xf32, #tpu.memory_space<vmem>>, %arg2: memref<448x32xf32, #tpu.memory_space<vmem>>, %arg3: memref<96x64xf32, #tpu.memory_space<vmem>>, %arg4: memref<2x32x96xf32, #tpu.memory_space<vmem>>, %arg5: memref<8x128xf32, #tpu.memory_space<vmem>>, %arg6: memref<128x32xf32, #tpu.memory_space<vmem>>, %arg7: memref<96x96xf32, #tpu.memory_space<vmem>>) attributes {dimension_semantics = [], scalar_prefetch = 0 : i64, scratch_operands = 2 : i64, tpu.core_type = #tpu.core_type<tc>} {
    %c0 = arith.constant 0 : index
    %c0_0 = arith.constant 0 : index
    %0 = vector.load %arg2[%c0, %c0_0] : memref<448x32xf32, #tpu.memory_space<vmem>>, vector<128x32xf32>
    %c0_1 = arith.constant 0 : index
    %c0_2 = arith.constant 0 : index
    %1 = vector.load %arg3[%c0_1, %c0_2] : memref<96x64xf32, #tpu.memory_space<vmem>>, vector<32x64xf32>
    %cst = arith.constant dense<0.000000e+00> : vector<128x64xf32>
    %2 = tpu.matmul %0, %1, %cst {dimension_numbers = #tpu.dot_dimension_numbers<[1], [0], [0], [1], [0, 0, 1, 1], [], []>} : vector<128x32xf32>, vector<32x64xf32>, vector<128x64xf32> -> vector<128x64xf32>
    %c0_3 = arith.constant 0 : index
    %c0_4 = arith.constant 0 : index
    %3 = vector.load %arg1[%c0_3, %c0_4] : memref<21x128xf32, #tpu.memory_space<vmem>>, vector<1x64xf32>
    %4 = vector.broadcast %3 : vector<1x64xf32> to vector<128x64xf32>
    %5 = arith.addf %2, %4 : vector<128x64xf32>
    %cst_5 = arith.constant 0.000000e+00 : f32
    %6 = vector.broadcast %cst_5 : f32 to vector<128x64xf32>
    %7 = arith.maximumf %5, %6 : vector<128x64xf32>
    %c128 = arith.constant 128 : index
    %c0_6 = arith.constant 0 : index
    %8 = vector.load %arg2[%c128, %c0_6] : memref<448x32xf32, #tpu.memory_space<vmem>>, vector<64x32xf32>
    %cst_7 = arith.constant dense<0.000000e+00> : vector<128x32xf32>
    %9 = tpu.matmul %7, %8, %cst_7 {dimension_numbers = #tpu.dot_dimension_numbers<[1], [0], [0], [1], [0, 0, 1, 1], [], []>} : vector<128x64xf32>, vector<64x32xf32>, vector<128x32xf32> -> vector<128x32xf32>
    %c1 = arith.constant 1 : index
    %c0_8 = arith.constant 0 : index
    %10 = vector.load %arg1[%c1, %c0_8] : memref<21x128xf32, #tpu.memory_space<vmem>>, vector<1x32xf32>
    %11 = vector.broadcast %10 : vector<1x32xf32> to vector<128x32xf32>
    %12 = arith.addf %9, %11 : vector<128x32xf32>
    %c0_9 = arith.constant 0 : index
    %c0_10 = arith.constant 0 : index
    %13 = vector.load %arg0[%c0_9, %c0_10] : memref<16x1xi32, #tpu.memory_space<vmem>>, vector<16x1xi32>
    %c0_i32 = arith.constant 0 : i32
    %14 = vector.broadcast %c0_i32 : i32 to vector<16x1xi32>
    %15 = arith.subi %13, %14 : vector<16x1xi32>
    %16 = tpu.iota {dimensions = array<i32: 1>} : vector<16x128xi32>
    %17 = vector.broadcast %15 : vector<16x1xi32> to vector<16x128xi32>
    %18 = arith.cmpi eq, %16, %17 : vector<16x128xi32>
    %19 = arith.extui %18 : vector<16x128xi1> to vector<16x128xi32>
    %20 = arith.sitofp %19 : vector<16x128xi32> to vector<16x128xf32>
    %cst_11 = arith.constant dense<0.000000e+00> : vector<16x32xf32>
    %21 = tpu.matmul %20, %12, %cst_11 {dimension_numbers = #tpu.dot_dimension_numbers<[1], [0], [0], [1], [0, 0, 1, 1], [], []>} : vector<16x128xf32>, vector<128x32xf32>, vector<16x32xf32> -> vector<16x32xf32>
    %c0_12 = arith.constant 0 : index
    %c0_13 = arith.constant 0 : index
    %22 = vector.load %arg6[%c0_12, %c0_13] : memref<128x32xf32, #tpu.memory_space<vmem>>, vector<128x32xf32>
    tpu.vector_store %arg6[%c0_12, %c0_13], %12 {strides = array<i32>} : memref<128x32xf32, #tpu.memory_space<vmem>>, vector<128x32xf32>,
    %c192 = arith.constant 192 : index
    %c0_14 = arith.constant 0 : index
    %23 = vector.load %arg2[%c192, %c0_14] : memref<448x32xf32, #tpu.memory_space<vmem>>, vector<32x32xf32>
    %cst_15 = arith.constant dense<0.000000e+00> : vector<16x32xf32>
    %24 = tpu.matmul %21, %23, %cst_15 {dimension_numbers = #tpu.dot_dimension_numbers<[1], [0], [0], [1], [0, 0, 1, 1], [], []>} : vector<16x32xf32>, vector<32x32xf32>, vector<16x32xf32> -> vector<16x32xf32>
    %c2 = arith.constant 2 : index
    %c0_16 = arith.constant 0 : index
    %25 = vector.load %arg1[%c2, %c0_16] : memref<21x128xf32, #tpu.memory_space<vmem>>, vector<1x32xf32>
    %26 = vector.broadcast %25 : vector<1x32xf32> to vector<16x32xf32>
    %27 = arith.addf %24, %26 : vector<16x32xf32>
    %c3 = arith.constant 3 : index
    %c0_17 = arith.constant 0 : index
    %28 = vector.load %arg1[%c3, %c0_17] : memref<21x128xf32, #tpu.memory_space<vmem>>, vector<1x32xf32>
    %29 = vector.shape_cast %28 : vector<1x32xf32> to vector<1x32xf32>
    %30 = vector.broadcast %29 : vector<1x32xf32> to vector<8x32xf32>
    %31 = tpu.concatenate %27, %30 in 0 : vector<16x32xf32>, vector<8x32xf32> -> vector<24x32xf32>
    %32 = tpu.iota {dimensions = array<i32: 0>} : vector<96x96xi32>
    %33 = tpu.iota {dimensions = array<i32: 1>} : vector<96x96xi32>
    %c0_i32_18 = arith.constant 0 : i32
    %34 = vector.broadcast %c0_i32_18 : i32 to vector<96x96xi32>
    %c24_i32 = arith.constant 24 : i32
    %35 = vector.broadcast %c24_i32 : i32 to vector<96x96xi32>
    %36 = arith.cmpi sge, %32, %35 : vector<96x96xi32>
    %37 = arith.extui %36 : vector<96x96xi1> to vector<96x96xi32>
    %38 = arith.addi %34, %37 : vector<96x96xi32>
    %c48_i32 = arith.constant 48 : i32
    %39 = vector.broadcast %c48_i32 : i32 to vector<96x96xi32>
    %40 = arith.cmpi sge, %32, %39 : vector<96x96xi32>
    %41 = arith.extui %40 : vector<96x96xi1> to vector<96x96xi32>
    %42 = arith.addi %38, %41 : vector<96x96xi32>
    %c72_i32 = arith.constant 72 : i32
    %43 = vector.broadcast %c72_i32 : i32 to vector<96x96xi32>
    %44 = arith.cmpi sge, %32, %43 : vector<96x96xi32>
    %45 = arith.extui %44 : vector<96x96xi1> to vector<96x96xi32>
    %46 = arith.addi %42, %45 : vector<96x96xi32>
    %c0_i32_19 = arith.constant 0 : i32
    %47 = vector.broadcast %c0_i32_19 : i32 to vector<96x96xi32>
    %c24_i32_20 = arith.constant 24 : i32
    %48 = vector.broadcast %c24_i32_20 : i32 to vector<96x96xi32>
    %49 = arith.cmpi sge, %33, %48 : vector<96x96xi32>
    %50 = arith.extui %49 : vector<96x96xi1> to vector<96x96xi32>
    %51 = arith.addi %47, %50 : vector<96x96xi32>
    %c48_i32_21 = arith.constant 48 : i32
    %52 = vector.broadcast %c48_i32_21 : i32 to vector<96x96xi32>
    %53 = arith.cmpi sge, %33, %52 : vector<96x96xi32>
    %54 = arith.extui %53 : vector<96x96xi1> to vector<96x96xi32>
    %55 = arith.addi %51, %54 : vector<96x96xi32>
    %c72_i32_22 = arith.constant 72 : i32
    %56 = vector.broadcast %c72_i32_22 : i32 to vector<96x96xi32>
    %57 = arith.cmpi sge, %33, %56 : vector<96x96xi32>
    %58 = arith.extui %57 : vector<96x96xi1> to vector<96x96xi32>
    %59 = arith.addi %55, %58 : vector<96x96xi32>
    %60 = arith.cmpi eq, %46, %59 : vector<96x96xi32>
    %61 = arith.subi %32, %33 : vector<96x96xi32>
    %c0_i32_23 = arith.constant 0 : i32
    %62 = vector.broadcast %c0_i32_23 : i32 to vector<96x96xi32>
    %63 = arith.cmpi eq, %61, %62 : vector<96x96xi32>
    %c8_i32 = arith.constant 8 : i32
    %64 = vector.broadcast %c8_i32 : i32 to vector<96x96xi32>
    %65 = arith.cmpi eq, %61, %64 : vector<96x96xi32>
    %66 = arith.ori %63, %65 : vector<96x96xi1>
    %c-8_i32 = arith.constant -8 : i32
    %67 = vector.broadcast %c-8_i32 : i32 to vector<96x96xi32>
    %68 = arith.cmpi eq, %61, %67 : vector<96x96xi32>
    %69 = arith.ori %66, %68 : vector<96x96xi1>
    %c16_i32 = arith.constant 16 : i32
    %70 = vector.broadcast %c16_i32 : i32 to vector<96x96xi32>
    %71 = arith.cmpi eq, %61, %70 : vector<96x96xi32>
    %72 = arith.ori %69, %71 : vector<96x96xi1>
    %c-16_i32 = arith.constant -16 : i32
    %73 = vector.broadcast %c-16_i32 : i32 to vector<96x96xi32>
    %74 = arith.cmpi eq, %61, %73 : vector<96x96xi32>
    %75 = arith.ori %72, %74 : vector<96x96xi1>
    %76 = arith.andi %60, %75 : vector<96x96xi1>
    %cst_24 = arith.constant 0.000000e+00 : f32
    %cst_25 = arith.constant -1.000000e+30 : f32
    %77 = vector.broadcast %cst_24 : f32 to vector<96x96xf32>
    %78 = vector.broadcast %cst_25 : f32 to vector<96x96xf32>
    %79 = arith.select %76, %77, %78 : vector<96x96xi1>, vector<96x96xf32>
    %c0_26 = arith.constant 0 : index
    %c0_27 = arith.constant 0 : index
    %80 = vector.load %arg7[%c0_26, %c0_27] : memref<96x96xf32, #tpu.memory_space<vmem>>, vector<96x96xf32>
    tpu.vector_store %arg7[%c0_26, %c0_27], %79 {strides = array<i32>} : memref<96x96xf32, #tpu.memory_space<vmem>>, vector<96x96xf32>,
    %c0_28 = arith.constant 0 : index
    %c0_29 = arith.constant 0 : index
    %c0_30 = arith.constant 0 : index
    %81 = vector.load %arg4[%c0_28, %c0_29, %c0_30] : memref<2x32x96xf32, #tpu.memory_space<vmem>>, vector<1x32x96xf32>
    %82 = vector.shape_cast %81 : vector<1x32x96xf32> to vector<32x96xf32>
    %cst_31 = arith.constant dense<0.000000e+00> : vector<24x96xf32>
    %83 = tpu.matmul %31, %82, %cst_31 {dimension_numbers = #tpu.dot_dimension_numbers<[1], [0], [0], [1], [0, 0, 1, 1], [], []>} : vector<24x32xf32>, vector<32x96xf32>, vector<24x96xf32> -> vector<24x96xf32>
    %c5 = arith.constant 5 : index
    %c0_32 = arith.constant 0 : index
    %84 = vector.load %arg1[%c5, %c0_32] : memref<21x128xf32, #tpu.memory_space<vmem>>, vector<1x96xf32>
    %85 = vector.broadcast %84 : vector<1x96xf32> to vector<24x96xf32>
    %86 = arith.addf %83, %85 : vector<24x96xf32>
    %87 = vector.extract_strided_slice %86 {offsets = [0, 0], sizes = [24, 24], strides = [1, 1]} : vector<24x96xf32> to vector<24x24xf32>
    %88 = vector.extract_strided_slice %86 {offsets = [0, 24], sizes = [24, 24], strides = [1, 1]} : vector<24x96xf32> to vector<24x24xf32>
    %89 = vector.extract_strided_slice %86 {offsets = [0, 48], sizes = [24, 24], strides = [1, 1]} : vector<24x96xf32> to vector<24x24xf32>
    %90 = vector.extract_strided_slice %86 {offsets = [0, 72], sizes = [24, 24], strides = [1, 1]} : vector<24x96xf32> to vector<24x24xf32>
    %91 = tpu.concatenate %87, %88, %89, %90 in 0 : vector<24x24xf32>, vector<24x24xf32>, vector<24x24xf32>, vector<24x24xf32> -> vector<96x24xf32>
    %92 = vector.extract_strided_slice %91 {offsets = [0, 0], sizes = [96, 8], strides = [1, 1]} : vector<96x24xf32> to vector<96x8xf32>
    %93 = vector.extract_strided_slice %91 {offsets = [0, 8], sizes = [96, 8], strides = [1, 1]} : vector<96x24xf32> to vector<96x8xf32>
    %94 = vector.extract_strided_slice %91 {offsets = [0, 16], sizes = [96, 8], strides = [1, 1]} : vector<96x24xf32> to vector<96x8xf32>
    %cst_33 = arith.constant dense<0.000000e+00> : vector<96x96xf32>
    %95 = tpu.matmul %92, %93, %cst_33 {dimension_numbers = #tpu.dot_dimension_numbers<[1], [1], [0], [0], [0, 0, 1, 0], [], []>} : vector<96x8xf32>, vector<96x8xf32>, vector<96x96xf32> -> vector<96x96xf32>
    %c0_34 = arith.constant 0 : index
    %c0_35 = arith.constant 0 : index
    %96 = vector.load %arg7[%c0_34, %c0_35] : memref<96x96xf32, #tpu.memory_space<vmem>>, vector<96x96xf32>
    %97 = arith.addf %95, %96 : vector<96x96xf32>
    %cst_36 = arith.constant dense<0xFF800000> : vector<96xf32>
    %98 = vector.multi_reduction <maximumf>, %97, %cst_36 [1] : vector<96x96xf32> to vector<96xf32>
    %99 = vector.shape_cast %98 : vector<96xf32> to vector<96x1xf32>
    %100 = vector.broadcast %99 : vector<96x1xf32> to vector<96x96xf32>
    %101 = arith.subf %97, %100 : vector<96x96xf32>
    %cst_37 = arith.constant 0.353553385 : f32
    %102 = vector.broadcast %cst_37 : f32 to vector<96x96xf32>
    %103 = arith.mulf %101, %102 : vector<96x96xf32>
    %104 = math.exp %103 : vector<96x96xf32>
    %cst_38 = arith.constant dense<0.000000e+00> : vector<96xf32>
    %105 = vector.multi_reduction <add>, %104, %cst_38 [1] : vector<96x96xf32> to vector<96xf32>
    %106 = vector.shape_cast %105 : vector<96xf32> to vector<96x1xf32>
    %107 = tpu.reciprocal %106 {approx = true} : vector<96x1xf32> -> vector<96x1xf32>
    %108 = vector.broadcast %107 : vector<96x1xf32> to vector<96x96xf32>
    %109 = arith.mulf %104, %108 : vector<96x96xf32>
    %cst_39 = arith.constant dense<0.000000e+00> : vector<96x8xf32>
    %110 = tpu.matmul %109, %94, %cst_39 {dimension_numbers = #tpu.dot_dimension_numbers<[1], [0], [0], [1], [0, 0, 1, 1], [], []>} : vector<96x96xf32>, vector<96x8xf32>, vector<96x8xf32> -> vector<96x8xf32>
    %111 = vector.extract_strided_slice %110 {offsets = [0, 0], sizes = [24, 8], strides = [1, 1]} : vector<96x8xf32> to vector<24x8xf32>
    %112 = vector.extract_strided_slice %110 {offsets = [24, 0], sizes = [24, 8], strides = [1, 1]} : vector<96x8xf32> to vector<24x8xf32>
    %113 = vector.extract_strided_slice %110 {offsets = [48, 0], sizes = [24, 8], strides = [1, 1]} : vector<96x8xf32> to vector<24x8xf32>
    %114 = vector.extract_strided_slice %110 {offsets = [72, 0], sizes = [24, 8], strides = [1, 1]} : vector<96x8xf32> to vector<24x8xf32>
    %115 = tpu.concatenate %111, %112, %113, %114 in 1 : vector<24x8xf32>, vector<24x8xf32>, vector<24x8xf32>, vector<24x8xf32> -> vector<24x32xf32>
    %c384 = arith.constant 384 : index
    %c0_40 = arith.constant 0 : index
    %116 = vector.load %arg2[%c384, %c0_40] : memref<448x32xf32, #tpu.memory_space<vmem>>, vector<32x32xf32>
    %cst_41 = arith.constant dense<0.000000e+00> : vector<24x32xf32>
    %117 = tpu.matmul %115, %116, %cst_41 {dimension_numbers = #tpu.dot_dimension_numbers<[1], [0], [0], [1], [0, 0, 1, 1], [], []>} : vector<24x32xf32>, vector<32x32xf32>, vector<24x32xf32> -> vector<24x32xf32>
    %c6 = arith.constant 6 : index
    %c0_42 = arith.constant 0 : index
    %118 = vector.load %arg1[%c6, %c0_42] : memref<21x128xf32, #tpu.memory_space<vmem>>, vector<1x32xf32>
    %119 = vector.broadcast %118 : vector<1x32xf32> to vector<24x32xf32>
    %120 = arith.addf %117, %119 : vector<24x32xf32>
    %121 = arith.addf %31, %120 : vector<24x32xf32>
    %c9 = arith.constant 9 : index
    %c0_43 = arith.constant 0 : index
    %122 = vector.load %arg1[%c9, %c0_43] : memref<21x128xf32, #tpu.memory_space<vmem>>, vector<1x32xf32>
    %c10 = arith.constant 10 : index
    %c0_44 = arith.constant 0 : index
    %123 = vector.load %arg1[%c10, %c0_44] : memref<21x128xf32, #tpu.memory_space<vmem>>, vector<1x32xf32>
    %cst_45 = arith.constant dense<0.000000e+00> : vector<24xf32>
    %124 = vector.multi_reduction <add>, %121, %cst_45 [1] : vector<24x32xf32> to vector<24xf32>
    %125 = vector.shape_cast %124 : vector<24xf32> to vector<24x1xf32>
    %cst_46 = arith.constant 3.200000e+01 : f32
    %126 = vector.broadcast %cst_46 : f32 to vector<24x1xf32>
    %127 = arith.divf %125, %126 : vector<24x1xf32>
    %128 = arith.mulf %121, %121 : vector<24x32xf32>
    %cst_47 = arith.constant dense<0.000000e+00> : vector<24xf32>
    %129 = vector.multi_reduction <add>, %128, %cst_47 [1] : vector<24x32xf32> to vector<24xf32>
    %130 = vector.shape_cast %129 : vector<24xf32> to vector<24x1xf32>
    %cst_48 = arith.constant 3.200000e+01 : f32
    %131 = vector.broadcast %cst_48 : f32 to vector<24x1xf32>
    %132 = arith.divf %130, %131 : vector<24x1xf32>
    %133 = arith.mulf %127, %127 : vector<24x1xf32>
    %134 = arith.subf %132, %133 : vector<24x1xf32>
    %135 = vector.broadcast %127 : vector<24x1xf32> to vector<24x32xf32>
    %136 = arith.subf %121, %135 : vector<24x32xf32>
    %cst_49 = arith.constant 9.99999974E-6 : f32
    %137 = vector.broadcast %cst_49 : f32 to vector<24x1xf32>
    %138 = arith.addf %134, %137 : vector<24x1xf32>
    %139 = math.rsqrt %138 : vector<24x1xf32>
    %140 = vector.broadcast %139 : vector<24x1xf32> to vector<24x32xf32>
    %141 = arith.mulf %136, %140 : vector<24x32xf32>
    %142 = vector.broadcast %122 : vector<1x32xf32> to vector<24x32xf32>
    %143 = arith.mulf %141, %142 : vector<24x32xf32>
    %144 = vector.broadcast %123 : vector<1x32xf32> to vector<24x32xf32>
    %145 = arith.addf %143, %144 : vector<24x32xf32>
    %c32 = arith.constant 32 : index
    %c0_50 = arith.constant 0 : index
    %146 = vector.load %arg3[%c32, %c0_50] : memref<96x64xf32, #tpu.memory_space<vmem>>, vector<32x64xf32>
    %cst_51 = arith.constant dense<0.000000e+00> : vector<24x64xf32>
    %147 = tpu.matmul %145, %146, %cst_51 {dimension_numbers = #tpu.dot_dimension_numbers<[1], [0], [0], [1], [0, 0, 1, 1], [], []>} : vector<24x32xf32>, vector<32x64xf32>, vector<24x64xf32> -> vector<24x64xf32>
    %c7 = arith.constant 7 : index
    %c0_52 = arith.constant 0 : index
    %148 = vector.load %arg1[%c7, %c0_52] : memref<21x128xf32, #tpu.memory_space<vmem>>, vector<1x64xf32>
    %149 = vector.broadcast %148 : vector<1x64xf32> to vector<24x64xf32>
    %150 = arith.addf %147, %149 : vector<24x64xf32>
    %cst_53 = arith.constant 0.000000e+00 : f32
    %151 = vector.broadcast %cst_53 : f32 to vector<24x64xf32>
    %152 = arith.maximumf %150, %151 : vector<24x64xf32>
    %c256 = arith.constant 256 : index
    %c0_54 = arith.constant 0 : index
    %153 = vector.load %arg2[%c256, %c0_54] : memref<448x32xf32, #tpu.memory_space<vmem>>, vector<64x32xf32>
    %cst_55 = arith.constant dense<0.000000e+00> : vector<24x32xf32>
    %154 = tpu.matmul %152, %153, %cst_55 {dimension_numbers = #tpu.dot_dimension_numbers<[1], [0], [0], [1], [0, 0, 1, 1], [], []>} : vector<24x64xf32>, vector<64x32xf32>, vector<24x32xf32> -> vector<24x32xf32>
    %c8 = arith.constant 8 : index
    %c0_56 = arith.constant 0 : index
    %155 = vector.load %arg1[%c8, %c0_56] : memref<21x128xf32, #tpu.memory_space<vmem>>, vector<1x32xf32>
    %156 = vector.broadcast %155 : vector<1x32xf32> to vector<24x32xf32>
    %157 = arith.addf %154, %156 : vector<24x32xf32>
    %158 = arith.addf %145, %157 : vector<24x32xf32>
    %c11 = arith.constant 11 : index
    %c0_57 = arith.constant 0 : index
    %159 = vector.load %arg1[%c11, %c0_57] : memref<21x128xf32, #tpu.memory_space<vmem>>, vector<1x32xf32>
    %c12 = arith.constant 12 : index
    %c0_58 = arith.constant 0 : index
    %160 = vector.load %arg1[%c12, %c0_58] : memref<21x128xf32, #tpu.memory_space<vmem>>, vector<1x32xf32>
    %cst_59 = arith.constant dense<0.000000e+00> : vector<24xf32>
    %161 = vector.multi_reduction <add>, %158, %cst_59 [1] : vector<24x32xf32> to vector<24xf32>
    %162 = vector.shape_cast %161 : vector<24xf32> to vector<24x1xf32>
    %cst_60 = arith.constant 3.200000e+01 : f32
    %163 = vector.broadcast %cst_60 : f32 to vector<24x1xf32>
    %164 = arith.divf %162, %163 : vector<24x1xf32>
    %165 = arith.mulf %158, %158 : vector<24x32xf32>
    %cst_61 = arith.constant dense<0.000000e+00> : vector<24xf32>
    %166 = vector.multi_reduction <add>, %165, %cst_61 [1] : vector<24x32xf32> to vector<24xf32>
    %167 = vector.shape_cast %166 : vector<24xf32> to vector<24x1xf32>
    %cst_62 = arith.constant 3.200000e+01 : f32
    %168 = vector.broadcast %cst_62 : f32 to vector<24x1xf32>
    %169 = arith.divf %167, %168 : vector<24x1xf32>
    %170 = arith.mulf %164, %164 : vector<24x1xf32>
    %171 = arith.subf %169, %170 : vector<24x1xf32>
    %172 = vector.broadcast %164 : vector<24x1xf32> to vector<24x32xf32>
    %173 = arith.subf %158, %172 : vector<24x32xf32>
    %cst_63 = arith.constant 9.99999974E-6 : f32
    %174 = vector.broadcast %cst_63 : f32 to vector<24x1xf32>
    %175 = arith.addf %171, %174 : vector<24x1xf32>
    %176 = math.rsqrt %175 : vector<24x1xf32>
    %177 = vector.broadcast %176 : vector<24x1xf32> to vector<24x32xf32>
    %178 = arith.mulf %173, %177 : vector<24x32xf32>
    %179 = vector.broadcast %159 : vector<1x32xf32> to vector<24x32xf32>
    %180 = arith.mulf %178, %179 : vector<24x32xf32>
    %181 = vector.broadcast %160 : vector<1x32xf32> to vector<24x32xf32>
    %182 = arith.addf %180, %181 : vector<24x32xf32>
    %c1_64 = arith.constant 1 : index
    %c0_65 = arith.constant 0 : index
    %c0_66 = arith.constant 0 : index
    %183 = vector.load %arg4[%c1_64, %c0_65, %c0_66] : memref<2x32x96xf32, #tpu.memory_space<vmem>>, vector<1x32x96xf32>
    %184 = vector.shape_cast %183 : vector<1x32x96xf32> to vector<32x96xf32>
    %cst_67 = arith.constant dense<0.000000e+00> : vector<24x96xf32>
    %185 = tpu.matmul %182, %184, %cst_67 {dimension_numbers = #tpu.dot_dimension_numbers<[1], [0], [0], [1], [0, 0, 1, 1], [], []>} : vector<24x32xf32>, vector<32x96xf32>, vector<24x96xf32> -> vector<24x96xf32>
    %c13 = arith.constant 13 : index
    %c0_68 = arith.constant 0 : index
    %186 = vector.load %arg1[%c13, %c0_68] : memref<21x128xf32, #tpu.memory_space<vmem>>, vector<1x96xf32>
    %187 = vector.broadcast %186 : vector<1x96xf32> to vector<24x96xf32>
    %188 = arith.addf %185, %187 : vector<24x96xf32>
    %189 = vector.extract_strided_slice %188 {offsets = [0, 0], sizes = [24, 24], strides = [1, 1]} : vector<24x96xf32> to vector<24x24xf32>
    %190 = vector.extract_strided_slice %188 {offsets = [0, 24], sizes = [24, 24], strides = [1, 1]} : vector<24x96xf32> to vector<24x24xf32>
    %191 = vector.extract_strided_slice %188 {offsets = [0, 48], sizes = [24, 24], strides = [1, 1]} : vector<24x96xf32> to vector<24x24xf32>
    %192 = vector.extract_strided_slice %188 {offsets = [0, 72], sizes = [24, 24], strides = [1, 1]} : vector<24x96xf32> to vector<24x24xf32>
    %193 = tpu.concatenate %189, %190, %191, %192 in 0 : vector<24x24xf32>, vector<24x24xf32>, vector<24x24xf32>, vector<24x24xf32> -> vector<96x24xf32>
    %194 = vector.extract_strided_slice %193 {offsets = [0, 0], sizes = [96, 8], strides = [1, 1]} : vector<96x24xf32> to vector<96x8xf32>
    %195 = vector.extract_strided_slice %193 {offsets = [0, 8], sizes = [96, 8], strides = [1, 1]} : vector<96x24xf32> to vector<96x8xf32>
    %196 = vector.extract_strided_slice %193 {offsets = [0, 16], sizes = [96, 8], strides = [1, 1]} : vector<96x24xf32> to vector<96x8xf32>
    %cst_69 = arith.constant dense<0.000000e+00> : vector<96x96xf32>
    %197 = tpu.matmul %194, %195, %cst_69 {dimension_numbers = #tpu.dot_dimension_numbers<[1], [1], [0], [0], [0, 0, 1, 0], [], []>} : vector<96x8xf32>, vector<96x8xf32>, vector<96x96xf32> -> vector<96x96xf32>
    %c0_70 = arith.constant 0 : index
    %c0_71 = arith.constant 0 : index
    %198 = vector.load %arg7[%c0_70, %c0_71] : memref<96x96xf32, #tpu.memory_space<vmem>>, vector<96x96xf32>
    %199 = arith.addf %197, %198 : vector<96x96xf32>
    %cst_72 = arith.constant dense<0xFF800000> : vector<96xf32>
    %200 = vector.multi_reduction <maximumf>, %199, %cst_72 [1] : vector<96x96xf32> to vector<96xf32>
    %201 = vector.shape_cast %200 : vector<96xf32> to vector<96x1xf32>
    %202 = vector.broadcast %201 : vector<96x1xf32> to vector<96x96xf32>
    %203 = arith.subf %199, %202 : vector<96x96xf32>
    %cst_73 = arith.constant 0.353553385 : f32
    %204 = vector.broadcast %cst_73 : f32 to vector<96x96xf32>
    %205 = arith.mulf %203, %204 : vector<96x96xf32>
    %206 = math.exp %205 : vector<96x96xf32>
    %cst_74 = arith.constant dense<0.000000e+00> : vector<96xf32>
    %207 = vector.multi_reduction <add>, %206, %cst_74 [1] : vector<96x96xf32> to vector<96xf32>
    %208 = vector.shape_cast %207 : vector<96xf32> to vector<96x1xf32>
    %209 = tpu.reciprocal %208 {approx = true} : vector<96x1xf32> -> vector<96x1xf32>
    %210 = vector.broadcast %209 : vector<96x1xf32> to vector<96x96xf32>
    %211 = arith.mulf %206, %210 : vector<96x96xf32>
    %cst_75 = arith.constant dense<0.000000e+00> : vector<96x8xf32>
    %212 = tpu.matmul %211, %196, %cst_75 {dimension_numbers = #tpu.dot_dimension_numbers<[1], [0], [0], [1], [0, 0, 1, 1], [], []>} : vector<96x96xf32>, vector<96x8xf32>, vector<96x8xf32> -> vector<96x8xf32>
    %213 = vector.extract_strided_slice %212 {offsets = [0, 0], sizes = [24, 8], strides = [1, 1]} : vector<96x8xf32> to vector<24x8xf32>
    %214 = vector.extract_strided_slice %212 {offsets = [24, 0], sizes = [24, 8], strides = [1, 1]} : vector<96x8xf32> to vector<24x8xf32>
    %215 = vector.extract_strided_slice %212 {offsets = [48, 0], sizes = [24, 8], strides = [1, 1]} : vector<96x8xf32> to vector<24x8xf32>
    %216 = vector.extract_strided_slice %212 {offsets = [72, 0], sizes = [24, 8], strides = [1, 1]} : vector<96x8xf32> to vector<24x8xf32>
    %217 = tpu.concatenate %213, %214, %215, %216 in 1 : vector<24x8xf32>, vector<24x8xf32>, vector<24x8xf32>, vector<24x8xf32> -> vector<24x32xf32>
    %c416 = arith.constant 416 : index
    %c0_76 = arith.constant 0 : index
    %218 = vector.load %arg2[%c416, %c0_76] : memref<448x32xf32, #tpu.memory_space<vmem>>, vector<32x32xf32>
    %cst_77 = arith.constant dense<0.000000e+00> : vector<24x32xf32>
    %219 = tpu.matmul %217, %218, %cst_77 {dimension_numbers = #tpu.dot_dimension_numbers<[1], [0], [0], [1], [0, 0, 1, 1], [], []>} : vector<24x32xf32>, vector<32x32xf32>, vector<24x32xf32> -> vector<24x32xf32>
    %c14 = arith.constant 14 : index
    %c0_78 = arith.constant 0 : index
    %220 = vector.load %arg1[%c14, %c0_78] : memref<21x128xf32, #tpu.memory_space<vmem>>, vector<1x32xf32>
    %221 = vector.broadcast %220 : vector<1x32xf32> to vector<24x32xf32>
    %222 = arith.addf %219, %221 : vector<24x32xf32>
    %223 = arith.addf %182, %222 : vector<24x32xf32>
    %c17 = arith.constant 17 : index
    %c0_79 = arith.constant 0 : index
    %224 = vector.load %arg1[%c17, %c0_79] : memref<21x128xf32, #tpu.memory_space<vmem>>, vector<1x32xf32>
    %c18 = arith.constant 18 : index
    %c0_80 = arith.constant 0 : index
    %225 = vector.load %arg1[%c18, %c0_80] : memref<21x128xf32, #tpu.memory_space<vmem>>, vector<1x32xf32>
    %cst_81 = arith.constant dense<0.000000e+00> : vector<24xf32>
    %226 = vector.multi_reduction <add>, %223, %cst_81 [1] : vector<24x32xf32> to vector<24xf32>
    %227 = vector.shape_cast %226 : vector<24xf32> to vector<24x1xf32>
    %cst_82 = arith.constant 3.200000e+01 : f32
    %228 = vector.broadcast %cst_82 : f32 to vector<24x1xf32>
    %229 = arith.divf %227, %228 : vector<24x1xf32>
    %230 = arith.mulf %223, %223 : vector<24x32xf32>
    %cst_83 = arith.constant dense<0.000000e+00> : vector<24xf32>
    %231 = vector.multi_reduction <add>, %230, %cst_83 [1] : vector<24x32xf32> to vector<24xf32>
    %232 = vector.shape_cast %231 : vector<24xf32> to vector<24x1xf32>
    %cst_84 = arith.constant 3.200000e+01 : f32
    %233 = vector.broadcast %cst_84 : f32 to vector<24x1xf32>
    %234 = arith.divf %232, %233 : vector<24x1xf32>
    %235 = arith.mulf %229, %229 : vector<24x1xf32>
    %236 = arith.subf %234, %235 : vector<24x1xf32>
    %237 = vector.broadcast %229 : vector<24x1xf32> to vector<24x32xf32>
    %238 = arith.subf %223, %237 : vector<24x32xf32>
    %cst_85 = arith.constant 9.99999974E-6 : f32
    %239 = vector.broadcast %cst_85 : f32 to vector<24x1xf32>
    %240 = arith.addf %236, %239 : vector<24x1xf32>
    %241 = math.rsqrt %240 : vector<24x1xf32>
    %242 = vector.broadcast %241 : vector<24x1xf32> to vector<24x32xf32>
    %243 = arith.mulf %238, %242 : vector<24x32xf32>
    %244 = vector.broadcast %224 : vector<1x32xf32> to vector<24x32xf32>
    %245 = arith.mulf %243, %244 : vector<24x32xf32>
    %246 = vector.broadcast %225 : vector<1x32xf32> to vector<24x32xf32>
    %247 = arith.addf %245, %246 : vector<24x32xf32>
    %c64 = arith.constant 64 : index
    %c0_86 = arith.constant 0 : index
    %248 = vector.load %arg3[%c64, %c0_86] : memref<96x64xf32, #tpu.memory_space<vmem>>, vector<32x64xf32>
    %cst_87 = arith.constant dense<0.000000e+00> : vector<24x64xf32>
    %249 = tpu.matmul %247, %248, %cst_87 {dimension_numbers = #tpu.dot_dimension_numbers<[1], [0], [0], [1], [0, 0, 1, 1], [], []>} : vector<24x32xf32>, vector<32x64xf32>, vector<24x64xf32> -> vector<24x64xf32>
    %c15 = arith.constant 15 : index
    %c0_88 = arith.constant 0 : index
    %250 = vector.load %arg1[%c15, %c0_88] : memref<21x128xf32, #tpu.memory_space<vmem>>, vector<1x64xf32>
    %251 = vector.broadcast %250 : vector<1x64xf32> to vector<24x64xf32>
    %252 = arith.addf %249, %251 : vector<24x64xf32>
    %cst_89 = arith.constant 0.000000e+00 : f32
    %253 = vector.broadcast %cst_89 : f32 to vector<24x64xf32>
    %254 = arith.maximumf %252, %253 : vector<24x64xf32>
    %c320 = arith.constant 320 : index
    %c0_90 = arith.constant 0 : index
    %255 = vector.load %arg2[%c320, %c0_90] : memref<448x32xf32, #tpu.memory_space<vmem>>, vector<64x32xf32>
    %cst_91 = arith.constant dense<0.000000e+00> : vector<24x32xf32>
    %256 = tpu.matmul %254, %255, %cst_91 {dimension_numbers = #tpu.dot_dimension_numbers<[1], [0], [0], [1], [0, 0, 1, 1], [], []>} : vector<24x64xf32>, vector<64x32xf32>, vector<24x32xf32> -> vector<24x32xf32>
    %c16 = arith.constant 16 : index
    %c0_92 = arith.constant 0 : index
    %257 = vector.load %arg1[%c16, %c0_92] : memref<21x128xf32, #tpu.memory_space<vmem>>, vector<1x32xf32>
    %258 = vector.broadcast %257 : vector<1x32xf32> to vector<24x32xf32>
    %259 = arith.addf %256, %258 : vector<24x32xf32>
    %260 = arith.addf %247, %259 : vector<24x32xf32>
    %c19 = arith.constant 19 : index
    %c0_93 = arith.constant 0 : index
    %261 = vector.load %arg1[%c19, %c0_93] : memref<21x128xf32, #tpu.memory_space<vmem>>, vector<1x32xf32>
    %c20 = arith.constant 20 : index
    %c0_94 = arith.constant 0 : index
    %262 = vector.load %arg1[%c20, %c0_94] : memref<21x128xf32, #tpu.memory_space<vmem>>, vector<1x32xf32>
    %cst_95 = arith.constant dense<0.000000e+00> : vector<24xf32>
    %263 = vector.multi_reduction <add>, %260, %cst_95 [1] : vector<24x32xf32> to vector<24xf32>
    %264 = vector.shape_cast %263 : vector<24xf32> to vector<24x1xf32>
    %cst_96 = arith.constant 3.200000e+01 : f32
    %265 = vector.broadcast %cst_96 : f32 to vector<24x1xf32>
    %266 = arith.divf %264, %265 : vector<24x1xf32>
    %267 = arith.mulf %260, %260 : vector<24x32xf32>
    %cst_97 = arith.constant dense<0.000000e+00> : vector<24xf32>
    %268 = vector.multi_reduction <add>, %267, %cst_97 [1] : vector<24x32xf32> to vector<24xf32>
    %269 = vector.shape_cast %268 : vector<24xf32> to vector<24x1xf32>
    %cst_98 = arith.constant 3.200000e+01 : f32
    %270 = vector.broadcast %cst_98 : f32 to vector<24x1xf32>
    %271 = arith.divf %269, %270 : vector<24x1xf32>
    %272 = arith.mulf %266, %266 : vector<24x1xf32>
    %273 = arith.subf %271, %272 : vector<24x1xf32>
    %274 = vector.broadcast %266 : vector<24x1xf32> to vector<24x32xf32>
    %275 = arith.subf %260, %274 : vector<24x32xf32>
    %cst_99 = arith.constant 9.99999974E-6 : f32
    %276 = vector.broadcast %cst_99 : f32 to vector<24x1xf32>
    %277 = arith.addf %273, %276 : vector<24x1xf32>
    %278 = math.rsqrt %277 : vector<24x1xf32>
    %279 = vector.broadcast %278 : vector<24x1xf32> to vector<24x32xf32>
    %280 = arith.mulf %275, %279 : vector<24x32xf32>
    %281 = vector.broadcast %261 : vector<1x32xf32> to vector<24x32xf32>
    %282 = arith.mulf %280, %281 : vector<24x32xf32>
    %283 = vector.broadcast %262 : vector<1x32xf32> to vector<24x32xf32>
    %284 = arith.addf %282, %283 : vector<24x32xf32>
    %285 = vector.extract_strided_slice %284 {offsets = [16, 0], sizes = [8, 32], strides = [1, 1]} : vector<24x32xf32> to vector<8x32xf32>
    %c224 = arith.constant 224 : index
    %c0_100 = arith.constant 0 : index
    %286 = vector.load %arg2[%c224, %c0_100] : memref<448x32xf32, #tpu.memory_space<vmem>>, vector<32x32xf32>
    %cst_101 = arith.constant dense<0.000000e+00> : vector<8x32xf32>
    %287 = tpu.matmul %285, %286, %cst_101 {dimension_numbers = #tpu.dot_dimension_numbers<[1], [0], [0], [1], [0, 0, 1, 1], [], []>} : vector<8x32xf32>, vector<32x32xf32>, vector<8x32xf32> -> vector<8x32xf32>
    %c4 = arith.constant 4 : index
    %c0_102 = arith.constant 0 : index
    %288 = vector.load %arg1[%c4, %c0_102] : memref<21x128xf32, #tpu.memory_space<vmem>>, vector<1x32xf32>
    %289 = vector.broadcast %288 : vector<1x32xf32> to vector<8x32xf32>
    %290 = arith.addf %287, %289 : vector<8x32xf32>
    %c0_103 = arith.constant 0 : index
    %c0_104 = arith.constant 0 : index
    %291 = vector.load %arg6[%c0_103, %c0_104] : memref<128x32xf32, #tpu.memory_space<vmem>>, vector<128x32xf32>
    %cst_105 = arith.constant dense<0.000000e+00> : vector<8x128xf32>
    %292 = tpu.matmul %290, %291, %cst_105 {dimension_numbers = #tpu.dot_dimension_numbers<[1], [1], [0], [0], [0, 0, 1, 0], [], []>} : vector<8x32xf32>, vector<128x32xf32>, vector<8x128xf32> -> vector<8x128xf32>
    %c0_106 = arith.constant 0 : index
    %c0_107 = arith.constant 0 : index
    %293 = vector.load %arg5[%c0_106, %c0_107] : memref<8x128xf32, #tpu.memory_space<vmem>>, vector<8x128xf32>
    tpu.vector_store %arg5[%c0_106, %c0_107], %292 {strides = array<i32>} : memref<8x128xf32, #tpu.memory_space<vmem>>, vector<8x128xf32>,
    return
  }
}

</mosaic_0001>

<bundles_post_ra>
// kernel: latent_embedding_addition_forward.1
= control target key start
LH: loop header
LB: loop body
LE: loop exit
PB: predicated region body
PF: predicated region fallthrough
CT: control target
= control target key end

     0   :  { %vm4325_vm0 = vcmask 261120   ;;  %s4318_s0 = inlined_call_operand.vmem [shape: s32[16,1], index: 0, kind: input, shape index: {}]   ;;  %s4319_s1 = inlined_call_operand.vmem [shape: f32[21,128], index: 1, kind: input, shape index: {}]   ;;  %s4320_s2 = inlined_call_operand.vmem [shape: f32[448,32], index: 2, kind: input, shape index: {}]   ;;  %s4321_s3 = inlined_call_operand.vmem [shape: f32[96,64], index: 3, kind: input, shape index: {}]   ;;  %s4322_s4 = inlined_call_operand.vmem [shape: f32[2,32,96], index: 4, kind: input, shape index: {}]   ;;  %s4323_s5 = inlined_call_operand.hbm [shape: f32[8,128], index: 5, kind: output, shape index: {}]  }
   0x1   :  { %v40_v0 = vld [vmem:[%s4321_s3 + $0x18] sm:$0xff]  ;;  %v39_v1 = vld [vmem:[%s4321_s3 + $0x10] sm:$0xff]  ;;  %v38_v2 = vld [vmem:[%s4321_s3 + $0x8] sm:$0xff] }
   0x2   :  { %104 = vmatpush.msra.mxu0 %v40_v0  ;;  %v37_v3 = vld [vmem:[%s4321_s3] sm:$0xff] }
   0x3   :  { %v21_v4 = vld [vmem:[%s4320_s2] sm:$0xff] }
   0x4   :  { %105 = vmatpush.msra.mxu0 %v39_v1 }
   0x6   :  { %106 = vmatpush.msra.mxu0 %v38_v2 }
   0x8   :  { %107 = vmatpush.msra.mxu0 %v37_v3 }
   0x9   :  { %2377 = vmatmul.msk.f32.vlgmr.msra.gmra.mxu0 %vm4325_vm0, %v21_v4 }
   0xa   :  { %10 = vsyncpa [#allocation5], 0  ;;  %v22_v5 = vld [vmem:[%s4320_s2 + $0x8] sm:$0xff]  ;;  %v23_v6 = vld [vmem:[%s4320_s2 + $0x10] sm:$0xff]  ;;  %vm4324_vm1 = vcmask 523264   ;;  %s2807_s28 = smov 56  }
   0xb   :  { %v24_v7 = vld [vmem:[%s4320_s2 + $0x18] sm:$0xff]  ;;  %v25_v8 = vld [vmem:[%s4320_s2 + $0x20] sm:$0xff]  ;;  %v26_v9 = vld [vmem:[%s4320_s2 + $0x28] sm:$0xff]  ;;  %s2808_s29 = smov 80   ;;  %s2809_s30 = smov 104  }
   0xc   :  { %v27_v10 = vld [vmem:[%s4320_s2 + $0x30] sm:$0xff]  ;;  %v28_v11 = vld [vmem:[%s4320_s2 + $0x38] sm:$0xff]  ;;  %v29_v12 = vld [vmem:[%s4320_s2 + $0x40] sm:$0xff]  ;;  %s2810_s6 = smov 120   ;;  %s2812_s7 = smov 8  }
   0xd   :  { %v30_v13 = vld [vmem:[%s4320_s2 + $0x48] sm:$0xff]  ;;  %v31_v14 = vld [vmem:[%s4320_s2 + $0x50] sm:$0xff]  ;;  %v180_v15 = vld [vmem:[%s4320_s2 + $0xb8] sm:$0xff]  ;;  %s2813_s8 = smov 16   ;;  %s2814_s9 = smov 24  }
   0xe   :  { %v179_v16 = vld [vmem:[%s4320_s2 + $0xb0] sm:$0xff]  ;;  %240 = vmatpush.msrb.mxu0 %v180_v15  ;;  %2545 = vmatpush.msra.mxu1 %v180_v15  ;;  %v178_v17 = vld [vmem:[%s4320_s2 + $0xa8] sm:$0xff]  ;;  %v32_v18 = vld [vmem:[%s4320_s2 + $0x58] sm:$0xff]  ;;  %s2816_s10 = smov [#allocation4]  }
   0xf   :  { %v177_v19 = vld [vmem:[%s4320_s2 + $0xa0] sm:$0xff]  ;;  %v176_v20 = vld [vmem:[%s4320_s2 + $0x98] sm:$0xff]  ;;  %v175_v21 = vld [vmem:[%s4320_s2 + $0x90] sm:$0xff] }
  0x10   :  { %241 = vmatpush.msrb.mxu0 %v179_v16  ;;  %2546 = vmatpush.msra.mxu1 %v179_v16  ;;  %v33_v22 = vld [vmem:[%s4320_s2 + $0x60] sm:$0xff]  ;;  %v174_v23 = vld [vmem:[%s4320_s2 + $0x88] sm:$0xff]  ;;  %v35_v26 = vld [vmem:[%s4320_s2 + $0x70] sm:$0xff]  ;;  %v299_v16 = vlaneseq }
  0x11   :  { %2378 = vmatmul.msk.f32.gmra.mxu0 %vm4325_vm0, %v22_v5  ;;  %v173_v24 = vld [vmem:[%s4320_s2 + $0x80] sm:$0xff]  ;;  %v34_v25 = vld [vmem:[%s4320_s2 + $0x68] sm:$0xff]  ;;  %v36_v27 = vld [vmem:[%s4320_s2 + $0x78] sm:$0xff] }
  0x12   :  { %242 = vmatpush.msrb.mxu0 %v178_v17  ;;  %2547 = vmatpush.msra.mxu1 %v178_v17  ;;  %v2950_v28 = vld [vmem:[%s4319_s1] ss:$0 sm:$0xff] }
  0x13   :  { %v297_v15 = vld [vmem:[%s4318_s0] sm:$0xff] }
  0x14   :  { %243 = vmatpush.msrb.mxu0 %v177_v19  ;;  %2548 = vmatpush.msra.mxu1 %v177_v19  ;;  %v2996_v19 = vshrl.u32 %v299_v16, 7 }
  0x16   :  { %244 = vmatpush.msrb.mxu0 %v176_v20  ;;  %2549 = vmatpush.msra.mxu1 %v176_v20  ;;  %v392_v20 = vadd.s32 16, %v2996_v19 }
  0x18   :  { %245 = vmatpush.msrb.mxu0 %v175_v21  ;;  %2550 = vmatpush.msra.mxu1 %v175_v21  ;;  %v393_v21 = vadd.s32 24, %v2996_v19 }
  0x19   :  { %2379 = vmatmul.msk.f32.gmra.mxu0 %vm4325_vm0, %v23_v6 }
  0x1a   :  { %246 = vmatpush.msrb.mxu0 %v174_v23  ;;  %2551 = vmatpush.msra.mxu1 %v174_v23  ;;  %v394_v23 = vadd.s32 32, %v2996_v19 }
  0x1c   :  { %247 = vmatpush.msrb.mxu0 %v173_v24  ;;  %2552 = vmatpush.msra.mxu1 %v173_v24  ;;  %v298_v24 = vld [vmem:[%s4318_s0 + $0x8] sm:$0xff]  ;;  %s2811_s0 = smov 112  }
  0x21   :  { %2380 = vmatmul.msk.f32.gmra.mxu0 %vm4325_vm0, %v24_v7 }
  0x29   :  { %2381 = vmatmul.msk.f32.gmra.mxu0 %vm4325_vm0, %v25_v8 }
  0x31   :  { %2382 = vmatmul.msk.f32.gmra.mxu0 %vm4325_vm0, %v26_v9 }
  0x39   :  { %2383 = vmatmul.msk.f32.gmra.mxu0 %vm4325_vm0, %v27_v10 }
  0x41   :  { %2384 = vmatmul.msk.f32.gmra.mxu0 %vm4325_vm0, %v28_v11 }
  0x49   :  { %2385 = vmatmul.msk.f32.gmra.mxu0 %vm4325_vm0, %v29_v12 }
  0x51   :  { %2386 = vmatmul.msk.f32.gmra.mxu0 %vm4325_vm0, %v30_v13  ;;  %v2804_v13 = vmov 0  }
  0x52   :  { %2566 = vset.pattern.permute.xlu0 %v2804_v13 }
  0x53   :  { %302 = vperm.xlu0 %2566, %v297_v15   ;;  %v4386_v15 = vmov 0 }
  0x59   :  { %2387 = vmatmul.msk.f32.gmra.mxu0 %vm4325_vm0, %v31_v14  ;;  %v2988_v14 = vld [vmem:[%s4319_s1 + $0x1] ss:$0 sm:$0xff] }
  0x5b   :  { %305 = vperm.xlu0 %2566, %v298_v24   ;;  %v4400_v24 = vmov 0 }
  0x61   :  { %2388 = vmatmul.msk.f32.gmra.mxu0 %vm4325_vm0, %v32_v18 }
  0x69   :  { %2389 = vmatmul.msk.f32.gmra.mxu0 %vm4325_vm0, %v33_v22  ;;  %v3002_v22 = vand.u32 127, %v299_v16  ;;  %v4390_v16 = vmov 0 }
  0x71   :  { %2390 = vmatmul.msk.f32.gmra.mxu0 %vm4325_vm0, %v34_v25  ;;  %v395_v25 = vadd.s32 40, %v2996_v19 }
  0x79   :  { %2391 = vmatmul.msk.f32.gmra.mxu0 %vm4325_vm0, %v35_v26  ;;  %v396_v26 = vadd.s32 48, %v2996_v19 }
  0x81   :  { %2392 = vmatmul.msk.f32.gmra.mxu0 %vm4325_vm0, %v36_v27  ;;  %v3011_v27 = vsub.s32 %v392_v20, %v3002_v22  ;;  %v355_v20 = vld [vmem:[%s4320_s2 + $0xd8] sm:$0xff] }
  0x83   :  { %vm532_vm2 = vcmp.eq.s32.totalorder %v3011_v27, 0  ;;  %vm544_vm3 = vcmp.eq.s32.totalorder %v3011_v27, 8 }
  0x84   :  { %vm3053_vm10 = vmor %vm532_vm2, %vm544_vm3 }
  0x86   :  { %v109_v29 = vpop.f32.mrf.mxu0 }
  0x87   :  { %v110_v30 = vadd.f32 %v2950_v28, %v109_v29  ;;  %v397_v29 = vadd.s32 56, %v2996_v19 }
  0x89   :  { %v157_v31 = vmax.f32 %v110_v30, 0.0  ;;  %v3015_v30 = vsub.s32 %v393_v21, %v3002_v22 }
  0x8b   :  { %2393 = vmatmul.msk.f32.vlgmr.msrb.gmra.mxu0 %vm4324_vm1, %v157_v31  ;;  %vm533_vm4 = vcmp.eq.s32.totalorder %v3015_v30, 0  ;;  %vm545_vm5 = vcmp.eq.s32.totalorder %v3015_v30, 8 }
  0x8c   :  { %vm3065_vm13 = vmor %vm533_vm4, %vm545_vm5 }
  0x8e   :  { %v112_v32 = vpop.f32.mrf.mxu0 }
  0x8f   :  { %v113_v33 = vadd.f32 %v2950_v28, %v112_v32  ;;  %v398_v32 = vadd.s32 64, %v2996_v19 }
  0x91   :  { %v158_v34 = vmax.f32 %v113_v33, 0.0  ;;  %v3022_v33 = vsub.s32 %v394_v23, %v3002_v22 }
  0x93   :  { %2394 = vmatmul.msk.f32.gmra.mxu0 %vm4324_vm1, %v158_v34  ;;  %v391_v34 = vadd.s32 8, %v2996_v19  ;;  %vm534_vm6 = vcmp.eq.s32.totalorder %v3022_v33, 0  ;;  %vm546_vm7 = vcmp.eq.s32.totalorder %v3022_v33, 8 }
  0x94   :  { %vm3076_vm2 = vmor %vm534_vm6, %vm546_vm7 }
  0x96   :  { %v115_v35 = vpop.f32.mrf.mxu0 }
  0x97   :  { %v116_v36 = vadd.f32 %v2950_v28, %v115_v35  ;;  %v399_v35 = vadd.s32 72, %v2996_v19 }
  0x99   :  { %v159_v37 = vmax.f32 %v116_v36, 0.0  ;;  %v3027_v36 = vsub.s32 %v395_v25, %v3002_v22 }
  0x9b   :  { %2395 = vmatmul.msk.f32.gmra.mxu0 %vm4324_vm1, %v159_v37  ;;  %v400_v37 = vadd.s32 80, %v2996_v19  ;;  %vm535_vm8 = vcmp.eq.s32.totalorder %v3027_v36, 0  ;;  %vm547_vm9 = vcmp.eq.s32.totalorder %v3027_v36, 8 }
  0x9c   :  { %vm3089_vm5 = vmor %vm535_vm8, %vm547_vm9 }
  0x9e   :  { %v118_v38 = vpop.f32.mrf.mxu0 }
  0x9f   :  { %v119_v39 = vadd.f32 %v2950_v28, %v118_v38  ;;  %v3033_v38 = vsub.s32 %v396_v26, %v3002_v22  ;;  %v4402_v26 = vmov 0 }
  0xa1   :  { %v160_v40 = vmax.f32 %v119_v39, 0.0  ;;  %v401_v39 = vadd.s32 88, %v2996_v19  ;;  %vm536_vm11 = vcmp.eq.s32.totalorder %v3033_v38, 0  ;;  %vm548_vm12 = vcmp.eq.s32.totalorder %v3033_v38, 8 }
  0xa3   :  { %2396 = vmatmul.msk.f32.vlgmr.msra.gmra.mxu1 %vm4324_vm1, %v160_v40  ;;  %v3039_v40 = vsub.s32 %v397_v29, %v3002_v22 }
  0xa5   :  { %vm549_vm15 = vcmp.eq.s32.totalorder %v3039_v40, 8 }
  0xa6   :  { %v121_v41 = vpop.f32.mrf.mxu0 }
  0xa7   :  { %v122_v42 = vadd.f32 %v2950_v28, %v121_v41  ;;  %v3044_v41 = vsub.s32 %v398_v32, %v3002_v22 }
  0xa9   :  { %v161_v43 = vmax.f32 %v122_v42, 0.0  ;;  %v3049_v42 = vsub.s32 %v399_v35, %v3002_v22  ;;  %vm538_vm3 = vcmp.eq.s32.totalorder %v3044_v41, 0  ;;  %vm550_vm4 = vcmp.eq.s32.totalorder %v3044_v41, 8 }
  0xaa   :  { %v4411_v35 = vmov 0 }
  0xab   :  { %2397 = vmatmul.msk.f32.gmra.mxu1 %vm4324_vm1, %v161_v43  ;;  %v4326_v43 = vmov 0  ;;  %vm539_vm6 = vcmp.eq.s32.totalorder %v3049_v42, 0  ;;  %vm551_vm7 = vcmp.eq.s32.totalorder %v3049_v42, 8 }
  0xac   :  { %v4327_v43 = vsel %vm3053_vm10, 4294967295, %v4326_v43  ;;  %vm568_vm10 = vcmp.eq.s32.totalorder %v3011_v27, 4294967288 }
  0xae   :  { %v124_v44 = vpop.f32.mrf.mxu0 }
  0xaf   :  { %v125_v45 = vadd.f32 %v2950_v28, %v124_v44  ;;  %v3058_v44 = vsub.s32 %v391_v34, %v3002_v22  ;;  %v4408_v34 = vmov 0 }
  0xb1   :  { %v162_v46 = vmax.f32 %v125_v45, 0.0  ;;  %v3061_v45 = vsub.s32 %v400_v37, %v3002_v22  ;;  %vm531_vm14 = vcmp.eq.s32.totalorder %v3058_v44, 0  ;;  %vm543_vm8 = vcmp.eq.s32.totalorder %v3058_v44, 8 }
  0xb2   :  { %v4415_v37 = vmov 0 }
  0xb3   :  { %2398 = vmatmul.msk.f32.gmra.mxu1 %vm4324_vm1, %v162_v46  ;;  %v4328_v46 = vmov 0  ;;  %vm552_vm9 = vcmp.eq.s32.totalorder %v3061_v45, 8 }
  0xb4   :  { %v4329_v46 = vsel %vm3065_vm13, 4294967295, %v4328_v46 }
  0xb6   :  { %v127_v47 = vpop.f32.mrf.mxu0 }
  0xb7   :  { %v128_v48 = vadd.f32 %v2950_v28, %v127_v47 }
  0xb9   :  { %v163_v49 = vmax.f32 %v128_v48, 0.0  ;;  %v3070_v48 = vsub.s32 %v401_v39, %v3002_v22 }
  0xbb   :  { %2399 = vmatmul.msk.f32.gmra.mxu1 %vm4324_vm1, %v163_v49  ;;  %v4330_v49 = vmov 0 }
  0xbc   :  { %v4331_v49 = vsel %vm3076_vm2, 4294967295, %v4330_v49  ;;  %vm540_vm2 = vcmp.eq.s32.totalorder %v3061_v45, 0 }
  0xbe   :  { %v130_v50 = vpop.f32.mrf.mxu0 }
  0xbf   :  { %v131_v51 = vadd.f32 %v2950_v28, %v130_v50 }
  0xc1   :  { %v164_v52 = vmax.f32 %v131_v51, 0.0  ;;  %v4332_v51 = vmov 0 }
  0xc2   :  { %v4333_v51 = vsel %vm3089_vm5, 4294967295, %v4332_v51  ;;  %vm4336_vm5 = vcmp.eq.s32.totalorder %v3039_v40, 0 }
  0xc3   :  { %2400 = vmatmul.msk.f32.gmra.mxu1 %vm4324_vm1, %v164_v52  ;;  %v4334_v52 = vmov 0  ;;  %vm3107_vm13 = vmor %vm4336_vm5, %vm549_vm15 }
  0xc4   :  { %vm3122_vm5 = vmor %vm531_vm14, %vm543_vm8  ;;  %vm4349_vm14 = vnez %v4327_v43  ;;  %vm4352_vm8 = vnez %v4329_v46 }
  0xc5   :  { %vm3126_vm15 = vmor %vm540_vm2, %vm552_vm9  ;;  %vm572_vm2 = vcmp.eq.s32.totalorder %v3033_v38, 4294967288 }
  0xc6   :  { %v133_v53 = vpop.f32.mrf.mxu0 }
  0xc7   :  { %v134_v54 = vadd.f32 %v2950_v28, %v133_v53  ;;  %v4337_v53 = vmov 0 }
  0xc8   :  { %v4338_v53 = vsel %vm3107_vm13, 4294967295, %v4337_v53  ;;  %vm569_vm13 = vcmp.eq.s32.totalorder %v3015_v30, 4294967288 }
  0xc9   :  { %v165_v55 = vmax.f32 %v134_v54, 0.0  ;;  %vm3148_vm9 = vmor %vm4352_vm8, %vm569_vm13  ;;  %vm4361_vm13 = vcmask 261120   ;;  %vm575_vm8 = vcmp.eq.s32.totalorder %v3049_v42, 4294967288 }
  0xcb   :  { %2401 = vmatmul.msk.f32.gmra.mxu1 %vm4324_vm1, %v165_v55 }
  0xce   :  { %v136_v56 = vpop.f32.mrf.mxu0 }
  0xcf   :  { %v137_v57 = vadd.f32 %v2950_v28, %v136_v56  ;;  %v4343_v56 = vmov 0 }
  0xd0   :  { %v4344_v56 = vsel %vm3122_vm5, 4294967295, %v4343_v56 }
  0xd1   :  { %v166_v58 = vmax.f32 %v137_v57, 0.0 }
  0xd3   :  { %2402 = vmatmul.msk.f32.gmra.mxu1 %vm4324_vm1, %v166_v58  ;;  %v4347_v58 = vmov 0 }
  0xd6   :  { %v139_v59 = vpop.f32.mrf.mxu0 }
  0xd7   :  { %v140_v60 = vadd.f32 %v2950_v28, %v139_v59 }
  0xd9   :  { %v167_v61 = vmax.f32 %v140_v60, 0.0  ;;  %v4350_v60 = vmov 0 }
  0xdb   :  { %2403 = vmatmul.msk.f32.gmra.mxu1 %vm4324_vm1, %v167_v61  ;;  %v518_v61 = vsub.s32 %v2996_v19, %v3002_v22 }
  0xde   :  { %v142_v62 = vpop.f32.mrf.mxu0 }
  0xdf   :  { %v143_v63 = vadd.f32 %v2950_v28, %v142_v62  ;;  %v4353_v62 = vmov 0 }
  0xe0   :  { %v4354_v62 = vsel %vm3148_vm9, 4294967295, %v4353_v62 }
  0xe1   :  { %v168_v0 = vmax.f32 %v143_v63, 0.0 }
  0xe3   :  { %2404 = vmatmul.msk.f32.gmra.mxu1 %vm4324_vm1, %v168_v0  ;;  %v4356_v0 = vmov 0 }
  0xe6   :  { %v145_v1 = vpop.f32.mrf.mxu0 }
  0xe7   :  { %v146_v2 = vadd.f32 %v2950_v28, %v145_v1  ;;  %v4359_v1 = vmov 0 }
  0xe9   :  { %v169_v3 = vmax.f32 %v146_v2, 0.0 }
  0xeb   :  { %2405 = vmatmul.msk.f32.gmra.mxu1 %vm4324_vm1, %v169_v3  ;;  %v4366_v3 = vmov 0 }
  0xee   :  { %v148_v4 = vpop.f32.mrf.mxu0 }
  0xef   :  { %v149_v5 = vadd.f32 %v2950_v28, %v148_v4 }
  0xf1   :  { %v170_v6 = vmax.f32 %v149_v5, 0.0 }
  0xf3   :  { %2406 = vmatmul.msk.f32.gmra.mxu1 %vm4324_vm1, %v170_v6  ;;  %v4372_v6 = vmov 0 }
  0xf6   :  { %v151_v7 = vpop.f32.mrf.mxu0 }
  0xf7   :  { %v152_v8 = vadd.f32 %v2950_v28, %v151_v7  ;;  %v4374_v7 = vmov 0 }
  0xf9   :  { %v171_v9 = vmax.f32 %v152_v8, 0.0 }
  0xfb   :  { %2407 = vmatmul.msk.f32.gmra.mxu1 %vm4324_vm1, %v171_v9  ;;  %v4377_v9 = vmov 0 }
  0xfe   :  { %v154_v10 = vpop.f32.mrf.mxu0 }
  0xff   :  { %v155_v11 = vadd.f32 %v2950_v28, %v154_v10  ;;  %v4380_v10 = vmov 0 }
 0x101   :  { %v172_v12 = vmax.f32 %v155_v11, 0.0 }
 0x103   :  { %2408 = vmatmul.msk.f32.gmra.mxu1 %vm4324_vm1, %v172_v12  ;;  %vm3095_vm1 = vmor %vm536_vm11, %vm548_vm12  ;;  %vm541_vm11 = vcmp.eq.s32.totalorder %v3070_v48, 0  ;;  %vm553_vm12 = vcmp.eq.s32.totalorder %v3070_v48, 8  ;;  %v4383_v12 = vmov 0 }
 0x104   :  { %v4335_v52 = vsel %vm3095_vm1, 4294967295, %v4334_v52  ;;  %vm3113_vm1 = vmor %vm538_vm3, %vm550_vm4  ;;  %vm570_vm4 = vcmp.eq.s32.totalorder %v3022_v33, 4294967288 }
 0x105   :  { %vm3131_vm3 = vmor %vm541_vm11, %vm553_vm12  ;;  %vm573_vm11 = vcmp.eq.s32.totalorder %v3039_v40, 4294967288  ;;  %vm4362_vm9 = vnez %v4335_v52 }
 0x106   :  { %v4348_v58 = vsel %vm3131_vm3, 4294967295, %v4347_v58  ;;  %vm3174_vm5 = vmor %vm4362_vm9, %vm572_vm2 }
 0x108   :  { %v249_v17 = vpop.f32.mrf.mxu0 }
 0x109   :  { %v2994_v18 = vadd.f32 %v2988_v14, %v249_v17 }
 0x10b   :  { %336 = vst.msk [vmem:[#allocation2] sm:$0xff] %vm4325_vm0, %v2994_v18 }
 0x110   :  { %v252_v28 = vpop.f32.mrf.mxu0 }
 0x111   :  { %v3018_v31 = vadd.f32 %v2988_v14, %v252_v28 }
 0x113   :  { %337 = vst.msk [vmem:[#allocation2 + $0x8] sm:$0xff] %vm4325_vm0, %v3018_v31 }
 0x118   :  { %v255_v47 = vpop.f32.mrf.mxu0 }
 0x119   :  { %v3081_v50 = vadd.f32 %v2988_v14, %v255_v47  ;;  %v2805_v47 = vmov -1e+30  }
 0x11b   :  { %338 = vst.msk [vmem:[#allocation2 + $0x10] sm:$0xff] %vm4325_vm0, %v3081_v50  ;;  %vm3117_vm0 = vmor %vm539_vm6, %vm551_vm7  ;;  %vm571_vm6 = vcmp.eq.s32.totalorder %v3027_v36, 4294967288 }
 0x11c   :  { %vm3139_vm7 = vmor %vm4349_vm14, %vm568_vm10  ;;  %vm4355_vm10 = vnez %v4331_v49  ;;  %vm574_vm14 = vcmp.eq.s32.totalorder %v3044_v41, 4294967288 }
 0x11d   :  { %v4351_v60 = vsel %vm3139_vm7, 4294967295, %v4350_v60  ;;  %vm3158_vm12 = vmor %vm4355_vm10, %vm570_vm4  ;;  %vm4358_vm7 = vnez %v4333_v51  ;;  %vm530_vm4 = vcmp.eq.s32.totalorder %v518_v61, 0  ;;  %vm566_vm10 = vcmp.eq.s32.totalorder %v518_v61, 4294967288 }
 0x11e   :  { %v4357_v0 = vsel %vm3158_vm12, 4294967295, %v4356_v0  ;;  %vm3165_vm3 = vmor %vm4358_vm7, %vm571_vm6  ;;  %vm576_vm12 = vcmp.eq.s32.totalorder %v3061_v45, 4294967288  ;;  %vm4365_vm6 = vnez %v4338_v53 }
 0x11f   :  { %v4360_v1 = vsel %vm3165_vm3, 4294967295, %v4359_v1  ;;  %vm3181_vm7 = vmor %vm4365_vm6, %vm573_vm11  ;;  %vm577_vm3 = vcmp.eq.s32.totalorder %v3070_v48, 4294967288  ;;  %vm592_vm11 = vcmp.eq.s32.totalorder %v3011_v27, 16 }
 0x120   :  { %v258_v59 = vpop.f32.mrf.mxu1  ;;  %v4367_v3 = vsel %vm3181_vm7, 4294967295, %v4366_v3  ;;  %vm3189_vm2 = vmor %vm3113_vm1, %vm574_vm14  ;;  %vm593_vm1 = vcmp.eq.s32.totalorder %v3015_v30, 16 }
 0x121   :  { %v3153_v63 = vadd.f32 %v2988_v14, %v258_v59  ;;  %vm3195_vm9 = vmor %vm3117_vm0, %vm575_vm8  ;;  %vm4376_vm0 = vnez %v4344_v56  ;;  %vm4379_vm8 = vnez %v4348_v58 }
 0x122   :  { %vm3200_vm6 = vmor %vm530_vm4, %vm566_vm10  ;;  %vm4382_vm10 = vnez %v4351_v60 }
 0x123   :  { %339 = vst.msk [vmem:[#allocation2 + $0x18] sm:$0xff] %vm4361_vm13, %v3153_v63  ;;  %vm567_vm13 = vcmp.eq.s32.totalorder %v3058_v44, 4294967288  ;;  %v4373_v6 = vsel %vm3200_vm6, 4294967295, %v4372_v6  ;;  %vm3206_vm7 = vmor %vm3126_vm15, %vm576_vm12  ;;  %vm594_vm15 = vcmp.eq.s32.totalorder %v3022_v33, 16  ;;  %vm595_vm12 = vcmp.eq.s32.totalorder %v3027_v36, 16 }
 0x124   :  { %v4375_v7 = vsel %vm3206_vm7, 4294967295, %v4374_v7  ;;  %vm3213_vm14 = vmor %vm4376_vm0, %vm567_vm13  ;;  %vm596_vm13 = vcmp.eq.s32.totalorder %v3033_v38, 16 }
 0x125   :  { %v4378_v9 = vsel %vm3213_vm14, 4294967295, %v4377_v9  ;;  %vm3219_vm4 = vmor %vm4379_vm8, %vm577_vm3  ;;  %vm4385_vm3 = vnez %v4354_v62  ;;  %vm4388_vm8 = vcmask 261120   ;;  %vm597_vm14 = vcmp.eq.s32.totalorder %v3039_v40, 16 }
 0x126   :  { %v4381_v10 = vsel %vm3219_vm4, 4294967295, %v4380_v10  ;;  %vm3230_vm6 = vmor %vm4382_vm10, %vm592_vm11  ;;  %vm4389_vm4 = vnez %v4357_v0  ;;  %vm498_vm11 = vcmp.ge.s32.totalorder %v3002_v22, 24  ;;  %vm500_vm10 = vcmp.ge.s32.totalorder %v3002_v22, 48 }
 0x127   :  { %v4384_v12 = vsel %vm3230_vm6, 4294967295, %v4383_v12  ;;  %vm3237_vm0 = vmor %vm4385_vm3, %vm593_vm1  ;;  %vm598_vm1 = vcmp.eq.s32.totalorder %v3044_v41, 16  ;;  %vm4392_vm3 = vnez %v4360_v1  ;;  %v499_v21 = vsel %vm498_vm11, 1, %v2804_v13 }
 0x128   :  { %v261_v8 = vpop.f32.mrf.mxu1  ;;  %v4387_v15 = vsel %vm3237_vm0, 4294967295, %v4386_v15  ;;  %vm3246_vm7 = vmor %vm4389_vm4, %vm594_vm15  ;;  %vm600_vm15 = vcmp.eq.s32.totalorder %v3061_v45, 16  ;;  %v501_v23 = vsel %vm500_vm10, 1, %v2804_v13  ;;  %vm616_vm10 = vcmp.eq.s32.totalorder %v3011_v27, 4294967280 }
 0x129   :  { %v3225_v11 = vadd.f32 %v2988_v14, %v261_v8  ;;  %v4391_v16 = vsel %vm3246_vm7, 4294967295, %v4390_v16  ;;  %vm3255_vm0 = vmor %vm4392_vm3, %vm595_vm12  ;;  %vm4397_vm7 = vnez %v4367_v3  ;;  %vm601_vm12 = vcmp.eq.s32.totalorder %v3070_v48, 16 }
 0x12a   :  { %vm3262_vm4 = vmor %vm3174_vm5, %vm596_vm13  ;;  %vm614_vm13 = vcmp.eq.s32.totalorder %v518_v61, 4294967280  ;;  %vm503_vm3 = vcmp.ge.s32.totalorder %v3002_v22, 72  ;;  %v502_v32 = vadd.s32 %v501_v23, %v499_v21  ;;  %v2806_v21 = vmov 1.0   ;;  %v677_v23 = vld [vmem:[%s4322_s4 + $0x10] sm:$0xff] }
 0x12b   :  { %340 = vst.msk [vmem:[#allocation2 + $0x20] sm:$0xff] %vm4388_vm8, %v3225_v11  ;;  %vm599_vm8 = vcmp.eq.s32.totalorder %v3049_v42, 16  ;;  %vm3269_vm6 = vmor %vm4397_vm7, %vm597_vm14  ;;  %vm615_vm14 = vcmp.eq.s32.totalorder %v3058_v44, 4294967280  ;;  %v504_v27 = vsel %vm503_vm3, 1, %v2804_v13  ;;  %vm4420_vm3 = vnez %v4387_v15 }
 0x12c   :  { %vm3278_vm5 = vmor %vm3189_vm2, %vm598_vm1  ;;  %vm4404_vm2 = vnez %v4375_v7  ;;  %vm4407_vm1 = vnez %v4381_v10  ;;  %v4437_v44 = vmov 0 }
 0x12d   :  { %v4401_v24 = vsel %vm3278_vm5, 4294967295, %v4400_v24  ;;  %vm3285_vm7 = vmor %vm3195_vm9, %vm599_vm8  ;;  %vm617_vm8 = vcmp.eq.s32.totalorder %v3015_v30, 4294967280 }
 0x12e   :  { %v4403_v26 = vsel %vm3285_vm7, 4294967295, %v4402_v26  ;;  %vm3295_vm11 = vmor %vm4404_vm2, %vm600_vm15  ;;  %vm4410_vm7 = vnez %v4373_v6  ;;  %vm4413_vm15 = vcmask 261120   ;;  %vm618_vm2 = vcmp.eq.s32.totalorder %v3022_v33, 4294967280 }
 0x12f   :  { %vm3302_vm9 = vmor %vm4407_vm1, %vm601_vm12  ;;  %vm4414_vm12 = vnez %v4378_v9  ;;  %v505_v33 = vadd.s32 %v504_v27, %v502_v32  ;;  %v3507_v27 = vld [vmem:[%s4319_s1 + $0x3] ss:$0 sm:$0xff] }
 0x130   :  { %v264_v25 = vpop.f32.mrf.mxu1  ;;  %v4409_v34 = vsel %vm3302_vm9, 4294967295, %v4408_v34  ;;  %vm3309_vm5 = vmor %vm4410_vm7, %vm614_vm13  ;;  %vm619_vm9 = vcmp.eq.s32.totalorder %v3027_v36, 4294967280  ;;  %vm4417_vm13 = vnez %v4384_v12  ;;  %v4424_v36 = vmov 0 }
 0x131   :  { %v3291_v28 = vadd.f32 %v2988_v14, %v264_v25  ;;  %v4412_v35 = vsel %vm3309_vm5, 4294967295, %v4411_v35  ;;  %vm3319_vm1 = vmor %vm4414_vm12, %vm615_vm14  ;;  %vm621_vm14 = vcmp.eq.s32.totalorder %v3039_v40, 4294967280  ;;  %vm4423_vm12 = vnez %v4391_v16  ;;  %v676_v25 = vld [vmem:[%s4322_s4 + $0x8] sm:$0xff] }
 0x132   :  { %v4416_v37 = vsel %vm3319_vm1, 4294967295, %v4415_v37  ;;  %vm3326_vm7 = vmor %vm4417_vm13, %vm616_vm10  ;;  %vm622_vm10 = vcmp.eq.s32.totalorder %v3044_v41, 4294967280  ;;  %v4428_v40 = vmov 0 }
 0x133   :  { %341 = vst.msk [vmem:[#allocation2 + $0x28] sm:$0xff] %vm4413_vm15, %v3291_v28  ;;  %vm620_vm15 = vcmp.eq.s32.totalorder %v3033_v38, 4294967280  ;;  %vm3333_vm5 = vmor %vm4420_vm3, %vm617_vm8  ;;  %v4426_v38 = vmov 0  ;;  %vm623_vm8 = vcmp.eq.s32.totalorder %v3049_v42, 4294967280  ;;  %v4433_v42 = vmov 0 }
 0x134   :  { %vm3340_vm1 = vmor %vm4423_vm12, %vm618_vm2  ;;  %vm624_vm2 = vcmp.eq.s32.totalorder %v3061_v45, 4294967280  ;;  %vm625_vm12 = vcmp.eq.s32.totalorder %v3070_v48, 4294967280 }
 0x135   :  { %v4425_v36 = vsel %vm3340_vm1, 4294967295, %v4424_v36  ;;  %vm3347_vm13 = vmor %vm3255_vm0, %vm619_vm9  ;;  %vm2415_vm9 = vcmp.eq.s32.totalorder %v505_v33, 0 }
 0x136   :  { %v4427_v38 = vsel %vm3347_vm13, 4294967295, %v4426_v38  ;;  %vm3354_vm3 = vmor %vm3262_vm4, %vm620_vm15  ;;  %vm4432_vm13 = vnez %v4401_v24  ;;  %vm4435_vm15 = vcmask 261120  }
 0x137   :  { %v4429_v40 = vsel %vm3354_vm3, 4294967295, %v4428_v40  ;;  %vm3364_vm0 = vmor %vm3269_vm6, %vm621_vm14  ;;  %vm4436_vm3 = vnez %v4403_v26  ;;  %vm662_vm6 = vcmask 785408   ;;  %v675_v26 = vld [vmem:[%s4322_s4] sm:$0xff] }
 0x138   :  { %v267_v39 = vpop.f32.mrf.mxu1  ;;  %vm3371_vm4 = vmor %vm4432_vm13, %vm622_vm10  ;;  %vm2418_vm10 = vcmp.eq.s32.totalorder %v505_v33, 1  ;;  %vm4441_vm13 = vnez %v4409_v34 }
 0x139   :  { %v3359_v43 = vadd.f32 %v2988_v14, %v267_v39  ;;  %v4434_v42 = vsel %vm3371_vm4, 4294967295, %v4433_v42  ;;  %vm3379_vm1 = vmor %vm4436_vm3, %vm623_vm8  ;;  %vm4445_vm3 = vnez %v4416_v37  ;;  %v2631_v37 = vld [vmem:[%s4319_s1 + $0x5] ss:$0 sm:$0xff] }
 0x13a   :  { %v4438_v44 = vsel %vm3379_vm1, 4294967295, %v4437_v44  ;;  %vm3385_vm14 = vmor %vm3295_vm11, %vm624_vm2  ;;  %vm2421_vm2 = vcmp.eq.s32.totalorder %v505_v33, 2 }
 0x13b   :  { %342 = vst.msk [vmem:[#allocation2 + $0x30] sm:$0xff] %vm4435_vm15, %v3359_v43  ;;  %vm3391_vm4 = vmor %vm4441_vm13, %vm625_vm12  ;;  %vm4444_vm15 = vnez %v4412_v35  ;;  %vm4446_vm13 = vnez %v4425_v36 }
 0x13c   :  { %vm638_vm8 = vmand %vm2415_vm9, %vm4444_vm15 }
 0x13d   :  { %vm639_vm1 = vmand %vm2415_vm9, %vm4445_vm3  ;;  %v650_v48 = vsel %vm638_vm8, 0.0, %v2805_v47 }
 0x13e   :  { %vm640_vm11 = vmand %vm2415_vm9, %vm3326_vm7  ;;  %v651_v49 = vsel %vm639_vm1, 0.0, %v2805_v47  ;;  %663 = vst.msk [vmem:[#allocation3] sm:$0xff] %vm662_vm6, %v650_v48  ;;  %vm4447_vm1 = vnez %v4427_v38  ;;  %vm2424_vm9 = vcmp.eq.s32.totalorder %v505_v33, 3 }
 0x13f   :  { %vm641_vm12 = vmand %vm2418_vm10, %vm3333_vm5  ;;  %v652_v52 = vsel %vm640_vm11, 0.0, %v2805_v47  ;;  %664 = vst.msk [vmem:[#allocation3 + $0x8] sm:$0xff] %vm662_vm6, %v651_v49  ;;  %vm4448_vm5 = vnez %v4429_v40 }
 0x140   :  { %v270_v51 = vpop.f32.mrf.mxu1  ;;  %vm642_vm15 = vmand %vm2418_vm10, %vm4446_vm13  ;;  %v653_v53 = vsel %vm641_vm12, 0.0, %v2805_v47  ;;  %665 = vst.msk [vmem:[#allocation3 + $0x10] sm:$0xff] %vm662_vm6, %v652_v52  ;;  %vm4450_vm12 = vnez %v4438_v44 }
 0x141   :  { %vm643_vm7 = vmand %vm2418_vm10, %vm4447_vm1  ;;  %v654_v54 = vsel %vm642_vm15, 0.0, %v2805_v47  ;;  %666 = vst.msk [vmem:[#allocation3 + $0x18] sm:$0xff] %vm662_vm6, %v653_v53  ;;  %vm4449_vm10 = vnez %v4434_v42  ;;  %v271_v0 = vadd.f32 %v2988_v14, %v270_v51 }
 0x142   :  { %vm644_vm8 = vmand %vm2421_vm2, %vm4448_vm5  ;;  %v655_v55 = vsel %vm643_vm7, 0.0, %v2805_v47  ;;  %667 = vst.msk [vmem:[#allocation3 + $0x20] sm:$0xff] %vm662_vm6, %v654_v54 }
 0x143   :  { %vm645_vm3 = vmand %vm2421_vm2, %vm3364_vm0  ;;  %v656_v56 = vsel %vm644_vm8, 0.0, %v2805_v47  ;;  %668 = vst.msk [vmem:[#allocation3 + $0x28] sm:$0xff] %vm662_vm6, %v655_v55 }
 0x144   :  { %vm646_vm11 = vmand %vm2421_vm2, %vm4449_vm10  ;;  %v657_v57 = vsel %vm645_vm3, 0.0, %v2805_v47  ;;  %669 = vst.msk [vmem:[#allocation3 + $0x30] sm:$0xff] %vm662_vm6, %v656_v56 }
 0x145   :  { %vm647_vm13 = vmand %vm2424_vm9, %vm4450_vm12  ;;  %v658_v58 = vsel %vm646_vm11, 0.0, %v2805_v47  ;;  %670 = vst.msk [vmem:[#allocation3 + $0x38] sm:$0xff] %vm662_vm6, %v657_v57 }
 0x146   :  { %vm648_vm0 = vmand %vm2424_vm9, %vm3385_vm14  ;;  %v659_v59 = vsel %vm647_vm13, 0.0, %v2805_v47  ;;  %671 = vst.msk [vmem:[#allocation3 + $0x40] sm:$0xff] %vm662_vm6, %v658_v58  ;;  %vm4451_vm14 = vcmask 261120  }
 0x147   :  { %vm649_vm2 = vmand %vm2424_vm9, %vm3391_vm4  ;;  %v660_v61 = vsel %vm648_vm0, 0.0, %v2805_v47  ;;  %672 = vst.msk [vmem:[#allocation3 + $0x48] sm:$0xff] %vm662_vm6, %v659_v59 }
 0x148   :  { %v273_v60 = vpop.f32.mrf.mxu1  ;;  %v661_v1 = vsel %vm649_vm2, 0.0, %v2805_v47  ;;  %673 = vst.msk [vmem:[#allocation3 + $0x50] sm:$0xff] %vm662_vm6, %v660_v61  ;;  %vm4452_vm15 = vmmov %vm4451_vm14 }
 0x149   :  { %v274_v62 = vadd.f32 %v2988_v14, %v273_v60  ;;  %674 = vst.msk [vmem:[#allocation3 + $0x58] sm:$0xff] %vm662_vm6, %v661_v1  ;;  %vm4453_vm4 = vmmov %vm4451_vm14 }
 0x14a   :  { %343 = vst.msk [vmem:[#allocation2 + $0x38] sm:$0xff] %vm4452_vm15, %v271_v0  ;;  %vm4454_vm1 = vmmov %vm4453_vm4  ;;  %vm773_vm15 = vcmask 64512  }
 0x14b   :  { %344 = vst.msk [vmem:[#allocation2 + $0x40] sm:$0xff] %vm4451_vm14, %v274_v62  ;;  %vm4455_vm7 = vmmov %vm4454_vm1 }
 0x14c   :  { %vm4456_vm9 = vmmov %vm4454_vm1 }
 0x14d   :  { %vm4457_vm5 = vmmov %vm4454_vm1 }
 0x14e   :  { %vm4458_vm8 = vmmov %vm4454_vm1 }
 0x14f   :  { %vm4459_vm3 = vmmov %vm4454_vm1 }
 0x150   :  { %v276_v2 = vpop.f32.mrf.mxu1  ;;  %vm4460_vm12 = vmmov %vm4454_vm1 }
 0x151   :  { %v277_v3 = vadd.f32 %v2988_v14, %v276_v2  ;;  %vm4461_vm13 = vmmov %vm4454_vm1 }
 0x152   :  { %vm4462_vm0 = vmmov %vm4454_vm1 }
 0x153   :  { %345 = vst.msk [vmem:[#allocation2 + $0x48] sm:$0xff] %vm4453_vm4, %v277_v3  ;;  %vm4463_vm2 = vmmov %vm4462_vm0  ;;  %vm1183_vm4 = vcmask 130048  }
 0x154   :  { %vm4464_vm14 = vmmov %vm4462_vm0 }
 0x158   :  { %v279_v4 = vpop.f32.mrf.mxu1 }
 0x159   :  { %v280_v5 = vadd.f32 %v2988_v14, %v279_v4 }
 0x15b   :  { %346 = vst.msk [vmem:[#allocation2 + $0x50] sm:$0xff] %vm4454_vm1, %v280_v5  ;;  %vm1187_vm1 = vcmask 195584  }
 0x160   :  { %v282_v6 = vpop.f32.mrf.mxu1 }
 0x161   :  { %v283_v7 = vadd.f32 %v2988_v14, %v282_v6 }
 0x163   :  { %347 = vst.msk [vmem:[#allocation2 + $0x58] sm:$0xff] %vm4455_vm7, %v283_v7  ;;  %vm4465_vm7 = vmmov %vm4462_vm0 }
 0x168   :  { %v285_v8 = vpop.f32.mrf.mxu1 }
 0x169   :  { %v286_v9 = vadd.f32 %v2988_v14, %v285_v8 }
 0x16b   :  { %348 = vst.msk [vmem:[#allocation2 + $0x60] sm:$0xff] %vm4456_vm9, %v286_v9  ;;  %vm4466_vm9 = vmmov %vm4462_vm0 }
 0x170   :  { %v288_v10 = vpop.f32.mrf.mxu1 }
 0x171   :  { %v289_v12 = vadd.f32 %v2988_v14, %v288_v10 }
 0x173   :  { %349 = vst.msk [vmem:[#allocation2 + $0x68] sm:$0xff] %vm4457_vm5, %v289_v12  ;;  %vm4467_vm5 = vmmov %vm4462_vm0 }
 0x178   :  { %v291_v15 = vpop.f32.mrf.mxu1 }
 0x179   :  { %v292_v16 = vadd.f32 %v2988_v14, %v291_v15 }
 0x17b   :  { %350 = vst.msk [vmem:[#allocation2 + $0x70] sm:$0xff] %vm4458_vm8, %v292_v16  ;;  %vm4468_vm8 = vmmov %vm4462_vm0 }
 0x180   :  { %v294_v17 = vpop.f32.mrf.mxu1 }
 0x181   :  { %v295_v19 = vadd.f32 %v2988_v14, %v294_v17  ;;  %v303_v14 = vpop.permute.xlu0 %302 }
 0x182   :  { %vm307_vm10 = vcmp.eq.s32.totalorder %v3002_v22, %v303_v14 }
 0x183   :  { %351 = vst.msk [vmem:[#allocation2 + $0x78] sm:$0xff] %vm4459_vm3, %v295_v19  ;;  %313 = vmatpush.msra.mxu2 %v295_v19  ;;  %v740_v19 = vld [vmem:[#allocation3 + $0x18] sm:$0xff]  ;;  %vm4469_vm3 = vmmov %vm4462_vm0 }
 0x185   :  { %314 = vmatpush.msra.mxu2 %v292_v16 }
 0x187   :  { %315 = vmatpush.msra.mxu2 %v289_v12  ;;  %v739_v12 = vld [vmem:[#allocation3 + $0x10] sm:$0xff] }
 0x189   :  { %316 = vmatpush.msra.mxu2 %v286_v9 }
 0x18b   :  { %317 = vmatpush.msra.mxu2 %v283_v7  ;;  %v738_v7 = vld [vmem:[#allocation3 + $0x8] sm:$0xff] }
 0x18d   :  { %318 = vmatpush.msra.mxu2 %v280_v5 }
 0x18f   :  { %319 = vmatpush.msra.mxu2 %v277_v3  ;;  %v737_v3 = vld [vmem:[#allocation3] sm:$0xff] }
 0x191   :  { %320 = vmatpush.msra.mxu2 %v274_v62 }
 0x193   :  { %321 = vmatpush.msra.mxu2 %v271_v0 }
 0x195   :  { %322 = vmatpush.msra.mxu2 %v3359_v43 }
 0x197   :  { %323 = vmatpush.msra.mxu2 %v3291_v28  ;;  %v2629_v28 = vld [vmem:[%s4319_s1 + $0x2] ss:$0 sm:$0xff] }
 0x199   :  { %324 = vmatpush.msra.mxu2 %v3225_v11  ;;  %v354_v11 = vld [vmem:[%s4320_s2 + $0xd0] sm:$0xff] }
 0x19b   :  { %325 = vmatpush.msra.mxu2 %v3153_v63  ;;  %v306_v63 = vpop.permute.xlu0 %305 }
 0x19c   :  { %vm308_vm11 = vcmp.eq.s32.totalorder %v3002_v22, %v306_v63 }
 0x19d   :  { %326 = vmatpush.msra.mxu2 %v3081_v50  ;;  %v353_v50 = vld [vmem:[%s4320_s2 + $0xc8] sm:$0xff] }
 0x19f   :  { %327 = vmatpush.msra.mxu2 %v3018_v31  ;;  %v678_v31 = vld [vmem:[%s4322_s4 + $0x18] sm:$0xff] }
 0x1a0   :  { %702 = vmatpush.msra.mxu3 %v678_v31 }
 0x1a1   :  { %328 = vmatpush.msra.mxu2 %v2994_v18  ;;  %v352_v18 = vld [vmem:[%s4320_s2 + $0xc0] sm:$0xff] }
 0x1a2   :  { %2411 = vmatmul.msk.f32.vlgmr.msra.gmra.mxu2 %vm307_vm10, %v2806_v21  ;;  %703 = vmatpush.msra.mxu3 %v677_v23  ;;  %vm4470_vm10 = vmmov %vm4462_vm0 }
 0x1a3   :  { %376 = vmatpush.msrb.mxu2 %v355_v20 }
 0x1a4   :  { %704 = vmatpush.msra.mxu3 %v676_v25  ;;  %v742_v25 = vld [vmem:[#allocation3 + $0x28] sm:$0xff] }
 0x1a5   :  { %377 = vmatpush.msrb.mxu2 %v354_v11 }
 0x1a6   :  { %705 = vmatpush.msra.mxu3 %v675_v26 }
 0x1a7   :  { %378 = vmatpush.msrb.mxu2 %v353_v50  ;;  %v741_v50 = vld [vmem:[#allocation3 + $0x20] sm:$0xff] }
 0x1a9   :  { %379 = vmatpush.msrb.mxu2 %v352_v18 }
 0x1aa   :  { %2412 = vmatmul.msk.f32.gmra.mxu2 %vm308_vm11, %v2806_v21  ;;  %vm4471_vm11 = vmmov %vm4462_vm0 }
 0x225   :  { %v330_v24 = vpop.f32.mrf.mxu2 }
 0x226   :  { %2413 = vmatmul.msk.f32.vlgmr.msrb.gmra.mxu2 %vm4460_vm12, %v330_v24  ;;  %vm4472_vm12 = vmmov %vm4462_vm0 }
 0x22d   :  { %v333_v22 = vpop.f32.mrf.mxu2 }
 0x22e   :  { %2414 = vmatmul.msk.f32.gmra.mxu2 %vm4461_vm13, %v333_v22  ;;  %vm4473_vm13 = vmmov %vm4462_vm0 }
 0x2a9   :  { %v381_v29 = vpop.f32.mrf.mxu2 }
 0x2aa   :  { %v3496_v32 = vadd.f32 %v2629_v28, %v381_v29 }
 0x2ac   :  { %2427 = vmatmul.msk.f32.vlgmr.msra.gmra.mxu3 %vm4462_vm0, %v3496_v32 }
 0x2b1   :  { %v384_v34 = vpop.f32.mrf.mxu2 }
 0x2b2   :  { %v3500_v35 = vadd.f32 %v2629_v28, %v384_v34  ;;  %v743_v34 = vld [vmem:[#allocation3 + $0x30] sm:$0xff] }
 0x2b4   :  { %2428 = vmatmul.msk.f32.gmra.mxu3 %vm4463_vm2, %v3500_v35 }
 0x2bc   :  { %2429 = vmatmul.msk.f32.gmra.mxu3 %vm4464_vm14, %v3507_v27 }
 0x32f   :  { %v707_v30 = vpop.f32.mrf.mxu3 }
 0x330   :  { %v3514_v13 = vadd.f32 %v2631_v37, %v707_v30  ;;  %v744_v30 = vld [vmem:[#allocation3 + $0x38] sm:$0xff] }
 0x332   :  { %731 = vrot.lane.b32.xlu2 %v3514_v13, %s2807_s28 }
 0x337   :  { %v710_v33 = vpop.f32.mrf.mxu3 }
 0x338   :  { %v3518_v36 = vadd.f32 %v2631_v37, %v710_v33 }
 0x33a   :  { %727 = vrot.lane.b32.xlu0 %v3518_v36, %s2808_s29 }
 0x33f   :  { %v713_v38 = vpop.f32.mrf.mxu3 }
 0x340   :  { %v3522_v39 = vadd.f32 %v2631_v37, %v713_v38 }
 0x342   :  { %735 = vrot.lane.b32.xlu1 %v3522_v39, %s2807_s28  ;;  %721 = vrot.lane.b32.xlu0 %v3518_v36, %s2809_s30 }
 0x343   :  { %729 = vrot.lane.b32.xlu2 %v3522_v39, %s2808_s29 }
 0x34a   :  { %733 = vrot.lane.b32.xlu1 %v3518_v36, %s2807_s28 }
 0x34b   :  { %723 = vrot.lane.b32.xlu2 %v3522_v39, %s2809_s30 }
 0x352   :  { %725 = vrot.lane.b32.xlu1 %v3514_v13, %s2808_s29 }
 0x35a   :  { %719 = vrot.lane.b32.xlu1 %v3514_v13, %s2809_s30 }
 0x38c   :  { %v3538_v40 = vpop.permute.xlu2 %731 }
 0x38d   :  { %767 = vrot.lane.b32.xlu1 %v3538_v40, %s2810_s6 }
 0x39d   :  { %v3546_v41 = vpop.permute.xlu2 %729 }
 0x39e   :  { %v2572_v24 = vpack.i.bf16 %v3546_v41, %v3538_v40 }
 0x3a5   :  { %v3555_v46 = vpop.permute.xlu2 %723 }
 0x3ac   :  { %v3551_v44 = vpop.permute.xlu0 %727 }
 0x3b4   :  { %v3542_v43 = vpop.permute.xlu1 %735  ;;  %v3563_v47 = vpop.permute.xlu0 %721 }
 0x3b5   :  { %771 = vrot.lane.b32.xlu2 %v3542_v43, %s2810_s6  ;;  %v2582_v23 = vpack.i.bf16 %v3563_v47, %v3555_v46 }
 0x3bc   :  { %v734_v42 = vpop.permute.xlu1 %733 }
 0x3bd   :  { %769 = vrot.lane.b32.xlu0 %v734_v42, %s2810_s6  ;;  %765 = vrot.lane.b32.xlu2 %v3546_v41, %s2810_s6  ;;  %v2567_v49 = vpack.i.bf16 %v734_v42, %v3542_v43 }
 0x3c4   :  { %v3553_v45 = vpop.permute.xlu1 %725 }
 0x3c5   :  { %763 = vrot.lane.b32.xlu0 %v3551_v44, %s2810_s6  ;;  %761 = vrot.lane.b32.xlu1 %v3553_v45, %s2810_s6  ;;  %v2577_v11 = vpack.i.bf16 %v3553_v45, %v3551_v44 }
 0x3c6   :  { %759 = vrot.lane.b32.xlu2 %v3555_v46, %s2810_s6 }
 0x3cc   :  { %v3565_v48 = vpop.permute.xlu1 %719 }
 0x3cd   :  { %757 = vrot.lane.b32.xlu0 %v3563_v47, %s2810_s6  ;;  %755 = vrot.lane.b32.xlu1 %v3565_v48, %s2810_s6 }
 0x3ce   :  { %753 = vrot.lane.b32.xlu2 %v3522_v39, %s2810_s6 }
 0x3d5   :  { %751 = vrot.lane.b32.xlu0 %v3518_v36, %s2810_s6  ;;  %749 = vrot.lane.b32.xlu1 %v3514_v13, %s2810_s6 }
 0x3dd   :  { %2568 = vrot.lane.b32.xlu1 %v2567_v49, %s2811_s0 }
 0x3ff   :  { %v768_v52 = vpop.permute.xlu1 %767 }
 0x40f   :  { %v772_v51 = vpop.permute.xlu2 %771 }
 0x410   :  { %2430 = vmatpush.xpose.msk.msrb.mxu3 %vm773_vm15, %v772_v51 }
 0x417   :  { %v766_v54 = vpop.permute.xlu2 %765 }
 0x420   :  { %v760_v58 = vpop.permute.xlu2 %759 }
 0x428   :  { %v754_v61 = vpop.permute.xlu2 %753 }
 0x42f   :  { %v770_v53 = vpop.permute.xlu0 %769 }
 0x430   :  { %2431 = vmatpush.xpose.msk.msrb.mxu3 %vm773_vm15, %v770_v53 }
 0x434   :  { %2432 = vmatpush.xpose.msk.msrb.mxu3 %vm773_vm15, %v768_v52 }
 0x437   :  { %v762_v55 = vpop.permute.xlu1 %761  ;;  %v764_v56 = vpop.permute.xlu0 %763 }
 0x438   :  { %2433 = vmatpush.xpose.msk.msrb.mxu3 %vm773_vm15, %v766_v54 }
 0x43c   :  { %2434 = vmatpush.xpose.msk.msrb.mxu3 %vm773_vm15, %v764_v56 }
 0x43f   :  { %v756_v57 = vpop.permute.xlu1 %755  ;;  %v758_v59 = vpop.permute.xlu0 %757 }
 0x440   :  { %2435 = vmatpush.xpose.msk.msrb.mxu3 %vm773_vm15, %v762_v55 }
 0x444   :  { %2436 = vmatpush.xpose.msk.msrb.mxu3 %vm773_vm15, %v760_v58 }
 0x447   :  { %v750_v60 = vpop.permute.xlu1 %749  ;;  %v752_v2 = vpop.permute.xlu0 %751 }
 0x448   :  { %2437 = vmatpush.xpose.msk.msrb.mxu3 %vm773_vm15, %v758_v59 }
 0x44c   :  { %2438 = vmatpush.xpose.msk.msrb.mxu3 %vm773_vm15, %v756_v57 }
 0x44f   :  { %v2569_v62 = vpop.permute.xlu1 %2568 }
 0x450   :  { %v2570_v0 = vunpack.i.l.bf16 %v2569_v62  ;;  %2439 = vmatpush.xpose.msk.msrb.mxu3 %vm773_vm15, %v754_v61  ;;  %v2571_v1 = vunpack.i.h.bf16 %v2569_v62  ;;  %v746_v61 = vld [vmem:[#allocation3 + $0x48] sm:$0xff] }
 0x452   :  { %1095 = vmatpush.msra.mxu2 %v2570_v0 }
 0x454   :  { %2440 = vmatpush.xpose.msk.msrb.mxu3 %vm773_vm15, %v752_v2  ;;  %1096 = vmatpush.msra.mxu2 %v2571_v1 }
 0x458   :  { %2441 = vmatpush.xpose.msk.msrb.mxu3 %vm773_vm15, %v750_v60 }
 0x45b   :  { %2442 = vmatmul.msk.f32.vlgmr.msrb.gmra.mxu3 %vm773_vm15, %v3514_v13 }
 0x463   :  { %2443 = vmatmul.msk.f32.gmra.mxu3 %vm773_vm15, %v3518_v36 }
 0x46b   :  { %2444 = vmatmul.msk.f32.gmra.mxu3 %vm773_vm15, %v3522_v39 }
 0x473   :  { %2445 = vmatmul.msk.f32.gmra.mxu3 %vm773_vm15, %v3565_v48 }
 0x47b   :  { %2446 = vmatmul.msk.f32.gmra.mxu3 %vm773_vm15, %v3563_v47 }
 0x483   :  { %2447 = vmatmul.msk.f32.gmra.mxu3 %vm773_vm15, %v3555_v46 }
 0x48b   :  { %2448 = vmatmul.msk.f32.gmra.mxu3 %vm773_vm15, %v3553_v45 }
 0x493   :  { %2449 = vmatmul.msk.f32.gmra.mxu3 %vm773_vm15, %v3551_v44 }
 0x49b   :  { %2450 = vmatmul.msk.f32.gmra.mxu3 %vm773_vm15, %v3546_v41  ;;  %v2587_v41 = vpack.i.bf16 %v3522_v39, %v3565_v48  ;;  %v745_v48 = vld [vmem:[#allocation3 + $0x40] sm:$0xff] }
 0x4a3   :  { %2451 = vmatmul.msk.f32.gmra.mxu3 %vm773_vm15, %v3538_v40 }
 0x4ab   :  { %2452 = vmatmul.msk.f32.gmra.mxu3 %vm773_vm15, %v734_v42  ;;  %v2592_v42 = vpack.i.bf16 %v3514_v13, %v3518_v36 }
 0x4b3   :  { %2453 = vmatmul.msk.f32.gmra.mxu3 %vm773_vm15, %v3542_v43 }
 0x4de   :  { %v839_v4 = vpop.f32.mrf.mxu3 }
 0x4df   :  { %v840_v5 = vadd.f32 %v839_v4, %v737_v3 }
 0x4e1   :  { %v875_v6 = vsel %vm662_vm6, %v840_v5, -inf }
 0x4e2   :  { %876 = vmax.xlane.f32.xlu2 %v875_v6 }
 0x4e6   :  { %v842_v8 = vpop.f32.mrf.mxu3 }
 0x4e7   :  { %v843_v9 = vadd.f32 %v842_v8, %v738_v7 }
 0x4e9   :  { %v878_v10 = vsel %vm662_vm6, %v843_v9, -inf }
 0x4ea   :  { %879 = vmax.xlane.f32.xlu0 %v878_v10 }
 0x4ee   :  { %v845_v15 = vpop.f32.mrf.mxu3 }
 0x4ef   :  { %v846_v16 = vadd.f32 %v845_v15, %v739_v12  ;;  %v748_v15 = vld [vmem:[#allocation3 + $0x58] sm:$0xff] }
 0x4f1   :  { %v881_v17 = vsel %vm662_vm6, %v846_v16, -inf }
 0x4f2   :  { %882 = vmax.xlane.f32.xlu1 %v881_v17 }
 0x4f6   :  { %v848_v14 = vpop.f32.mrf.mxu3 }
 0x4f7   :  { %v849_v20 = vadd.f32 %v848_v14, %v740_v19 }
 0x4f9   :  { %v884_v21 = vsel %vm662_vm6, %v849_v20, -inf }
 0x4fa   :  { %885 = vmax.xlane.f32.xlu2 %v884_v21 }
 0x4fe   :  { %v851_v63 = vpop.f32.mrf.mxu3  ;;  %2578 = vrot.lane.b32.xlu0 %v2577_v11, %s2811_s0 }
 0x4ff   :  { %v3621_v18 = vadd.f32 %v851_v63, %v741_v50 }
 0x501   :  { %v887_v31 = vsel %vm662_vm6, %v3621_v18, -inf }
 0x502   :  { %888 = vmax.xlane.f32.xlu2 %v887_v31 }
 0x506   :  { %v854_v22 = vpop.f32.mrf.mxu3 }
 0x507   :  { %v3631_v26 = vadd.f32 %v854_v22, %v742_v25 }
 0x509   :  { %v890_v29 = vsel %vm662_vm6, %v3631_v26, -inf }
 0x50b   :  { %2583 = vrot.lane.b32.xlu1 %v2582_v23, %s2811_s0 }
 0x50e   :  { %v857_v28 = vpop.f32.mrf.mxu3 }
 0x50f   :  { %v3635_v37 = vadd.f32 %v857_v28, %v743_v34 }
 0x511   :  { %v893_v38 = vsel %vm662_vm6, %v3635_v37, -inf }
 0x516   :  { %v860_v33 = vpop.f32.mrf.mxu3 }
 0x517   :  { %v3639_v40 = vadd.f32 %v860_v33, %v744_v30 }
 0x519   :  { %v896_v43 = vsel %vm662_vm6, %v3639_v40, -inf }
 0x51a   :  { %2573 = vrot.lane.b32.xlu2 %v2572_v24, %s2811_s0 }
 0x51e   :  { %v863_v46 = vpop.f32.mrf.mxu3 }
 0x51f   :  { %v3653_v56 = vadd.f32 %v863_v46, %v745_v48 }
 0x521   :  { %v899_v60 = vsel %vm662_vm6, %v3653_v56, -inf }
 0x526   :  { %v866_v54 = vpop.f32.mrf.mxu3 }
 0x527   :  { %v3657_v2 = vadd.f32 %v866_v54, %v746_v61 }
 0x528   :  { %891 = vmax.xlane.f32.xlu0 %v890_v29 }
 0x529   :  { %v902_v8 = vsel %vm662_vm6, %v3657_v2, -inf }
 0x52e   :  { %v869_v62 = vpop.f32.mrf.mxu3 }
 0x530   :  { %894 = vmax.xlane.f32.xlu0 %v893_v38 }
 0x535   :  { %897 = vmax.xlane.f32.xlu1 %v896_v43 }
 0x544   :  { %2588 = vrot.lane.b32.xlu0 %v2587_v41, %s2811_s0 }
 0x54c   :  { %2593 = vrot.lane.b32.xlu0 %v2592_v42, %s2811_s0 }
 0x555   :  { %v877_v44 = vpop.xlane.xlu2 %876 }
 0x556   :  { %v911_v45 = vsub.f32 %v840_v5, %v877_v44 }
 0x558   :  { %v923_v47 = vmul.f32 0.35355338, %v911_v45 }
 0x55a   :  { %v935_v49 = vmul.f32 1.442695, %v923_v47 }
 0x55c   :  { %2648 = vpow2.f32 %v935_v49 }
 0x55d   :  { %v880_v51 = vpop.xlane.xlu0 %879 }
 0x55e   :  { %v912_v52 = vsub.f32 %v843_v9, %v880_v51  ;;  %v747_v9 = vld [vmem:[#allocation3 + $0x50] sm:$0xff] }
 0x55f   :  { %v3670_v19 = vadd.f32 %v869_v62, %v747_v9 }
 0x560   :  { %v924_v55 = vmul.f32 0.35355338, %v912_v52 }
 0x561   :  { %v905_v50 = vsel %vm662_vm6, %v3670_v19, -inf }
 0x562   :  { %v3649_v53 = vpop.eup %2648  ;;  %v937_v57 = vmul.f32 1.442695, %v924_v55 }
 0x563   :  { %v959_v39 = vsel %vm662_vm6, %v3649_v53, 0.0 }
 0x564   :  { %960 = vadd.xlane.f32.xlu2 %v959_v39  ;;  %2650 = vpow2.f32 %v937_v57 }
 0x565   :  { %v883_v13 = vpop.xlane.xlu1 %882 }
 0x566   :  { %v913_v36 = vsub.f32 %v846_v16, %v883_v13  ;;  %v872_v16 = vpop.f32.mrf.mxu3 }
 0x568   :  { %v925_v58 = vmul.f32 0.35355338, %v913_v36 }
 0x56a   :  { %v939_v59 = vmul.f32 1.442695, %v925_v58  ;;  %v3659_v4 = vpop.eup %2650 }
 0x56b   :  { %v962_v12 = vsel %vm662_vm6, %v3659_v4, 0.0 }
 0x56c   :  { %2652 = vpow2.f32 %v939_v59  ;;  %900 = vmax.xlane.f32.xlu2 %v899_v60 }
 0x56d   :  { %v886_v0 = vpop.xlane.xlu2 %885 }
 0x56e   :  { %v914_v1 = vsub.f32 %v849_v20, %v886_v0  ;;  %v3672_v20 = vadd.f32 %v872_v16, %v748_v15 }
 0x570   :  { %v926_v3 = vmul.f32 0.35355338, %v914_v1  ;;  %v2579_v24 = vpop.permute.xlu0 %2578 }
 0x571   :  { %v2580_v28 = vunpack.i.l.bf16 %v2579_v24  ;;  %v2581_v30 = vunpack.i.h.bf16 %v2579_v24 }
 0x572   :  { %v3661_v5 = vpop.eup %2652  ;;  %v941_v6 = vmul.f32 1.442695, %v926_v3 }
 0x573   :  { %v965_v7 = vsel %vm662_vm6, %v3661_v5, 0.0 }
 0x574   :  { %2654 = vpow2.f32 %v941_v6  ;;  %966 = vadd.xlane.f32.xlu1 %v965_v7  ;;  %903 = vmax.xlane.f32.xlu2 %v902_v8 }
 0x575   :  { %v889_v10 = vpop.xlane.xlu2 %888 }
 0x576   :  { %v915_v17 = vsub.f32 %v3621_v18, %v889_v10  ;;  %963 = vadd.xlane.f32.xlu0 %v962_v12  ;;  %v908_v18 = vsel %vm662_vm6, %v3672_v20, -inf }
 0x578   :  { %v927_v14 = vmul.f32 0.35355338, %v915_v17 }
 0x57a   :  { %v3674_v21 = vpop.eup %2654  ;;  %v943_v11 = vmul.f32 1.442695, %v927_v14 }
 0x57b   :  { %v968_v63 = vsel %vm662_vm6, %v3674_v21, 0.0 }
 0x57c   :  { %2656 = vpow2.f32 %v943_v11  ;;  %906 = vmax.xlane.f32.xlu2 %v905_v50  ;;  %969 = vadd.xlane.f32.xlu1 %v968_v63 }
 0x57d   :  { %v2574_v31 = vpop.permute.xlu2 %2573  ;;  %v2584_v29 = vpop.permute.xlu1 %2583 }
 0x57e   :  { %v2575_v23 = vunpack.i.l.bf16 %v2574_v31  ;;  %909 = vmax.xlane.f32.xlu0 %v908_v18  ;;  %v2576_v22 = vunpack.i.h.bf16 %v2574_v31  ;;  %v2585_v33 = vunpack.i.l.bf16 %v2584_v29  ;;  %v2586_v38 = vunpack.i.h.bf16 %v2584_v29 }
 0x580   :  { %1097 = vmatpush.msra.mxu2 %v2575_v23 }
 0x582   :  { %v3682_v25 = vpop.eup %2656  ;;  %1098 = vmatpush.msra.mxu2 %v2576_v22 }
 0x583   :  { %v971_v34 = vsel %vm662_vm6, %v3682_v25, 0.0 }
 0x584   :  { %972 = vadd.xlane.f32.xlu1 %v971_v34  ;;  %1099 = vmatpush.msra.mxu2 %v2580_v28 }
 0x586   :  { %1100 = vmatpush.msra.mxu2 %v2581_v30 }
 0x588   :  { %1101 = vmatpush.msra.mxu2 %v2585_v33 }
 0x58a   :  { %1102 = vmatpush.msra.mxu2 %v2586_v38 }
 0x59b   :  { %v892_v43 = vpop.xlane.xlu0 %891 }
 0x59c   :  { %v916_v41 = vsub.f32 %v3631_v26, %v892_v43 }
 0x59e   :  { %v928_v42 = vmul.f32 0.35355338, %v916_v41 }
 0x5a0   :  { %v945_v44 = vmul.f32 1.442695, %v928_v42 }
 0x5a2   :  { %2658 = vpow2.f32 %v945_v44 }
 0x5a3   :  { %v895_v45 = vpop.xlane.xlu0 %894 }
 0x5a4   :  { %v917_v46 = vsub.f32 %v3635_v37, %v895_v45 }
 0x5a6   :  { %v929_v47 = vmul.f32 0.35355338, %v917_v46 }
 0x5a8   :  { %v3688_v49 = vpop.eup %2658  ;;  %v947_v51 = vmul.f32 1.442695, %v929_v47  ;;  %v898_v52 = vpop.xlane.xlu1 %897 }
 0x5a9   :  { %v918_v54 = vsub.f32 %v3639_v40, %v898_v52  ;;  %v974_v55 = vsel %vm662_vm6, %v3688_v49, 0.0 }
 0x5aa   :  { %2660 = vpow2.f32 %v947_v51  ;;  %975 = vadd.xlane.f32.xlu2 %v974_v55 }
 0x5ab   :  { %v930_v39 = vmul.f32 0.35355338, %v918_v54 }
 0x5ad   :  { %v949_v26 = vmul.f32 1.442695, %v930_v39 }
 0x5af   :  { %2662 = vpow2.f32 %v949_v26 }
 0x5b0   :  { %v3693_v48 = vpop.eup %2660 }
 0x5b1   :  { %v977_v37 = vsel %vm662_vm6, %v3693_v48, 0.0 }
 0x5b2   :  { %978 = vadd.xlane.f32.xlu1 %v977_v37 }
 0x5b5   :  { %v3697_v13 = vpop.eup %2662 }
 0x5b6   :  { %v2589_v36 = vpop.permute.xlu0 %2588  ;;  %v980_v40 = vsel %vm662_vm6, %v3697_v13, 0.0 }
 0x5b7   :  { %v2590_v57 = vunpack.i.l.bf16 %v2589_v36  ;;  %981 = vadd.xlane.f32.xlu0 %v980_v40  ;;  %v2591_v58 = vunpack.i.h.bf16 %v2589_v36 }
 0x5b9   :  { %1103 = vmatpush.msra.mxu2 %v2590_v57 }
 0x5bb   :  { %1104 = vmatpush.msra.mxu2 %v2591_v58 }
 0x5be   :  { %v2594_v59 = vpop.permute.xlu0 %2593 }
 0x5bf   :  { %v2595_v60 = vunpack.i.l.bf16 %v2594_v59  ;;  %v2596_v61 = vunpack.i.h.bf16 %v2594_v59 }
 0x5c1   :  { %1105 = vmatpush.msra.mxu2 %v2595_v60 }
 0x5c3   :  { %1106 = vmatpush.msra.mxu2 %v2596_v61 }
 0x5d7   :  { %v961_v62 = vpop.xlane.xlu2 %960 }
 0x5d8   :  { %2664 = vrcp.f32 %v961_v62 }
 0x5de   :  { %v2665_v0 = vpop.eup %2664 }
 0x5df   :  { %v1007_v1 = vmul.f32 %v2665_v0, %v3649_v53  ;;  %v901_v3 = vpop.xlane.xlu2 %900 }
 0x5e0   :  { %v919_v6 = vsub.f32 %v3653_v56, %v901_v3 }
 0x5e1   :  { %2454 = vmatmul.msk.f32.vlgmr.msra.gmra.mxu2 %vm662_vm6, %v1007_v1 }
 0x5e2   :  { %v931_v7 = vmul.f32 0.35355338, %v919_v6 }
 0x5e4   :  { %v951_v8 = vmul.f32 1.442695, %v931_v7 }
 0x5e6   :  { %2666 = vpow2.f32 %v951_v8 }
 0x5e7   :  { %v904_v9 = vpop.xlane.xlu2 %903  ;;  %v967_v12 = vpop.xlane.xlu1 %966 }
 0x5e8   :  { %v920_v10 = vsub.f32 %v3657_v2, %v904_v9 }
 0x5e9   :  { %v964_v15 = vpop.xlane.xlu0 %963 }
 0x5ea   :  { %v932_v16 = vmul.f32 0.35355338, %v920_v10  ;;  %2668 = vrcp.f32 %v964_v15 }
 0x5ec   :  { %v2667_v17 = vpop.eup %2666  ;;  %v953_v14 = vmul.f32 1.442695, %v932_v16  ;;  %v1194_v16 = vld [vmem:[%s4320_s2 + $0x198] sm:$0xff] }
 0x5ed   :  { %v983_v11 = vsel %vm662_vm6, %v2667_v17, 0.0  ;;  %1218 = vmatpush.msra.mxu0 %v1194_v16 }
 0x5ee   :  { %2670 = vpow2.f32 %v953_v14  ;;  %984 = vadd.xlane.f32.xlu2 %v983_v11  ;;  %v1192_v14 = vld [vmem:[%s4320_s2 + $0x188] sm:$0xff]  ;;  %v1191_v11 = vld [vmem:[%s4320_s2 + $0x180] sm:$0xff] }
 0x5ef   :  { %v907_v53 = vpop.xlane.xlu2 %906  ;;  %2672 = vrcp.f32 %v967_v12  ;;  %v970_v23 = vpop.xlane.xlu1 %969 }
 0x5f0   :  { %v2669_v56 = vpop.eup %2668  ;;  %v921_v50 = vsub.f32 %v3670_v19, %v907_v53 }
 0x5f1   :  { %v910_v63 = vpop.xlane.xlu0 %909  ;;  %v1008_v31 = vmul.f32 %v2669_v56, %v3659_v4 }
 0x5f2   :  { %v933_v18 = vmul.f32 0.35355338, %v921_v50  ;;  %v922_v2 = vsub.f32 %v3672_v20, %v910_v63 }
 0x5f3   :  { %2455 = vmatmul.msk.f32.gmra.mxu2 %vm662_vm6, %v1008_v31 }
 0x5f4   :  { %v2671_v24 = vpop.eup %2670  ;;  %v955_v22 = vmul.f32 1.442695, %v933_v18  ;;  %v934_v28 = vmul.f32 0.35355338, %v922_v2 }
 0x5f5   :  { %v986_v29 = vsel %vm662_vm6, %v2671_v24, 0.0  ;;  %v2673_v34 = vpop.eup %2672 }
 0x5f6   :  { %2674 = vpow2.f32 %v955_v22  ;;  %v957_v30 = vmul.f32 1.442695, %v934_v28  ;;  %987 = vadd.xlane.f32.xlu1 %v986_v29  ;;  %v1009_v19 = vmul.f32 %v2673_v34, %v3661_v5 }
 0x5f7   :  { %2676 = vrcp.f32 %v970_v23  ;;  %v973_v33 = vpop.xlane.xlu1 %972 }
 0x5f8   :  { %2678 = vpow2.f32 %v957_v30 }
 0x5f9   :  { %2680 = vrcp.f32 %v973_v33 }
 0x5fb   :  { %2456 = vmatmul.msk.f32.gmra.mxu2 %vm662_vm6, %v1009_v19 }
 0x5fc   :  { %v2675_v4 = vpop.eup %2674 }
 0x5fd   :  { %v2677_v20 = vpop.eup %2676  ;;  %v989_v38 = vsel %vm662_vm6, %v2675_v4, 0.0 }
 0x5fe   :  { %v2679_v43 = vpop.eup %2678  ;;  %990 = vadd.xlane.f32.xlu0 %v989_v38  ;;  %v1010_v42 = vmul.f32 %v2677_v20, %v3674_v21  ;;  %v1327_v38 = vld [vmem:[%s4321_s3 + $0x38] sm:$0xff] }
 0x5ff   :  { %v992_v41 = vsel %vm662_vm6, %v2679_v43, 0.0  ;;  %v2681_v44 = vpop.eup %2680  ;;  %1351 = vmatpush.msrb.mxu1 %v1327_v38 }
 0x600   :  { %993 = vadd.xlane.f32.xlu2 %v992_v41  ;;  %v1011_v5 = vmul.f32 %v2681_v44, %v3682_v25  ;;  %v2632_v41 = vld [vmem:[%s4319_s1 + $0x6] ss:$0 sm:$0xff] }
 0x603   :  { %2457 = vmatmul.msk.f32.gmra.mxu2 %vm662_vm6, %v1010_v42 }
 0x60b   :  { %2458 = vmatmul.msk.f32.gmra.mxu2 %vm662_vm6, %v1011_v5 }
 0x61d   :  { %v976_v45 = vpop.xlane.xlu2 %975 }
 0x61e   :  { %2682 = vrcp.f32 %v976_v45 }
 0x624   :  { %v2683_v46 = vpop.eup %2682 }
 0x625   :  { %v979_v47 = vpop.xlane.xlu1 %978  ;;  %v1012_v51 = vmul.f32 %v2683_v46, %v3688_v49 }
 0x626   :  { %2684 = vrcp.f32 %v979_v47 }
 0x627   :  { %2459 = vmatmul.msk.f32.gmra.mxu2 %vm662_vm6, %v1012_v51 }
 0x62a   :  { %v982_v52 = vpop.xlane.xlu0 %981 }
 0x62b   :  { %2686 = vrcp.f32 %v982_v52 }
 0x62c   :  { %v2685_v54 = vpop.eup %2684 }
 0x62d   :  { %v1013_v21 = vmul.f32 %v2685_v54, %v3693_v48 }
 0x62f   :  { %2460 = vmatmul.msk.f32.gmra.mxu2 %vm662_vm6, %v1013_v21 }
 0x631   :  { %v2687_v55 = vpop.eup %2686 }
 0x632   :  { %v1014_v25 = vmul.f32 %v2687_v55, %v3697_v13 }
 0x637   :  { %2461 = vmatmul.msk.f32.gmra.mxu2 %vm662_vm6, %v1014_v25 }
 0x661   :  { %v985_v39 = vpop.xlane.xlu2 %984 }
 0x662   :  { %2688 = vrcp.f32 %v985_v39 }
 0x664   :  { %v1108_v36 = vpop.f32.mrf.mxu2 }
 0x668   :  { %v2689_v26 = vpop.eup %2688 }
 0x669   :  { %v988_v37 = vpop.xlane.xlu1 %987  ;;  %v1015_v49 = vmul.f32 %v2689_v26, %v2667_v17  ;;  %v1193_v17 = vld [vmem:[%s4320_s2 + $0x190] sm:$0xff] }
 0x66a   :  { %2690 = vrcp.f32 %v988_v37  ;;  %1219 = vmatpush.msra.mxu0 %v1193_v17 }
 0x66b   :  { %2462 = vmatmul.msk.f32.gmra.mxu2 %vm662_vm6, %v1015_v49 }
 0x66c   :  { %1220 = vmatpush.msra.mxu0 %v1192_v14 }
 0x66e   :  { %1221 = vmatpush.msra.mxu0 %v1191_v11 }
 0x670   :  { %v2691_v40 = vpop.eup %2690 }
 0x671   :  { %v991_v57 = vpop.xlane.xlu0 %990  ;;  %v1016_v58 = vmul.f32 %v2691_v40, %v2671_v24 }
 0x672   :  { %2692 = vrcp.f32 %v991_v57 }
 0x673   :  { %2463 = vmatmul.msk.f32.gmra.mxu2 %vm662_vm6, %v1016_v58  ;;  %v994_v48 = vpop.xlane.xlu2 %993 }
 0x674   :  { %2694 = vrcp.f32 %v994_v48 }
 0x676   :  { %v1111_v59 = vpop.f32.mrf.mxu2 }
 0x678   :  { %v2693_v13 = vpop.eup %2692 }
 0x679   :  { %v1017_v60 = vmul.f32 %v2693_v13, %v2675_v4 }
 0x67a   :  { %v2695_v61 = vpop.eup %2694 }
 0x67b   :  { %2464 = vmatmul.msk.f32.gmra.mxu2 %vm662_vm6, %v1017_v60  ;;  %v1018_v0 = vmul.f32 %v2695_v61, %v2679_v43  ;;  %v1326_v43 = vld [vmem:[%s4321_s3 + $0x30] sm:$0xff]  ;;  %v1325_v60 = vld [vmem:[%s4321_s3 + $0x28] sm:$0xff] }
 0x67c   :  { %1352 = vmatpush.msrb.mxu1 %v1326_v43  ;;  %v2633_v43 = vld [vmem:[%s4319_s1 + $0x9] ss:$0 sm:$0xff] }
 0x67e   :  { %v1114_v62 = vpop.f32.mrf.mxu2  ;;  %1353 = vmatpush.msrb.mxu1 %v1325_v60  ;;  %v1370_v60 = vld [vmem:[%s4320_s2 + $0x110] sm:$0xff] }
 0x683   :  { %2465 = vmatmul.msk.f32.gmra.mxu2 %vm662_vm6, %v1018_v0 }
 0x686   :  { %v1117_v1 = vpop.f32.mrf.mxu2 }
 0x687   :  { %1147 = vrot.lane.b32.xlu1 %v1117_v1, %s2812_s7 }
 0x68e   :  { %v1120_v3 = vpop.f32.mrf.mxu2 }
 0x6aa   :  { %v1123_v6 = vpop.f32.mrf.mxu2 }
 0x6b2   :  { %v1126_v7 = vpop.f32.mrf.mxu2 }
 0x6b3   :  { %1159 = vrot.lane.b32.xlu0 %v1126_v7, %s2813_s8 }
 0x6ba   :  { %v1129_v8 = vpop.f32.mrf.mxu2 }
 0x6bb   :  { %1149 = vrot.lane.b32.xlu0 %v1120_v3, %s2812_s7  ;;  %1161 = vrot.lane.b32.xlu1 %v1129_v8, %s2813_s8 }
 0x6c3   :  { %1151 = vrot.lane.b32.xlu0 %v1123_v6, %s2812_s7 }
 0x6ee   :  { %v1132_v9 = vpop.f32.mrf.mxu2 }
 0x6ef   :  { %1163 = vrot.lane.b32.xlu1 %v1132_v9, %s2813_s8  ;;  %v1324_v9 = vld [vmem:[%s4321_s3 + $0x20] sm:$0xff] }
 0x6f0   :  { %1354 = vmatpush.msrb.mxu1 %v1324_v9 }
 0x6f6   :  { %v1135_v10 = vpop.f32.mrf.mxu2 }
 0x6f7   :  { %1171 = vrot.lane.b32.xlu2 %v1135_v10, %s2814_s9 }
 0x6f9   :  { %v1148_v56 = vpop.permute.xlu1 %1147 }
 0x6fa   :  { %v1180_v50 = vsel %vm773_vm15, %v1108_v36, %v1148_v56  ;;  %v2815_v36 = vmov 32.0  }
 0x6fb   :  { %2696 = vrcp.f32 %v2815_v36 }
 0x6fe   :  { %v1138_v12 = vpop.f32.mrf.mxu2 }
 0x6ff   :  { %1173 = vrot.lane.b32.xlu2 %v1138_v12, %s2814_s9 }
 0x701   :  { %v2697_v40 = vpop.eup %2696 }
 0x702   :  { %v1247_v57 = vmul.f32 32.0, %v2697_v40  ;;  %vm1251_vm0 = vweird.f32 %v2697_v40 }
 0x704   :  { %v1248_v58 = vsub.f32 1.0, %v1247_v57 }
 0x706   :  { %v1141_v15 = vpop.f32.mrf.mxu2  ;;  %v1249_v48 = vmul.f32 %v2697_v40, %v1248_v58 }
 0x707   :  { %1175 = vrot.lane.b32.xlu2 %v1141_v15, %s2814_s9 }
 0x725   :  { %v1160_v53 = vpop.permute.xlu0 %1159 }
 0x726   :  { %v1184_v63 = vsel %vm1183_vm4, %v1180_v50, %v1160_v53 }
 0x72d   :  { %v1150_v2 = vpop.permute.xlu0 %1149  ;;  %v1162_v24 = vpop.permute.xlu1 %1161 }
 0x72e   :  { %v1181_v23 = vsel %vm773_vm15, %v1111_v59, %v1150_v2  ;;  %v1250_v59 = vadd.f32 %v2697_v40, %v1249_v48 }
 0x72f   :  { %v1185_v22 = vsel %vm1183_vm4, %v1181_v23, %v1162_v24 }
 0x735   :  { %v1152_v34 = vpop.permute.xlu0 %1151 }
 0x736   :  { %v1182_v30 = vsel %vm773_vm15, %v1114_v62, %v1152_v34  ;;  %v1372_v34 = vld [vmem:[%s4320_s2 + $0x120] sm:$0xff] }
 0x751   :  { %v1172_v31 = vpop.permute.xlu2 %1171 }
 0x752   :  { %v1188_v18 = vsel %vm1187_vm1, %v1184_v63, %v1172_v31  ;;  %v1375_v63 = vld [vmem:[%s4320_s2 + $0x138] sm:$0xff]  ;;  %v1374_v31 = vld [vmem:[%s4320_s2 + $0x130] sm:$0xff] }
 0x753   :  { %2466 = vmatmul.msk.f32.vlgmr.msra.gmra.mxu0 %vm4465_vm7, %v1188_v18  ;;  %1395 = vmatpush.msrb.mxu2 %v1375_v63 }
 0x755   :  { %1396 = vmatpush.msrb.mxu2 %v1374_v31 }
 0x759   :  { %v1174_v28 = vpop.permute.xlu2 %1173 }
 0x75a   :  { %v1189_v29 = vsel %vm1187_vm1, %v1185_v22, %v1174_v28  ;;  %v1373_v22 = vld [vmem:[%s4320_s2 + $0x128] sm:$0xff] }
 0x75b   :  { %2467 = vmatmul.msk.f32.gmra.mxu0 %vm4466_vm9, %v1189_v29  ;;  %1397 = vmatpush.msrb.mxu2 %v1373_v22 }
 0x75d   :  { %1398 = vmatpush.msrb.mxu2 %v1372_v34 }
 0x761   :  { %v1164_v19 = vpop.permute.xlu1 %1163  ;;  %v1176_v4 = vpop.permute.xlu2 %1175 }
 0x762   :  { %v1186_v20 = vsel %vm1183_vm4, %v1182_v30, %v1164_v19 }
 0x763   :  { %v1190_v33 = vsel %vm1187_vm1, %v1186_v20, %v1176_v4 }
 0x764   :  { %2468 = vmatmul.msk.f32.gmra.mxu0 %vm4467_vm5, %v1190_v33  ;;  %v1371_v33 = vld [vmem:[%s4320_s2 + $0x118] sm:$0xff] }
 0x765   :  { %1399 = vmatpush.msrb.mxu2 %v1371_v33 }
 0x767   :  { %1400 = vmatpush.msrb.mxu2 %v1370_v60 }
 0x7d0   :  { %v1223_v42 = vpop.f32.mrf.mxu0 }
 0x7d1   :  { %v1224_v44 = vadd.f32 %v2632_v41, %v1223_v42 }
 0x7d3   :  { %v3772_v5 = vadd.f32 %v1224_v44, %v3496_v32 }
 0x7d5   :  { %v1237_v45 = vsel %vm4468_vm8, %v3772_v5, 0.0  ;;  %v1256_v46 = vmul.f32 %v3772_v5, %v3772_v5 }
 0x7d6   :  { %1238 = vadd.xlane.f32.xlu0 %v1237_v45  ;;  %v2634_v45 = vld [vmem:[%s4319_s1 + $0xa] ss:$0 sm:$0xff] }
 0x7d7   :  { %v1259_v47 = vsel %vm4469_vm3, %v1256_v46, 0.0 }
 0x7d8   :  { %1260 = vadd.xlane.f32.xlu1 %v1259_v47  ;;  %v1226_v51 = vpop.f32.mrf.mxu0 }
 0x7d9   :  { %v1227_v52 = vadd.f32 %v2632_v41, %v1226_v51 }
 0x7db   :  { %v3780_v54 = vadd.f32 %v1227_v52, %v3500_v35 }
 0x7dd   :  { %v1240_v21 = vsel %vm4470_vm10, %v3780_v54, 0.0  ;;  %v1257_v32 = vmul.f32 %v3780_v54, %v3780_v54 }
 0x7de   :  { %1241 = vadd.xlane.f32.xlu2 %v1240_v21 }
 0x7df   :  { %v1262_v55 = vsel %vm4471_vm11, %v1257_v32, 0.0 }
 0x7e0   :  { %1263 = vadd.xlane.f32.xlu0 %v1262_v55 }
 0x7e1   :  { %v1229_v25 = vpop.f32.mrf.mxu0 }
 0x7e2   :  { %v1230_v39 = vadd.f32 %v2632_v41, %v1229_v25 }
 0x7e4   :  { %v3788_v26 = vadd.f32 %v3507_v27, %v1230_v39  ;;  %v3795_v27 = vsel %vm1251_vm0, %v2697_v40, %v1250_v59  ;;  %vm4475_vm0 = vmmov %vm4469_vm3 }
 0x7e6   :  { %v1243_v37 = vsel %vm4472_vm12, %v3788_v26, 0.0  ;;  %v1258_v35 = vmul.f32 %v3788_v26, %v3788_v26  ;;  %vm4474_vm12 = vmmov %vm4469_vm3 }
 0x7e7   :  { %1244 = vadd.xlane.f32.xlu1 %v1243_v37 }
 0x7e8   :  { %v1265_v49 = vsel %vm4473_vm13, %v1258_v35, 0.0 }
 0x7e9   :  { %1266 = vadd.xlane.f32.xlu2 %v1265_v49 }
 0x849   :  { %v1239_v13 = vpop.xlane.xlu0 %1238 }
 0x84a   :  { %v1253_v61 = vmul.f32 %v3795_v27, %v1239_v13 }
 0x84b   :  { %v1261_v62 = vpop.xlane.xlu1 %1260 }
 0x84c   :  { %v1271_v0 = vmul.f32 %v1253_v61, %v1253_v61  ;;  %v1268_v1 = vmul.f32 %v1261_v62, %v3795_v27  ;;  %v1277_v38 = vsub.f32 %v3772_v5, %v1253_v61  ;;  %v1369_v61 = vld [vmem:[%s4320_s2 + $0x108] sm:$0xff]  ;;  %v2635_v62 = vld [vmem:[%s4319_s1 + $0x7] ss:$0 sm:$0xff] }
 0x84d   :  { %1401 = vmatpush.msrb.mxu2 %v1369_v61 }
 0x84e   :  { %v1274_v3 = vsub.f32 %v1268_v1, %v1271_v0 }
 0x850   :  { %v1280_v6 = vadd.f32 1e-05, %v1274_v3 }
 0x851   :  { %v1242_v7 = vpop.xlane.xlu2 %1241 }
 0x852   :  { %2698 = vrsqrt.f32 %v1280_v6  ;;  %v1254_v8 = vmul.f32 %v3795_v27, %v1242_v7  ;;  %vm1289_vm14 = vweird.f32 %v1280_v6 }
 0x853   :  { %v1264_v10 = vpop.xlane.xlu0 %1263 }
 0x854   :  { %v1272_v12 = vmul.f32 %v1254_v8, %v1254_v8  ;;  %v1269_v15 = vmul.f32 %v1264_v10, %v3795_v27  ;;  %v1278_v32 = vsub.f32 %v3780_v54, %v1254_v8 }
 0x856   :  { %v1275_v16 = vsub.f32 %v1269_v15, %v1272_v12  ;;  %v2636_v15 = vld [vmem:[%s4319_s1 + $0x8] ss:$0 sm:$0xff] }
 0x858   :  { %v2699_v17 = vpop.eup %2698  ;;  %v1281_v14 = vadd.f32 1e-05, %v1275_v16 }
 0x859   :  { %v1284_v11 = vmul.f32 %v2699_v17, %v1280_v6  ;;  %vm1290_vm2 = vweird.f32 %v2699_v17 }
 0x85a   :  { %2700 = vrsqrt.f32 %v1281_v14  ;;  %v1245_v53 = vpop.xlane.xlu1 %1244  ;;  %vm1291_vm7 = vmor %vm1289_vm14, %vm1290_vm2  ;;  %vm1299_vm5 = vweird.f32 %v1281_v14  ;;  %vm4476_vm2 = vcmask 523264  }
 0x85b   :  { %v1285_v56 = vmul.f32 %v2699_v17, %v1284_v11  ;;  %v1255_v50 = vmul.f32 %v3795_v27, %v1245_v53  ;;  %vm4477_vm14 = vmmov %vm4476_vm2 }
 0x85c   :  { %v1267_v18 = vpop.xlane.xlu2 %1266 }
 0x85d   :  { %v1286_v2 = vmul.f32 0.5, %v1285_v56  ;;  %v1273_v23 = vmul.f32 %v1255_v50, %v1255_v50  ;;  %v1270_v24 = vmul.f32 %v1267_v18, %v3795_v27  ;;  %v1279_v58 = vsub.f32 %v3788_v26, %v1255_v50  ;;  %v1368_v26 = vld [vmem:[%s4320_s2 + $0x100] sm:$0xff] }
 0x85e   :  { %1402 = vmatpush.msrb.mxu2 %v1368_v26 }
 0x85f   :  { %v1287_v28 = vsub.f32 1.5, %v1286_v2  ;;  %v1276_v29 = vsub.f32 %v1270_v24, %v1273_v23 }
 0x860   :  { %v2701_v30 = vpop.eup %2700 }
 0x861   :  { %v1288_v19 = vmul.f32 %v2699_v17, %v1287_v28  ;;  %v1294_v4 = vmul.f32 %v2701_v30, %v1281_v14  ;;  %v1282_v20 = vadd.f32 1e-05, %v1276_v29  ;;  %vm1300_vm9 = vweird.f32 %v2701_v30 }
 0x862   :  { %vm1301_vm8 = vmor %vm1299_vm5, %vm1300_vm9 }
 0x863   :  { %v1292_v41 = vsel %vm1291_vm7, %v2699_v17, %v1288_v19  ;;  %v1295_v42 = vmul.f32 %v2701_v30, %v1294_v4  ;;  %2702 = vrsqrt.f32 %v1282_v20  ;;  %vm1309_vm11 = vweird.f32 %v1282_v20  ;;  %vm4478_vm7 = vmmov %vm4476_vm2 }
 0x864   :  { %v1313_v44 = vmul.f32 %v1292_v41, %v1277_v38  ;;  %vm4479_vm9 = vmmov %vm4475_vm0 }
 0x865   :  { %v1296_v46 = vmul.f32 0.5, %v1295_v42  ;;  %vm4480_vm5 = vmmov %vm4475_vm0  ;;  %v2477_v42 = vld [vmem:[%s4322_s4 + $0x30] sm:$0xff] }
 0x866   :  { %v1317_v47 = vmul.f32 %v2633_v43, %v1313_v44 }
 0x867   :  { %v1297_v51 = vsub.f32 1.5, %v1296_v46 }
 0x868   :  { %v1321_v5 = vadd.f32 %v2634_v45, %v1317_v47 }
 0x869   :  { %v2703_v52 = vpop.eup %2702  ;;  %v1298_v21 = vmul.f32 %v2701_v30, %v1297_v51  ;;  %v2475_v51 = vld [vmem:[%s4322_s4 + $0x20] sm:$0xff] }
 0x86a   :  { %v1304_v55 = vmul.f32 %v2703_v52, %v1282_v20  ;;  %2469 = vmatmul.msk.f32.vlgmr.msrb.gmra.mxu1 %vm4469_vm3, %v1321_v5  ;;  %vm1310_vm10 = vweird.f32 %v2703_v52  ;;  %vm4482_vm3 = vmmov %vm4475_vm0 }
 0x86b   :  { %v1302_v25 = vsel %vm1301_vm8, %v2701_v30, %v1298_v21  ;;  %vm1311_vm13 = vmor %vm1309_vm11, %vm1310_vm10 }
 0x86c   :  { %v1305_v39 = vmul.f32 %v2703_v52, %v1304_v55  ;;  %v1314_v37 = vmul.f32 %v1302_v25, %v1278_v32  ;;  %vm4481_vm8 = vmmov %vm4475_vm0 }
 0x86d   :  { %vm4483_vm10 = vmmov %vm4475_vm0 }
 0x86e   :  { %v1306_v35 = vmul.f32 0.5, %v1305_v39  ;;  %v1318_v49 = vmul.f32 %v2633_v43, %v1314_v37  ;;  %vm4484_vm11 = vmmov %vm4475_vm0 }
 0x870   :  { %v1307_v36 = vsub.f32 1.5, %v1306_v35  ;;  %v1322_v40 = vadd.f32 %v2634_v45, %v1318_v49 }
 0x872   :  { %v1308_v57 = vmul.f32 %v2703_v52, %v1307_v36  ;;  %2470 = vmatmul.msk.f32.gmra.mxu1 %vm4474_vm12, %v1322_v40 }
 0x874   :  { %v1312_v54 = vsel %vm1311_vm13, %v2703_v52, %v1308_v57 }
 0x875   :  { %v1315_v48 = vmul.f32 %v1312_v54, %v1279_v58 }
 0x877   :  { %v1319_v59 = vmul.f32 %v2633_v43, %v1315_v48  ;;  %v2478_v43 = vld [vmem:[%s4322_s4 + $0x38] sm:$0xff] }
 0x878   :  { %1526 = vmatpush.msrb.mxu0 %v2478_v43 }
 0x879   :  { %v1323_v13 = vadd.f32 %v2634_v45, %v1319_v59  ;;  %v2476_v45 = vld [vmem:[%s4322_s4 + $0x28] sm:$0xff] }
 0x87a   :  { %1527 = vmatpush.msrb.mxu0 %v2477_v42 }
 0x87b   :  { %2471 = vmatmul.msk.f32.gmra.mxu1 %vm4475_vm0, %v1323_v13 }
 0x87c   :  { %1528 = vmatpush.msrb.mxu0 %v2476_v45 }
 0x87e   :  { %1529 = vmatpush.msrb.mxu0 %v2475_v51 }
 0x8e7   :  { %v1356_v0 = vpop.f32.mrf.mxu1 }
 0x8e8   :  { %v1357_v1 = vadd.f32 %v2635_v62, %v1356_v0 }
 0x8ea   :  { %v1365_v3 = vmax.f32 %v1357_v1, 0.0 }
 0x8ec   :  { %2472 = vmatmul.msk.f32.vlgmr.msrb.gmra.mxu2 %vm4476_vm2, %v1365_v3 }
 0x8ef   :  { %v1359_v6 = vpop.f32.mrf.mxu1 }
 0x8f0   :  { %v1360_v7 = vadd.f32 %v2635_v62, %v1359_v6  ;;  %v2638_v6 = vld [vmem:[%s4319_s1 + $0xc] ss:$0 sm:$0xff] }
 0x8f2   :  { %v1366_v8 = vmax.f32 %v1360_v7, 0.0 }
 0x8f4   :  { %2473 = vmatmul.msk.f32.gmra.mxu2 %vm4477_vm14, %v1366_v8 }
 0x8f8   :  { %v1362_v9 = vpop.f32.mrf.mxu1 }
 0x8f9   :  { %v1363_v10 = vadd.f32 %v2635_v62, %v1362_v9  ;;  %v2637_v62 = vld [vmem:[%s4319_s1 + $0xb] ss:$0 sm:$0xff] }
 0x8fb   :  { %v1367_v12 = vmax.f32 %v1363_v10, 0.0 }
 0x8fd   :  { %2474 = vmatmul.msk.f32.gmra.mxu2 %vm4478_vm7, %v1367_v12 }
 0x96f   :  { %v1404_v16 = vpop.f32.mrf.mxu2 }
 0x970   :  { %v1405_v17 = vadd.f32 %v2636_v15, %v1404_v16 }
 0x972   :  { %v3854_v14 = vadd.f32 %v1405_v17, %v1321_v5 }
 0x974   :  { %v1418_v11 = vsel %vm4479_vm9, %v3854_v14, 0.0  ;;  %v1430_v53 = vmul.f32 %v3854_v14, %v3854_v14  ;;  %vm4485_vm9 = vmmov %vm4482_vm3 }
 0x975   :  { %1419 = vadd.xlane.f32.xlu0 %v1418_v11 }
 0x976   :  { %v1433_v56 = vsel %vm4480_vm5, %v1430_v53, 0.0 }
 0x977   :  { %v1407_v50 = vpop.f32.mrf.mxu2  ;;  %1434 = vadd.xlane.f32.xlu1 %v1433_v56 }
 0x978   :  { %v1408_v63 = vadd.f32 %v2636_v15, %v1407_v50 }
 0x97a   :  { %v3861_v31 = vadd.f32 %v1408_v63, %v1322_v40 }
 0x97c   :  { %v1421_v18 = vsel %vm4481_vm8, %v3861_v31, 0.0  ;;  %v1431_v2 = vmul.f32 %v3861_v31, %v3861_v31 }
 0x97d   :  { %1422 = vadd.xlane.f32.xlu2 %v1421_v18 }
 0x97e   :  { %v1436_v23 = vsel %vm4482_vm3, %v1431_v2, 0.0 }
 0x97f   :  { %1437 = vadd.xlane.f32.xlu0 %v1436_v23 }
 0x980   :  { %v1410_v24 = vpop.f32.mrf.mxu2 }
 0x981   :  { %v1411_v22 = vadd.f32 %v2636_v15, %v1410_v24 }
 0x983   :  { %v3868_v28 = vadd.f32 %v1411_v22, %v1323_v13 }
 0x985   :  { %v1424_v29 = vsel %vm4483_vm10, %v3868_v28, 0.0  ;;  %v1432_v34 = vmul.f32 %v3868_v28, %v3868_v28 }
 0x986   :  { %1425 = vadd.xlane.f32.xlu1 %v1424_v29 }
 0x987   :  { %v1439_v30 = vsel %vm4484_vm11, %v1432_v34, 0.0  ;;  %vm4486_vm11 = vmmov %vm4482_vm3  ;;  %v2639_v34 = vld [vmem:[%s4319_s1 + $0xd] ss:$0 sm:$0xff] }
 0x988   :  { %1440 = vadd.xlane.f32.xlu2 %v1439_v30 }
 0x9e8   :  { %v1420_v19 = vpop.xlane.xlu0 %1419 }
 0x9e9   :  { %v1427_v4 = vmul.f32 %v1420_v19, %v3795_v27 }
 0x9ea   :  { %v1435_v20 = vpop.xlane.xlu1 %1434 }
 0x9eb   :  { %v1445_v33 = vmul.f32 %v1427_v4, %v1427_v4  ;;  %v1442_v38 = vmul.f32 %v1435_v20, %v3795_v27  ;;  %v1451_v26 = vsub.f32 %v3854_v14, %v1427_v4 }
 0x9ed   :  { %v1448_v41 = vsub.f32 %v1442_v38, %v1445_v33 }
 0x9ef   :  { %v1454_v44 = vadd.f32 1e-05, %v1448_v41 }
 0x9f0   :  { %v1423_v46 = vpop.xlane.xlu2 %1422 }
 0x9f1   :  { %2704 = vrsqrt.f32 %v1454_v44  ;;  %v1428_v47 = vmul.f32 %v1423_v46, %v3795_v27  ;;  %vm1463_vm13 = vweird.f32 %v1454_v44 }
 0x9f2   :  { %v1438_v5 = vpop.xlane.xlu0 %1437 }
 0x9f3   :  { %v1446_v52 = vmul.f32 %v1428_v47, %v1428_v47  ;;  %v1443_v21 = vmul.f32 %v1438_v5, %v3795_v27  ;;  %v1452_v16 = vsub.f32 %v3861_v31, %v1428_v47 }
 0x9f5   :  { %v1449_v32 = vsub.f32 %v1443_v21, %v1446_v52 }
 0x9f7   :  { %v2705_v55 = vpop.eup %2704  ;;  %v1455_v25 = vadd.f32 1e-05, %v1449_v32 }
 0x9f8   :  { %v1458_v39 = vmul.f32 %v2705_v55, %v1454_v44  ;;  %vm1464_vm12 = vweird.f32 %v2705_v55 }
 0x9f9   :  { %2706 = vrsqrt.f32 %v1455_v25  ;;  %v1426_v37 = vpop.xlane.xlu1 %1425  ;;  %vm1465_vm0 = vmor %vm1463_vm13, %vm1464_vm12  ;;  %vm1473_vm14 = vweird.f32 %v1455_v25 }
 0x9fa   :  { %v1459_v35 = vmul.f32 %v2705_v55, %v1458_v39  ;;  %v1429_v49 = vmul.f32 %v1426_v37, %v3795_v27  ;;  %vm4487_vm12 = vmmov %vm4482_vm3 }
 0x9fb   :  { %v1441_v36 = vpop.xlane.xlu2 %1440  ;;  %vm4488_vm13 = vmmov %vm4482_vm3 }
 0x9fc   :  { %v1460_v40 = vmul.f32 0.5, %v1459_v35  ;;  %v1447_v57 = vmul.f32 %v1429_v49, %v1429_v49  ;;  %v1444_v58 = vmul.f32 %v1441_v36, %v3795_v27  ;;  %v1453_v31 = vsub.f32 %v3868_v28, %v1429_v49 }
 0x9fe   :  { %v1461_v54 = vsub.f32 1.5, %v1460_v40  ;;  %v1450_v48 = vsub.f32 %v1444_v58, %v1447_v57 }
 0x9ff   :  { %v2707_v59 = vpop.eup %2706 }
 0xa00   :  { %v1462_v13 = vmul.f32 %v2705_v55, %v1461_v54  ;;  %v1468_v60 = vmul.f32 %v2707_v59, %v1455_v25  ;;  %v1456_v61 = vadd.f32 1e-05, %v1450_v48  ;;  %vm1474_vm2 = vweird.f32 %v2707_v59 }
 0xa01   :  { %vm1475_vm7 = vmor %vm1473_vm14, %vm1474_vm2 }
 0xa02   :  { %v1466_v0 = vsel %vm1465_vm0, %v2705_v55, %v1462_v13  ;;  %v1469_v1 = vmul.f32 %v2707_v59, %v1468_v60  ;;  %2708 = vrsqrt.f32 %v1456_v61  ;;  %vm1483_vm8 = vweird.f32 %v1456_v61  ;;  %v2766_v13 = vld [vmem:[#allocation3] sm:$0xff]  ;;  %vm4489_vm0 = vmmov %vm4482_vm3 }
 0xa03   :  { %v1487_v3 = vmul.f32 %v1466_v0, %v1451_v26  ;;  %vm4490_vm2 = vmmov %vm4489_vm0 }
 0xa04   :  { %v1470_v7 = vmul.f32 0.5, %v1469_v1  ;;  %vm4491_vm14 = vmmov %vm4489_vm0 }
 0xa05   :  { %v1491_v8 = vmul.f32 %v2637_v62, %v1487_v3 }
 0xa06   :  { %v1471_v9 = vsub.f32 1.5, %v1470_v7 }
 0xa07   :  { %v3900_v10 = vadd.f32 %v2638_v6, %v1491_v8 }
 0xa08   :  { %v2709_v12 = vpop.eup %2708  ;;  %v1472_v15 = vmul.f32 %v2707_v59, %v1471_v9 }
 0xa09   :  { %v1478_v17 = vmul.f32 %v2709_v12, %v1456_v61  ;;  %2479 = vmatmul.msk.f32.vlgmr.msrb.gmra.mxu0 %vm4485_vm9, %v3900_v10  ;;  %vm1484_vm5 = vweird.f32 %v2709_v12  ;;  %vm4493_vm9 = vmmov %vm4489_vm0 }
 0xa0a   :  { %v1476_v14 = vsel %vm1475_vm7, %v2707_v59, %v1472_v15  ;;  %vm1485_vm10 = vmor %vm1483_vm8, %vm1484_vm5 }
 0xa0b   :  { %v1479_v11 = vmul.f32 %v2709_v12, %v1478_v17  ;;  %v1488_v53 = vmul.f32 %v1476_v14, %v1452_v16  ;;  %v2770_v14 = vld [vmem:[#allocation3 + $0x20] sm:$0xff]  ;;  %vm4492_vm7 = vmmov %vm4489_vm0 }
 0xa0c   :  { %vm4494_vm5 = vmmov %vm4489_vm0 }
 0xa0d   :  { %v1480_v56 = vmul.f32 0.5, %v1479_v11  ;;  %v1492_v50 = vmul.f32 %v2637_v62, %v1488_v53  ;;  %vm4495_vm8 = vmmov %vm4489_vm0 }
 0xa0f   :  { %v1481_v63 = vsub.f32 1.5, %v1480_v56  ;;  %v3905_v18 = vadd.f32 %v2638_v6, %v1492_v50 }
 0xa11   :  { %v1482_v2 = vmul.f32 %v2709_v12, %v1481_v63  ;;  %2480 = vmatmul.msk.f32.gmra.mxu0 %vm4482_vm3, %v3905_v18  ;;  %vm4496_vm3 = vmmov %vm4489_vm0 }
 0xa13   :  { %v1486_v23 = vsel %vm1485_vm10, %v2709_v12, %v1482_v2  ;;  %v2769_v12 = vld [vmem:[#allocation3 + $0x18] sm:$0xff]  ;;  %vm4497_vm10 = vmmov %vm4489_vm0 }
 0xa14   :  { %v1489_v24 = vmul.f32 %v1486_v23, %v1453_v31  ;;  %v2771_v23 = vld [vmem:[#allocation3 + $0x28] sm:$0xff] }
 0xa16   :  { %v1493_v22 = vmul.f32 %v2637_v62, %v1489_v24  ;;  %v2767_v62 = vld [vmem:[#allocation3 + $0x8] sm:$0xff] }
 0xa18   :  { %v3910_v29 = vadd.f32 %v2638_v6, %v1493_v22  ;;  %v2768_v6 = vld [vmem:[#allocation3 + $0x10] sm:$0xff] }
 0xa1a   :  { %2481 = vmatmul.msk.f32.gmra.mxu0 %vm4486_vm11, %v3910_v29  ;;  %vm4498_vm11 = vmmov %vm4489_vm0 }
 0xa86   :  { %v1531_v30 = vpop.f32.mrf.mxu0 }
 0xa87   :  { %v3917_v19 = vadd.f32 %v2639_v34, %v1531_v30  ;;  %v2772_v30 = vld [vmem:[#allocation3 + $0x30] sm:$0xff] }
 0xa89   :  { %1555 = vrot.lane.b32.xlu2 %v3917_v19, %s2807_s28 }
 0xa8e   :  { %v1534_v28 = vpop.f32.mrf.mxu0 }
 0xa8f   :  { %v3921_v4 = vadd.f32 %v2639_v34, %v1534_v28 }
 0xa91   :  { %1557 = vrot.lane.b32.xlu1 %v3921_v4, %s2807_s28 }
 0xa97   :  { %v1537_v20 = vpop.f32.mrf.mxu0 }
 0xa98   :  { %v3925_v33 = vadd.f32 %v2639_v34, %v1537_v20  ;;  %v2773_v20 = vld [vmem:[#allocation3 + $0x38] sm:$0xff] }
 0xa99   :  { %1551 = vrot.lane.b32.xlu1 %v3921_v4, %s2808_s29 }
 0xa9a   :  { %1547 = vrot.lane.b32.xlu2 %v3925_v33, %s2809_s30  ;;  %1559 = vrot.lane.b32.xlu0 %v3925_v33, %s2807_s28  ;;  %s2366_s28 = sshll.u32 %s2816_s10, 4  ;;  %s2367_s28 = int_to_ptr.vmem [resolvable:$true] %s2366_s28 }
 0xaa1   :  { %1545 = vrot.lane.b32.xlu1 %v3921_v4, %s2809_s30 }
 0xaa2   :  { %1553 = vrot.lane.b32.xlu0 %v3925_v33, %s2808_s29 }
 0xaaa   :  { %1549 = vrot.lane.b32.xlu0 %v3917_v19, %s2808_s29 }
 0xab2   :  { %1543 = vrot.lane.b32.xlu0 %v3917_v19, %s2809_s30 }
 0xae3   :  { %v3941_v38 = vpop.permute.xlu2 %1555 }
 0xae4   :  { %1579 = vrot.lane.b32.xlu0 %v3941_v38, %s2810_s6 }
 0xaf4   :  { %v3959_v46 = vpop.permute.xlu2 %1547 }
 0xb03   :  { %v1558_v43 = vpop.permute.xlu1 %1557 }
 0xb04   :  { %1581 = vrot.lane.b32.xlu1 %v1558_v43, %s2810_s6 }
 0xb0b   :  { %v3946_v41 = vpop.permute.xlu1 %1551 }
 0xb0c   :  { %v1560_v42 = vpop.permute.xlu0 %1559  ;;  %1575 = vrot.lane.b32.xlu1 %v3946_v41, %s2810_s6 }
 0xb0d   :  { %1583 = vrot.lane.b32.xlu2 %v1560_v42, %s2810_s6  ;;  %v2597_v5 = vpack.i.bf16 %v1558_v43, %v1560_v42 }
 0xb13   :  { %v3951_v44 = vpop.permute.xlu1 %1545 }
 0xb14   :  { %v3953_v45 = vpop.permute.xlu0 %1553  ;;  %1569 = vrot.lane.b32.xlu1 %v3951_v44, %s2810_s6  ;;  %v2612_v50 = vpack.i.bf16 %v3951_v44, %v3959_v46 }
 0xb15   :  { %1577 = vrot.lane.b32.xlu2 %v3953_v45, %s2810_s6  ;;  %v2602_v63 = vpack.i.bf16 %v3953_v45, %v3941_v38 }
 0xb1c   :  { %v3961_v47 = vpop.permute.xlu0 %1549  ;;  %1563 = vrot.lane.b32.xlu1 %v3921_v4, %s2810_s6 }
 0xb1d   :  { %1571 = vrot.lane.b32.xlu2 %v3959_v46, %s2810_s6  ;;  %1573 = vrot.lane.b32.xlu0 %v3961_v47, %s2810_s6  ;;  %v2607_v56 = vpack.i.bf16 %v3961_v47, %v3946_v41 }
 0xb24   :  { %v3969_v51 = vpop.permute.xlu0 %1543 }
 0xb25   :  { %1565 = vrot.lane.b32.xlu2 %v3925_v33, %s2810_s6  ;;  %1567 = vrot.lane.b32.xlu0 %v3969_v51, %s2810_s6 }
 0xb2d   :  { %1561 = vrot.lane.b32.xlu0 %v3917_v19, %s2810_s6  ;;  %2598 = vrot.lane.b32.xlu2 %v2597_v5, %s2811_s0  ;;  %v2775_v5 = vld [vmem:[#allocation3 + $0x48] sm:$0xff]  ;;  %s2368_s6 = sshll.u32 %s4323_s5, 4  ;;  %s2369_s6 = int_to_ptr.hbm [resolvable:$true] %s2368_s6 }
 0xb56   :  { %v1580_v25 = vpop.permute.xlu0 %1579 }
 0xb67   :  { %v1584_v52 = vpop.permute.xlu2 %1583 }
 0xb68   :  { %2482 = vmatpush.xpose.msk.msra.mxu3 %vm773_vm15, %v1584_v52 }
 0xb6f   :  { %v1578_v21 = vpop.permute.xlu2 %1577 }
 0xb76   :  { %v1582_v32 = vpop.permute.xlu1 %1581 }
 0xb77   :  { %v1572_v55 = vpop.permute.xlu2 %1571  ;;  %2483 = vmatpush.xpose.msk.msra.mxu3 %vm773_vm15, %v1582_v32 }
 0xb7b   :  { %2484 = vmatpush.xpose.msk.msra.mxu3 %vm773_vm15, %v1580_v25  ;;  %v2776_v25 = vld [vmem:[#allocation3 + $0x50] sm:$0xff] }
 0xb7e   :  { %v1576_v37 = vpop.permute.xlu1 %1575 }
 0xb7f   :  { %v1566_v39 = vpop.permute.xlu2 %1565  ;;  %2485 = vmatpush.xpose.msk.msra.mxu3 %vm773_vm15, %v1578_v21  ;;  %v2617_v21 = vpack.i.bf16 %v3925_v33, %v3969_v51 }
 0xb83   :  { %2486 = vmatpush.xpose.msk.msra.mxu3 %vm773_vm15, %v1576_v37 }
 0xb86   :  { %v1570_v57 = vpop.permute.xlu1 %1569 }
 0xb87   :  { %v2599_v35 = vpop.permute.xlu2 %2598 }
 0xb88   :  { %v2600_v49 = vunpack.i.l.bf16 %v2599_v35  ;;  %v2601_v36 = vunpack.i.h.bf16 %v2599_v35  ;;  %v2622_v35 = vpack.i.bf16 %v3917_v19, %v3921_v4 }
 0xb8a   :  { %1906 = vmatpush.msra.mxu1 %v2600_v49 }
 0xb8c   :  { %1907 = vmatpush.msra.mxu1 %v2601_v36 }
 0xb8e   :  { %v1564_v54 = vpop.permute.xlu1 %1563 }
 0xb8f   :  { %v1574_v40 = vpop.permute.xlu0 %1573 }
 0xb90   :  { %2487 = vmatpush.xpose.msk.msra.mxu3 %vm773_vm15, %v1574_v40 }
 0xb94   :  { %2488 = vmatpush.xpose.msk.msra.mxu3 %vm773_vm15, %v1572_v55 }
 0xb97   :  { %v1568_v58 = vpop.permute.xlu0 %1567 }
 0xb98   :  { %2489 = vmatpush.xpose.msk.msra.mxu3 %vm773_vm15, %v1570_v57 }
 0xb9c   :  { %2490 = vmatpush.xpose.msk.msra.mxu3 %vm773_vm15, %v1568_v58 }
 0xb9f   :  { %v1562_v48 = vpop.permute.xlu0 %1561 }
 0xba0   :  { %2491 = vmatpush.xpose.msk.msra.mxu3 %vm773_vm15, %v1566_v39 }
 0xba4   :  { %2492 = vmatpush.xpose.msk.msra.mxu3 %vm773_vm15, %v1564_v54 }
 0xba8   :  { %2493 = vmatpush.xpose.msk.msra.mxu3 %vm773_vm15, %v1562_v48 }
 0xbab   :  { %2494 = vmatmul.msk.f32.vlgmr.msra.gmra.mxu3 %vm773_vm15, %v3917_v19 }
 0xbb3   :  { %2495 = vmatmul.msk.f32.gmra.mxu3 %vm773_vm15, %v3921_v4 }
 0xbbb   :  { %2496 = vmatmul.msk.f32.gmra.mxu3 %vm773_vm15, %v3925_v33 }
 0xbc3   :  { %2497 = vmatmul.msk.f32.gmra.mxu3 %vm773_vm15, %v3969_v51 }
 0xbcb   :  { %2498 = vmatmul.msk.f32.gmra.mxu3 %vm773_vm15, %v3951_v44  ;;  %v2774_v44 = vld [vmem:[#allocation3 + $0x40] sm:$0xff] }
 0xbd3   :  { %2499 = vmatmul.msk.f32.gmra.mxu3 %vm773_vm15, %v3959_v46 }
 0xbdb   :  { %2500 = vmatmul.msk.f32.gmra.mxu3 %vm773_vm15, %v3961_v47 }
 0xbe3   :  { %2501 = vmatmul.msk.f32.gmra.mxu3 %vm773_vm15, %v3946_v41 }
 0xbeb   :  { %2502 = vmatmul.msk.f32.gmra.mxu3 %vm773_vm15, %v3953_v45 }
 0xbf3   :  { %2503 = vmatmul.msk.f32.gmra.mxu3 %vm773_vm15, %v3941_v38 }
 0xbfb   :  { %2504 = vmatmul.msk.f32.gmra.mxu3 %vm773_vm15, %v1558_v43 }
 0xc03   :  { %2505 = vmatmul.msk.f32.gmra.mxu3 %vm773_vm15, %v1560_v42 }
 0xc2e   :  { %v1650_v59 = vpop.f32.mrf.mxu3 }
 0xc2f   :  { %v4012_v60 = vadd.f32 %v2766_v13, %v1650_v59 }
 0xc31   :  { %v1686_v61 = vsel %vm662_vm6, %v4012_v60, -inf }
 0xc32   :  { %1687 = vmax.xlane.f32.xlu2 %v1686_v61 }
 0xc36   :  { %v1653_v26 = vpop.f32.mrf.mxu3 }
 0xc37   :  { %v4016_v0 = vadd.f32 %v2767_v62, %v1653_v26 }
 0xc39   :  { %v1689_v1 = vsel %vm662_vm6, %v4016_v0, -inf }
 0xc3a   :  { %1690 = vmax.xlane.f32.xlu1 %v1689_v1 }
 0xc3e   :  { %v1656_v3 = vpop.f32.mrf.mxu3 }
 0xc3f   :  { %v4020_v7 = vadd.f32 %v2768_v6, %v1656_v3 }
 0xc41   :  { %v1692_v8 = vsel %vm662_vm6, %v4020_v7, -inf }
 0xc42   :  { %1693 = vmax.xlane.f32.xlu0 %v1692_v8 }
 0xc46   :  { %v1659_v9 = vpop.f32.mrf.mxu3 }
 0xc47   :  { %v4024_v15 = vadd.f32 %v2769_v12, %v1659_v9 }
 0xc49   :  { %v1695_v16 = vsel %vm662_vm6, %v4024_v15, -inf }
 0xc4a   :  { %1696 = vmax.xlane.f32.xlu2 %v1695_v16 }
 0xc4e   :  { %v1662_v17 = vpop.f32.mrf.mxu3 }
 0xc4f   :  { %v4028_v11 = vadd.f32 %v2770_v14, %v1662_v17 }
 0xc51   :  { %v1698_v53 = vsel %vm662_vm6, %v4028_v11, -inf }
 0xc52   :  { %1699 = vmax.xlane.f32.xlu1 %v1698_v53  ;;  %v2777_v53 = vld [vmem:[#allocation3 + $0x58] sm:$0xff] }
 0xc56   :  { %2608 = vrot.lane.b32.xlu0 %v2607_v56, %s2811_s0  ;;  %v1665_v2 = vpop.f32.mrf.mxu3 }
 0xc57   :  { %v4041_v24 = vadd.f32 %v2771_v23, %v1665_v2 }
 0xc59   :  { %v1701_v34 = vsel %vm662_vm6, %v4041_v24, -inf }
 0xc5e   :  { %v1668_v31 = vpop.f32.mrf.mxu3 }
 0xc5f   :  { %v4045_v28 = vadd.f32 %v2772_v30, %v1668_v31 }
 0xc61   :  { %v1704_v38 = vsel %vm662_vm6, %v4045_v28, -inf }
 0xc62   :  { %2613 = vrot.lane.b32.xlu2 %v2612_v50, %s2811_s0 }
 0xc66   :  { %v1671_v22 = vpop.f32.mrf.mxu3 }
 0xc67   :  { %v4047_v43 = vadd.f32 %v2773_v20, %v1671_v22 }
 0xc69   :  { %v1707_v42 = vsel %vm662_vm6, %v4047_v43, -inf }
 0xc6b   :  { %2603 = vrot.lane.b32.xlu1 %v2602_v63, %s2811_s0 }
 0xc6e   :  { %v1674_v41 = vpop.f32.mrf.mxu3 }
 0xc6f   :  { %v4053_v45 = vadd.f32 %v2774_v44, %v1674_v41 }
 0xc71   :  { %v1710_v47 = vsel %vm662_vm6, %v4053_v45, -inf }
 0xc76   :  { %v1677_v46 = vpop.f32.mrf.mxu3 }
 0xc77   :  { %v4057_v52 = vadd.f32 %v2775_v5, %v1677_v46 }
 0xc79   :  { %v1713_v32 = vsel %vm662_vm6, %v4057_v52, -inf }
 0xc7e   :  { %v1680_v55 = vpop.f32.mrf.mxu3 }
 0xc7f   :  { %v4064_v39 = vadd.f32 %v2776_v25, %v1680_v55 }
 0xc80   :  { %1702 = vmax.xlane.f32.xlu0 %v1701_v34 }
 0xc81   :  { %v1716_v37 = vsel %vm662_vm6, %v4064_v39, -inf }
 0xc86   :  { %v1683_v14 = vpop.f32.mrf.mxu3 }
 0xc87   :  { %v4092_v56 = vadd.f32 %v2777_v53, %v1683_v14  ;;  %v2287_v53 = vld [vmem:[#allocation2 + $0x70] sm:$0xff] }
 0xc88   :  { %1705 = vmax.xlane.f32.xlu0 %v1704_v38 }
 0xc89   :  { %v1719_v63 = vsel %vm662_vm6, %v4092_v56, -inf }
 0xc8b   :  { %1708 = vmax.xlane.f32.xlu2 %v1707_v42 }
 0xc93   :  { %1711 = vmax.xlane.f32.xlu2 %v1710_v47 }
 0xc9b   :  { %1714 = vmax.xlane.f32.xlu2 %v1713_v32 }
 0xc9c   :  { %2618 = vrot.lane.b32.xlu0 %v2617_v21, %s2811_s0 }
 0xca3   :  { %1717 = vmax.xlane.f32.xlu2 %v1716_v37 }
 0xca4   :  { %2623 = vrot.lane.b32.xlu0 %v2622_v35, %s2811_s0 }
 0xca5   :  { %v1688_v33 = vpop.xlane.xlu2 %1687 }
 0xca6   :  { %v1722_v51 = vsub.f32 %v4012_v60, %v1688_v33 }
 0xca8   :  { %v1734_v49 = vmul.f32 0.35355338, %v1722_v51 }
 0xcaa   :  { %v1746_v36 = vmul.f32 1.442695, %v1734_v49 }
 0xcac   :  { %2710 = vpow2.f32 %v1746_v36 }
 0xcad   :  { %v1691_v58 = vpop.xlane.xlu1 %1690 }
 0xcae   :  { %v1723_v19 = vsub.f32 %v4016_v0, %v1691_v58 }
 0xcb0   :  { %v1735_v13 = vmul.f32 0.35355338, %v1723_v19 }
 0xcb2   :  { %v4072_v40 = vpop.eup %2710  ;;  %v1748_v26 = vmul.f32 1.442695, %v1735_v13 }
 0xcb3   :  { %v1770_v57 = vsel %vm662_vm6, %v4072_v40, 0.0 }
 0xcb4   :  { %1771 = vadd.xlane.f32.xlu1 %v1770_v57 }
 0xcb5   :  { %v1694_v54 = vpop.xlane.xlu0 %1693 }
 0xcb6   :  { %v1724_v48 = vsub.f32 %v4020_v7, %v1694_v54 }
 0xcb8   :  { %v1736_v4 = vmul.f32 0.35355338, %v1724_v48 }
 0xcba   :  { %v1750_v59 = vmul.f32 1.442695, %v1736_v4 }
 0xcbc   :  { %2712 = vpow2.f32 %v1750_v59 }
 0xcbd   :  { %v1697_v60 = vpop.xlane.xlu2 %1696  ;;  %2714 = vpow2.f32 %v1748_v26 }
 0xcbe   :  { %v1725_v61 = vsub.f32 %v4024_v15, %v1697_v60 }
 0xcc0   :  { %v1737_v62 = vmul.f32 0.35355338, %v1725_v61 }
 0xcc2   :  { %v4079_v1 = vpop.eup %2712  ;;  %v1752_v3 = vmul.f32 1.442695, %v1737_v62 }
 0xcc3   :  { %v1776_v6 = vsel %vm662_vm6, %v4079_v1, 0.0  ;;  %v4084_v9 = vpop.eup %2714 }
 0xcc4   :  { %2716 = vpow2.f32 %v1752_v3  ;;  %1777 = vadd.xlane.f32.xlu1 %v1776_v6  ;;  %v1773_v17 = vsel %vm662_vm6, %v4084_v9, 0.0 }
 0xcc5   :  { %v1700_v7 = vpop.xlane.xlu1 %1699  ;;  %v2614_v30 = vpop.permute.xlu2 %2613 }
 0xcc6   :  { %v1726_v0 = vsub.f32 %v4028_v11, %v1700_v7  ;;  %v2615_v41 = vunpack.i.l.bf16 %v2614_v30  ;;  %v2616_v38 = vunpack.i.h.bf16 %v2614_v30  ;;  %v2283_v30 = vld [vmem:[#allocation2 + $0x50] sm:$0xff] }
 0xcc8   :  { %v1738_v8 = vmul.f32 0.35355338, %v1726_v0  ;;  %v2609_v23 = vpop.permute.xlu0 %2608 }
 0xcc9   :  { %v2610_v34 = vunpack.i.l.bf16 %v2609_v23  ;;  %v2611_v20 = vunpack.i.h.bf16 %v2609_v23  ;;  %v2284_v23 = vld [vmem:[#allocation2 + $0x58] sm:$0xff] }
 0xcca   :  { %v4086_v12 = vpop.eup %2716  ;;  %v1754_v15 = vmul.f32 1.442695, %v1738_v8 }
 0xccb   :  { %v1779_v16 = vsel %vm662_vm6, %v4086_v12, 0.0 }
 0xccc   :  { %2718 = vpow2.f32 %v1754_v15  ;;  %1780 = vadd.xlane.f32.xlu1 %v1779_v16 }
 0xcce   :  { %1774 = vadd.xlane.f32.xlu0 %v1773_v17  ;;  %v2288_v17 = vld [vmem:[#allocation2 + $0x78] sm:$0xff] }
 0xcd2   :  { %v4094_v11 = vpop.eup %2718 }
 0xcd3   :  { %v1782_v50 = vsel %vm662_vm6, %v4094_v11, 0.0 }
 0xcd4   :  { %1783 = vadd.xlane.f32.xlu1 %v1782_v50 }
 0xcd6   :  { %1720 = vmax.xlane.f32.xlu0 %v1719_v63 }
 0xcdd   :  { %v2604_v2 = vpop.permute.xlu1 %2603 }
 0xcde   :  { %v2605_v31 = vunpack.i.l.bf16 %v2604_v2  ;;  %v2606_v22 = vunpack.i.h.bf16 %v2604_v2 }
 0xce0   :  { %1908 = vmatpush.msra.mxu1 %v2605_v31  ;;  %v2285_v31 = vld [vmem:[#allocation2 + $0x60] sm:$0xff] }
 0xce2   :  { %1909 = vmatpush.msra.mxu1 %v2606_v22 }
 0xce4   :  { %1910 = vmatpush.msra.mxu1 %v2610_v34 }
 0xce6   :  { %1911 = vmatpush.msra.mxu1 %v2611_v20  ;;  %v2282_v20 = vld [vmem:[#allocation2 + $0x48] sm:$0xff] }
 0xce8   :  { %1912 = vmatpush.msra.mxu1 %v2615_v41  ;;  %v2281_v41 = vld [vmem:[#allocation2 + $0x40] sm:$0xff] }
 0xcea   :  { %1913 = vmatpush.msra.mxu1 %v2616_v38  ;;  %v2280_v38 = vld [vmem:[#allocation2 + $0x38] sm:$0xff] }
 0xcf3   :  { %v1703_v42 = vpop.xlane.xlu0 %1702 }
 0xcf4   :  { %v1727_v44 = vsub.f32 %v4041_v24, %v1703_v42  ;;  %v2279_v42 = vld [vmem:[#allocation2 + $0x30] sm:$0xff] }
 0xcf6   :  { %v1739_v46 = vmul.f32 0.35355338, %v1727_v44 }
 0xcf8   :  { %v1756_v47 = vmul.f32 1.442695, %v1739_v46 }
 0xcfa   :  { %2720 = vpow2.f32 %v1756_v47  ;;  %v2277_v47 = vld [vmem:[#allocation2 + $0x20] sm:$0xff] }
 0xcfb   :  { %v1706_v5 = vpop.xlane.xlu0 %1705 }
 0xcfc   :  { %v1728_v21 = vsub.f32 %v4045_v28, %v1706_v5 }
 0xcfe   :  { %v1740_v32 = vmul.f32 0.35355338, %v1728_v21  ;;  %v1709_v55 = vpop.xlane.xlu2 %1708 }
 0xcff   :  { %v1729_v25 = vsub.f32 %v4047_v43, %v1709_v55 }
 0xd00   :  { %v4103_v37 = vpop.eup %2720  ;;  %v1758_v35 = vmul.f32 1.442695, %v1740_v32 }
 0xd01   :  { %v1741_v33 = vmul.f32 0.35355338, %v1729_v25  ;;  %v1785_v51 = vsel %vm662_vm6, %v4103_v37, 0.0 }
 0xd02   :  { %2722 = vpow2.f32 %v1758_v35  ;;  %1786 = vadd.xlane.f32.xlu2 %v1785_v51  ;;  %v2276_v35 = vld [vmem:[#allocation2 + $0x18] sm:$0xff] }
 0xd03   :  { %v1760_v24 = vmul.f32 1.442695, %v1741_v33 }
 0xd05   :  { %2724 = vpow2.f32 %v1760_v24 }
 0xd06   :  { %v1712_v49 = vpop.xlane.xlu2 %1711 }
 0xd07   :  { %v1730_v36 = vsub.f32 %v4053_v45, %v1712_v49  ;;  %v2275_v49 = vld [vmem:[#allocation2 + $0x10] sm:$0xff] }
 0xd08   :  { %v4108_v57 = vpop.eup %2722 }
 0xd09   :  { %v1742_v28 = vmul.f32 0.35355338, %v1730_v36  ;;  %v1788_v43 = vsel %vm662_vm6, %v4108_v57, 0.0 }
 0xd0a   :  { %1789 = vadd.xlane.f32.xlu1 %v1788_v43 }
 0xd0b   :  { %v4112_v58 = vpop.eup %2724  ;;  %v1762_v54 = vmul.f32 1.442695, %v1742_v28 }
 0xd0c   :  { %v1791_v48 = vsel %vm662_vm6, %v4112_v58, 0.0 }
 0xd0d   :  { %2726 = vpow2.f32 %v1762_v54  ;;  %1792 = vadd.xlane.f32.xlu0 %v1791_v48  ;;  %v2273_v48 = vld [vmem:[#allocation2] sm:$0xff] }
 0xd0e   :  { %v2619_v19 = vpop.permute.xlu0 %2618  ;;  %v1715_v4 = vpop.xlane.xlu2 %1714 }
 0xd0f   :  { %v2620_v59 = vunpack.i.l.bf16 %v2619_v19  ;;  %v1731_v45 = vsub.f32 %v4057_v52, %v1715_v4  ;;  %v2621_v13 = vunpack.i.h.bf16 %v2619_v19 }
 0xd11   :  { %v1743_v60 = vmul.f32 0.35355338, %v1731_v45  ;;  %1914 = vmatpush.msra.mxu1 %v2620_v59 }
 0xd13   :  { %v4117_v61 = vpop.eup %2726  ;;  %v1764_v26 = vmul.f32 1.442695, %v1743_v60  ;;  %1915 = vmatpush.msra.mxu1 %v2621_v13 }
 0xd14   :  { %v1794_v62 = vsel %vm662_vm6, %v4117_v61, 0.0 }
 0xd15   :  { %2728 = vpow2.f32 %v1764_v26  ;;  %1795 = vadd.xlane.f32.xlu2 %v1794_v62 }
 0xd16   :  { %v2624_v3 = vpop.permute.xlu0 %2623  ;;  %v1718_v6 = vpop.xlane.xlu2 %1717 }
 0xd17   :  { %v2625_v7 = vunpack.i.l.bf16 %v2624_v3  ;;  %v1732_v0 = vsub.f32 %v4064_v39, %v1718_v6  ;;  %v2626_v8 = vunpack.i.h.bf16 %v2624_v3  ;;  %v2286_v39 = vld [vmem:[#allocation2 + $0x68] sm:$0xff] }
 0xd19   :  { %v1744_v15 = vmul.f32 0.35355338, %v1732_v0  ;;  %1916 = vmatpush.msra.mxu1 %v2625_v7 }
 0xd1b   :  { %v4122_v52 = vpop.eup %2728  ;;  %v1766_v16 = vmul.f32 1.442695, %v1744_v15  ;;  %1917 = vmatpush.msra.mxu1 %v2626_v8 }
 0xd1c   :  { %v1797_v14 = vsel %vm662_vm6, %v4122_v52, 0.0 }
 0xd1d   :  { %2528 = vmatpush.xpose.msk.msrb.mxu1 %vm4487_vm12, %v2288_v17  ;;  %2730 = vpow2.f32 %v1766_v16  ;;  %1798 = vadd.xlane.f32.xlu1 %v1797_v14  ;;  %vm4499_vm12 = vmmov %vm4489_vm0 }
 0xd21   :  { %2529 = vmatpush.xpose.msk.msrb.mxu1 %vm4488_vm13, %v2287_v53  ;;  %vm4500_vm13 = vmmov %vm4489_vm0 }
 0xd23   :  { %v4128_v50 = vpop.eup %2730 }
 0xd24   :  { %v1800_v63 = vsel %vm662_vm6, %v4128_v50, 0.0 }
 0xd25   :  { %2530 = vmatpush.xpose.msk.msrb.mxu1 %vm4489_vm0, %v2286_v39  ;;  %1801 = vadd.xlane.f32.xlu0 %v1800_v63 }
 0xd27   :  { %v1772_v2 = vpop.xlane.xlu1 %1771 }
 0xd28   :  { %2732 = vrcp.f32 %v1772_v2 }
 0xd29   :  { %2531 = vmatpush.xpose.msk.msrb.mxu1 %vm4490_vm2, %v2285_v31  ;;  %vm4501_vm2 = vmmov %vm4489_vm0 }
 0xd2d   :  { %2532 = vmatpush.xpose.msk.msrb.mxu1 %vm4491_vm14, %v2284_v23  ;;  %vm4503_vm14 = vmmov %vm4489_vm0 }
 0xd2e   :  { %v2733_v22 = vpop.eup %2732 }
 0xd2f   :  { %v1818_v34 = vmul.f32 %v2733_v22, %v4072_v40  ;;  %v2278_v40 = vld [vmem:[#allocation2 + $0x28] sm:$0xff] }
 0xd31   :  { %2533 = vmatpush.xpose.msk.msrb.mxu1 %vm4492_vm7, %v2283_v30  ;;  %vm4504_vm7 = vmmov %vm4489_vm0 }
 0xd32   :  { %2506 = vmatmul.msk.f32.vlgmr.msra.gmra.mxu1 %vm662_vm6, %v1818_v34 }
 0xd35   :  { %2534 = vmatpush.xpose.msk.msrb.mxu1 %vm4493_vm9, %v2282_v20  ;;  %v2003_v20 = vld [vmem:[%s4320_s2 + $0x1b8] sm:$0xff]  ;;  %vm4505_vm9 = vmmov %vm4489_vm0 }
 0xd36   :  { %2027 = vmatpush.msra.mxu2 %v2003_v20 }
 0xd37   :  { %v1778_v44 = vpop.xlane.xlu1 %1777 }
 0xd39   :  { %2535 = vmatpush.xpose.msk.msrb.mxu1 %vm4494_vm5, %v2281_v41  ;;  %v2002_v41 = vld [vmem:[%s4320_s2 + $0x1b0] sm:$0xff]  ;;  %vm4509_vm5 = vmmov %vm4489_vm0 }
 0xd3a   :  { %2028 = vmatpush.msra.mxu2 %v2002_v41 }
 0xd3d   :  { %2536 = vmatpush.xpose.msk.msrb.mxu1 %vm4495_vm8, %v2280_v38  ;;  %v2001_v38 = vld [vmem:[%s4320_s2 + $0x1a8] sm:$0xff]  ;;  %vm4510_vm8 = vmmov %vm4489_vm0 }
 0xd3e   :  { %2029 = vmatpush.msra.mxu2 %v2001_v38 }
 0xd3f   :  { %v1781_v25 = vpop.xlane.xlu1 %1780 }
 0xd41   :  { %2537 = vmatpush.xpose.msk.msrb.mxu1 %vm4496_vm3, %v2279_v42  ;;  %v1775_v46 = vpop.xlane.xlu0 %1774 }
 0xd42   :  { %2734 = vrcp.f32 %v1775_v46 }
 0xd43   :  { %2736 = vrcp.f32 %v1778_v44  ;;  %v2000_v44 = vld [vmem:[%s4320_s2 + $0x1a0] sm:$0xff] }
 0xd44   :  { %2738 = vrcp.f32 %v1781_v25  ;;  %2030 = vmatpush.msra.mxu2 %v2000_v44 }
 0xd45   :  { %2538 = vmatpush.xpose.msk.msrb.mxu1 %vm4497_vm10, %v2278_v40 }
 0xd47   :  { %v1784_v28 = vpop.xlane.xlu1 %1783 }
 0xd48   :  { %v2735_v5 = vpop.eup %2734 }
 0xd49   :  { %2539 = vmatpush.xpose.msk.msrb.mxu1 %vm4498_vm11, %v2277_v47  ;;  %v1721_v21 = vpop.xlane.xlu0 %1720  ;;  %v1819_v32 = vmul.f32 %v2735_v5, %v4084_v9  ;;  %v2737_v51 = vpop.eup %2736  ;;  %v2274_v9 = vld [vmem:[#allocation2 + $0x8] sm:$0xff] }
 0xd4a   :  { %v1733_v55 = vsub.f32 %v4092_v56, %v1721_v21  ;;  %v1820_v36 = vmul.f32 %v2737_v51, %v4079_v1  ;;  %v2739_v56 = vpop.eup %2738 }
 0xd4b   :  { %2507 = vmatmul.msk.f32.gmra.mxu1 %vm662_vm6, %v1819_v32  ;;  %v1821_v19 = vmul.f32 %v2739_v56, %v4086_v12 }
 0xd4c   :  { %v1745_v33 = vmul.f32 0.35355338, %v1733_v55 }
 0xd4d   :  { %2540 = vmatpush.xpose.msk.msrb.mxu1 %vm4499_vm12, %v2276_v35 }
 0xd4e   :  { %v1768_v24 = vmul.f32 1.442695, %v1745_v33 }
 0xd50   :  { %2740 = vpow2.f32 %v1768_v24 }
 0xd51   :  { %2541 = vmatpush.xpose.msk.msrb.mxu1 %vm4500_vm13, %v2275_v49  ;;  %2742 = vrcp.f32 %v1784_v28 }
 0xd53   :  { %2508 = vmatmul.msk.f32.gmra.mxu1 %vm662_vm6, %v1820_v36 }
 0xd55   :  { %2542 = vmatpush.xpose.msk.msrb.mxu1 %vm4489_vm0, %v2274_v9 }
 0xd56   :  { %v2741_v43 = vpop.eup %2740 }
 0xd57   :  { %v1803_v54 = vsel %vm662_vm6, %v2741_v43, 0.0  ;;  %v2743_v1 = vpop.eup %2742 }
 0xd58   :  { %1804 = vadd.xlane.f32.xlu2 %v1803_v54  ;;  %v1822_v4 = vmul.f32 %v2743_v1, %v4094_v11  ;;  %v2640_v54 = vld [vmem:[%s4319_s1 + $0xe] ss:$0 sm:$0xff] }
 0xd59   :  { %2543 = vmatpush.xpose.msk.msrb.mxu1 %vm4501_vm2, %v2273_v48 }
 0xd5b   :  { %2509 = vmatmul.msk.f32.gmra.mxu1 %vm662_vm6, %v1821_v19 }
 0xd63   :  { %2510 = vmatmul.msk.f32.gmra.mxu1 %vm662_vm6, %v1822_v4 }
 0xd75   :  { %v1787_v59 = vpop.xlane.xlu2 %1786 }
 0xd76   :  { %2744 = vrcp.f32 %v1787_v59 }
 0xd7c   :  { %v2745_v45 = vpop.eup %2744 }
 0xd7d   :  { %v1790_v13 = vpop.xlane.xlu1 %1789  ;;  %v1823_v60 = vmul.f32 %v2745_v45, %v4103_v37 }
 0xd7e   :  { %2746 = vrcp.f32 %v1790_v13 }
 0xd7f   :  { %2511 = vmatmul.msk.f32.gmra.mxu1 %vm662_vm6, %v1823_v60 }
 0xd80   :  { %v1793_v26 = vpop.xlane.xlu0 %1792 }
 0xd81   :  { %2748 = vrcp.f32 %v1793_v26 }
 0xd84   :  { %v2747_v62 = vpop.eup %2746 }
 0xd85   :  { %v1824_v12 = vmul.f32 %v2747_v62, %v4108_v57 }
 0xd87   :  { %2512 = vmatmul.msk.f32.gmra.mxu1 %vm662_vm6, %v1824_v12  ;;  %v2749_v11 = vpop.eup %2748 }
 0xd88   :  { %v1796_v3 = vpop.xlane.xlu2 %1795  ;;  %v1825_v6 = vmul.f32 %v2749_v11, %v4112_v58 }
 0xd89   :  { %2750 = vrcp.f32 %v1796_v3 }
 0xd8f   :  { %2513 = vmatmul.msk.f32.gmra.mxu1 %vm662_vm6, %v1825_v6  ;;  %v2751_v0 = vpop.eup %2750 }
 0xd90   :  { %v1799_v7 = vpop.xlane.xlu1 %1798  ;;  %v1826_v37 = vmul.f32 %v2751_v0, %v4117_v61 }
 0xd91   :  { %2752 = vrcp.f32 %v1799_v7 }
 0xd97   :  { %2514 = vmatmul.msk.f32.gmra.mxu1 %vm662_vm6, %v1826_v37  ;;  %v2753_v15 = vpop.eup %2752 }
 0xd98   :  { %v1802_v8 = vpop.xlane.xlu0 %1801  ;;  %v1827_v57 = vmul.f32 %v2753_v15, %v4122_v52 }
 0xd99   :  { %2754 = vrcp.f32 %v1802_v8 }
 0xd9f   :  { %2515 = vmatmul.msk.f32.gmra.mxu1 %vm662_vm6, %v1827_v57  ;;  %v2755_v16 = vpop.eup %2754 }
 0xda0   :  { %v1828_v17 = vmul.f32 %v2755_v16, %v4128_v50 }
 0xda7   :  { %2516 = vmatmul.msk.f32.gmra.mxu1 %vm662_vm6, %v1828_v17  ;;  %v2128_v17 = vld [vmem:[%s4321_s3 + $0x50] sm:$0xff] }
 0xdaf   :  { %v1919_v58 = vpop.f32.mrf.mxu1 }
 0xdc8   :  { %v1922_v14 = vpop.f32.mrf.mxu1 }
 0xdcb   :  { %v1805_v53 = vpop.xlane.xlu2 %1804 }
 0xdcc   :  { %2756 = vrcp.f32 %v1805_v53 }
 0xdd0   :  { %v1925_v39 = vpop.f32.mrf.mxu1 }
 0xdd2   :  { %v2757_v61 = vpop.eup %2756 }
 0xdd3   :  { %v1829_v63 = vmul.f32 %v2757_v61, %v2741_v43 }
 0xdd5   :  { %2517 = vmatmul.msk.f32.gmra.mxu1 %vm662_vm6, %v1829_v63  ;;  %vm4502_vm6 = vmmov %vm4489_vm0 }
 0xdd8   :  { %v1928_v2 = vpop.f32.mrf.mxu1 }
 0xdd9   :  { %1958 = vrot.lane.b32.xlu1 %v1928_v2, %s2812_s7 }
 0xde0   :  { %v1931_v52 = vpop.f32.mrf.mxu1 }
 0xdfc   :  { %v1934_v31 = vpop.f32.mrf.mxu1 }
 0xe04   :  { %v1937_v23 = vpop.f32.mrf.mxu1 }
 0xe05   :  { %1970 = vrot.lane.b32.xlu0 %v1937_v23, %s2813_s8 }
 0xe0c   :  { %v1940_v50 = vpop.f32.mrf.mxu1 }
 0xe0d   :  { %1960 = vrot.lane.b32.xlu0 %v1931_v52, %s2812_s7  ;;  %1972 = vrot.lane.b32.xlu1 %v1940_v50, %s2813_s8 }
 0xe14   :  { %v1943_v22 = vpop.f32.mrf.mxu1 }
 0xe15   :  { %1962 = vrot.lane.b32.xlu0 %v1934_v31, %s2812_s7  ;;  %1974 = vrot.lane.b32.xlu1 %v1943_v22, %s2813_s8 }
 0xe1c   :  { %v1946_v34 = vpop.f32.mrf.mxu1 }
 0xe1d   :  { %1982 = vrot.lane.b32.xlu2 %v1946_v34, %s2814_s9 }
 0xe24   :  { %v1949_v30 = vpop.f32.mrf.mxu1 }
 0xe25   :  { %1984 = vrot.lane.b32.xlu2 %v1949_v30, %s2814_s9 }
 0xe4b   :  { %v1959_v46 = vpop.permute.xlu1 %1958 }
 0xe4c   :  { %v1991_v40 = vsel %vm773_vm15, %v1919_v58, %v1959_v46  ;;  %v2641_v46 = vld [vmem:[%s4319_s1 + $0x11] ss:$0 sm:$0xff] }
 0xe52   :  { %v1952_v42 = vpop.f32.mrf.mxu1 }
 0xe53   :  { %1986 = vrot.lane.b32.xlu2 %v1952_v42, %s2814_s9 }
 0xe77   :  { %v1971_v47 = vpop.permute.xlu0 %1970  ;;  %v1983_v5 = vpop.permute.xlu2 %1982 }
 0xe78   :  { %v1994_v21 = vsel %vm1183_vm4, %v1991_v40, %v1971_v47 }
 0xe79   :  { %v1997_v32 = vsel %vm1187_vm1, %v1994_v21, %v1983_v5  ;;  %v2642_v5 = vld [vmem:[%s4319_s1 + $0x12] ss:$0 sm:$0xff] }
 0xe7a   :  { %2518 = vmatmul.msk.f32.vlgmr.msra.gmra.mxu2 %vm4502_vm6, %v1997_v32  ;;  %vm4511_vm6 = vmmov %vm4489_vm0 }
 0xe7f   :  { %v1961_v55 = vpop.permute.xlu0 %1960  ;;  %v1973_v25 = vpop.permute.xlu1 %1972 }
 0xe80   :  { %v1992_v35 = vsel %vm773_vm15, %v1922_v14, %v1961_v55  ;;  %v1985_v51 = vpop.permute.xlu2 %1984  ;;  %v2127_v14 = vld [vmem:[%s4321_s3 + $0x48] sm:$0xff] }
 0xe81   :  { %v1995_v33 = vsel %vm1183_vm4, %v1992_v35, %v1973_v25 }
 0xe82   :  { %v1998_v24 = vsel %vm1187_vm1, %v1995_v33, %v1985_v51 }
 0xe83   :  { %2519 = vmatmul.msk.f32.gmra.mxu2 %vm4503_vm14, %v1998_v24 }
 0xe87   :  { %v1963_v49 = vpop.permute.xlu0 %1962  ;;  %v1975_v9 = vpop.permute.xlu1 %1974 }
 0xe88   :  { %v1993_v36 = vsel %vm773_vm15, %v1925_v39, %v1963_v49  ;;  %vm4506_vm15 = vmmov %vm4489_vm0  ;;  %v2126_v39 = vld [vmem:[%s4321_s3 + $0x40] sm:$0xff] }
 0xe89   :  { %v1996_v56 = vsel %vm1183_vm4, %v1993_v36, %v1975_v9  ;;  %vm4507_vm4 = vmmov %vm4489_vm0 }
 0xead   :  { %v1987_v28 = vpop.permute.xlu2 %1986 }
 0xeae   :  { %v1999_v43 = vsel %vm1187_vm1, %v1996_v56, %v1987_v28  ;;  %vm4508_vm1 = vmmov %vm4489_vm0 }
 0xeaf   :  { %2520 = vmatmul.msk.f32.gmra.mxu2 %vm4504_vm7, %v1999_v43 }
 0xefd   :  { %v2032_v48 = vpop.f32.mrf.mxu2 }
 0xefe   :  { %v2033_v19 = vadd.f32 %v2640_v54, %v2032_v48  ;;  %v2176_v48 = vld [vmem:[%s4320_s2 + $0x170] sm:$0xff] }
 0xf00   :  { %v2041_v1 = vadd.f32 %v2033_v19, %v3900_v10 }
 0xf02   :  { %v2046_v4 = vsel %vm4505_vm9, %v2041_v1, 0.0  ;;  %v2058_v59 = vmul.f32 %v2041_v1, %v2041_v1 }
 0xf03   :  { %2047 = vadd.xlane.f32.xlu0 %v2046_v4 }
 0xf04   :  { %v2061_v45 = vsel %vm4506_vm15, %v2058_v59, 0.0  ;;  %v2175_v59 = vld [vmem:[%s4320_s2 + $0x168] sm:$0xff]  ;;  %vm4512_vm15 = vmmov %vm4489_vm0 }
 0xf05   :  { %2062 = vadd.xlane.f32.xlu1 %v2061_v45 }
 0xf06   :  { %v2035_v13 = vpop.f32.mrf.mxu2 }
 0xf07   :  { %v2036_v60 = vadd.f32 %v2640_v54, %v2035_v13  ;;  %v2174_v13 = vld [vmem:[%s4320_s2 + $0x160] sm:$0xff] }
 0xf09   :  { %v4211_v26 = vadd.f32 %v2036_v60, %v3905_v18 }
 0xf0b   :  { %v2049_v62 = vsel %vm4507_vm4, %v4211_v26, 0.0  ;;  %v2059_v12 = vmul.f32 %v4211_v26, %v4211_v26  ;;  %vm4513_vm4 = vcmask 523264  }
 0xf0c   :  { %2050 = vadd.xlane.f32.xlu2 %v2049_v62 }
 0xf0d   :  { %v2064_v10 = vsel %vm4508_vm1, %v2059_v12, 0.0  ;;  %vm4514_vm1 = vmmov %vm4513_vm4 }
 0xf0e   :  { %2065 = vadd.xlane.f32.xlu0 %v2064_v10 }
 0xf32   :  { %v2038_v3 = vpop.f32.mrf.mxu2 }
 0xf33   :  { %v2039_v11 = vadd.f32 %v2640_v54, %v2038_v3  ;;  %v2177_v54 = vld [vmem:[%s4320_s2 + $0x178] sm:$0xff] }
 0xf34   :  { %2197 = vmatpush.msrb.mxu2 %v2177_v54 }
 0xf35   :  { %v4219_v6 = vadd.f32 %v2039_v11, %v3910_v29  ;;  %v2129_v29 = vld [vmem:[%s4321_s3 + $0x58] sm:$0xff] }
 0xf36   :  { %2153 = vmatpush.msra.mxu0 %v2129_v29  ;;  %2198 = vmatpush.msrb.mxu2 %v2176_v48  ;;  %v2643_v29 = vld [vmem:[%s4319_s1 + $0xf] ss:$0 sm:$0xff] }
 0xf37   :  { %v2052_v7 = vsel %vm4509_vm5, %v4219_v6, 0.0  ;;  %v2060_v18 = vmul.f32 %v4219_v6, %v4219_v6  ;;  %vm4515_vm5 = vmmov %vm4514_vm1 }
 0xf38   :  { %2053 = vadd.xlane.f32.xlu1 %v2052_v7  ;;  %2154 = vmatpush.msra.mxu0 %v2128_v17 }
 0xf39   :  { %v2067_v0 = vsel %vm4510_vm8, %v2060_v18, 0.0  ;;  %2199 = vmatpush.msrb.mxu2 %v2175_v59  ;;  %vm4516_vm8 = vmmov %vm4489_vm0 }
 0xf3a   :  { %2068 = vadd.xlane.f32.xlu2 %v2067_v0  ;;  %2155 = vmatpush.msra.mxu0 %v2127_v14 }
 0xf3b   :  { %2200 = vmatpush.msrb.mxu2 %v2174_v13 }
 0xf3c   :  { %2156 = vmatpush.msra.mxu0 %v2126_v39 }
 0xf76   :  { %v2048_v37 = vpop.xlane.xlu0 %2047 }
 0xf77   :  { %v2055_v8 = vmul.f32 %v2048_v37, %v3795_v27 }
 0xf78   :  { %v2063_v15 = vpop.xlane.xlu1 %2062 }
 0xf79   :  { %v2073_v57 = vmul.f32 %v2055_v8, %v2055_v8  ;;  %v2070_v16 = vmul.f32 %v2063_v15, %v3795_v27  ;;  %v2079_v44 = vsub.f32 %v2041_v1, %v2055_v8 }
 0xf7b   :  { %v2076_v58 = vsub.f32 %v2070_v16, %v2073_v57  ;;  %v2172_v57 = vld [vmem:[%s4320_s2 + $0x150] sm:$0xff]  ;;  %v2171_v16 = vld [vmem:[%s4320_s2 + $0x148] sm:$0xff] }
 0xf7d   :  { %v2082_v53 = vadd.f32 1e-05, %v2076_v58 }
 0xf7f   :  { %2758 = vrsqrt.f32 %v2082_v53  ;;  %v2051_v61 = vpop.xlane.xlu2 %2050  ;;  %vm2091_vm10 = vweird.f32 %v2082_v53 }
 0xf80   :  { %v2056_v63 = vmul.f32 %v2051_v61, %v3795_v27 }
 0xf81   :  { %v2066_v2 = vpop.xlane.xlu0 %2065 }
 0xf82   :  { %v2074_v52 = vmul.f32 %v2056_v63, %v2056_v63  ;;  %v2071_v31 = vmul.f32 %v2066_v2, %v3795_v27  ;;  %v2080_v24 = vsub.f32 %v4211_v26, %v2056_v63  ;;  %v2173_v26 = vld [vmem:[%s4320_s2 + $0x158] sm:$0xff] }
 0xf83   :  { %2201 = vmatpush.msrb.mxu2 %v2173_v26 }
 0xf84   :  { %v2077_v23 = vsub.f32 %v2071_v31, %v2074_v52 }
 0xf85   :  { %v2759_v50 = vpop.eup %2758  ;;  %2202 = vmatpush.msrb.mxu2 %v2172_v57 }
 0xf86   :  { %v2086_v22 = vmul.f32 %v2759_v50, %v2082_v53  ;;  %v2083_v34 = vadd.f32 1e-05, %v2077_v23  ;;  %vm2092_vm3 = vweird.f32 %v2759_v50 }
 0xf87   :  { %vm2093_vm11 = vmor %vm2091_vm10, %vm2092_vm3  ;;  %2203 = vmatpush.msrb.mxu2 %v2171_v16 }
 0xf88   :  { %v2087_v30 = vmul.f32 %v2759_v50, %v2086_v22  ;;  %2760 = vrsqrt.f32 %v2083_v34  ;;  %vm2101_vm13 = vweird.f32 %v2083_v34  ;;  %vm4517_vm3 = vmmov %vm4489_vm0 }
 0xf8a   :  { %v2088_v20 = vmul.f32 0.5, %v2087_v30 }
 0xf8c   :  { %v2089_v41 = vsub.f32 1.5, %v2088_v20 }
 0xf8e   :  { %v2761_v38 = vpop.eup %2760  ;;  %v2090_v42 = vmul.f32 %v2759_v50, %v2089_v41 }
 0xf8f   :  { %v2096_v40 = vmul.f32 %v2761_v38, %v2083_v34  ;;  %vm2102_vm12 = vweird.f32 %v2761_v38 }
 0xf90   :  { %v2094_v47 = vsel %vm2093_vm11, %v2759_v50, %v2090_v42  ;;  %vm2103_vm2 = vmor %vm2101_vm13, %vm2102_vm12  ;;  %v2644_v50 = vld [vmem:[%s4319_s1 + $0x10] ss:$0 sm:$0xff]  ;;  %v2247_v42 = vld [vmem:[%s4320_s2 + $0xf8] sm:$0xff] }
 0xf91   :  { %v2115_v21 = vmul.f32 %v2094_v47, %v2079_v44  ;;  %v2097_v32 = vmul.f32 %v2761_v38, %v2096_v40  ;;  %v2246_v44 = vld [vmem:[%s4320_s2 + $0xf0] sm:$0xff]  ;;  %2265 = vmatpush.msrb.mxu0 %v2247_v42  ;;  %v2245_v47 = vld [vmem:[%s4320_s2 + $0xe8] sm:$0xff]  ;;  %vm4518_vm13 = vmmov %vm4489_vm0 }
 0xf93   :  { %v2119_v55 = vmul.f32 %v2641_v46, %v2115_v21  ;;  %v2098_v25 = vmul.f32 0.5, %v2097_v32  ;;  %2266 = vmatpush.msrb.mxu0 %v2246_v44 }
 0xf95   :  { %v2123_v35 = vadd.f32 %v2642_v5, %v2119_v55  ;;  %v2099_v33 = vsub.f32 1.5, %v2098_v25  ;;  %v2244_v55 = vld [vmem:[%s4320_s2 + $0xe0] sm:$0xff]  ;;  %2267 = vmatpush.msrb.mxu0 %v2245_v47 }
 0xf97   :  { %v2100_v51 = vmul.f32 %v2761_v38, %v2099_v33  ;;  %2521 = vmatmul.msk.f32.vlgmr.msra.gmra.mxu0 %vm4489_vm0, %v2123_v35 }
 0xf98   :  { %2268 = vmatpush.msrb.mxu0 %v2244_v55 }
 0xf99   :  { %v2104_v49 = vsel %vm2103_vm2, %v2761_v38, %v2100_v51 }
 0xf9a   :  { %v2116_v36 = vmul.f32 %v2104_v49, %v2080_v24 }
 0xf9c   :  { %v2120_v9 = vmul.f32 %v2641_v46, %v2116_v36 }
 0xf9e   :  { %v2124_v56 = vadd.f32 %v2642_v5, %v2120_v9 }
 0xfa0   :  { %2522 = vmatmul.msk.f32.gmra.mxu0 %vm4511_vm6, %v2124_v56 }
 0xfab   :  { %v2054_v28 = vpop.xlane.xlu1 %2053 }
 0xfac   :  { %v2057_v43 = vmul.f32 %v2054_v28, %v3795_v27 }
 0xfad   :  { %v2069_v19 = vpop.xlane.xlu2 %2068 }
 0xfae   :  { %v2075_v1 = vmul.f32 %v2057_v43, %v2057_v43  ;;  %v2072_v4 = vmul.f32 %v2069_v19, %v3795_v27  ;;  %v2081_v18 = vsub.f32 %v4219_v6, %v2057_v43  ;;  %v2170_v6 = vld [vmem:[%s4320_s2 + $0x140] sm:$0xff]  ;;  %v2646_v43 = vld [vmem:[%s4319_s1 + $0x14] ss:$0 sm:$0xff] }
 0xfaf   :  { %2204 = vmatpush.msrb.mxu2 %v2170_v6 }
 0xfb0   :  { %v2078_v45 = vsub.f32 %v2072_v4, %v2075_v1  ;;  %v2647_v1 = vld [vmem:[%s4319_s1 + $0x4] ss:$0 sm:$0xff] }
 0xfb2   :  { %v2084_v60 = vadd.f32 1e-05, %v2078_v45 }
 0xfb4   :  { %2762 = vrsqrt.f32 %v2084_v60  ;;  %vm2111_vm7 = vweird.f32 %v2084_v60 }
 0xfba   :  { %v2763_v62 = vpop.eup %2762 }
 0xfbb   :  { %v2106_v12 = vmul.f32 %v2763_v62, %v2084_v60  ;;  %vm2112_vm14 = vweird.f32 %v2763_v62 }
 0xfbc   :  { %vm2113_vm9 = vmor %vm2111_vm7, %vm2112_vm14 }
 0xfbd   :  { %v2107_v10 = vmul.f32 %v2763_v62, %v2106_v12 }
 0xfbf   :  { %v2108_v3 = vmul.f32 0.5, %v2107_v10 }
 0xfc1   :  { %v2109_v11 = vsub.f32 1.5, %v2108_v3 }
 0xfc3   :  { %v2110_v7 = vmul.f32 %v2763_v62, %v2109_v11 }
 0xfc5   :  { %v2114_v0 = vsel %vm2113_vm9, %v2763_v62, %v2110_v7 }
 0xfc6   :  { %v2117_v37 = vmul.f32 %v2114_v0, %v2081_v18 }
 0xfc8   :  { %v2121_v8 = vmul.f32 %v2641_v46, %v2117_v37 }
 0xfca   :  { %v2125_v15 = vadd.f32 %v2642_v5, %v2121_v8 }
 0xfcc   :  { %2523 = vmatmul.msk.f32.gmra.mxu0 %vm4512_vm15, %v2125_v15 }
0x1014   :  { %v2158_v17 = vpop.f32.mrf.mxu0 }
0x1015   :  { %v2159_v58 = vadd.f32 %v2643_v29, %v2158_v17 }
0x1017   :  { %v2167_v14 = vmax.f32 %v2159_v58, 0.0 }
0x1019   :  { %2524 = vmatmul.msk.f32.vlgmr.msrb.gmra.mxu2 %vm4513_vm4, %v2167_v14 }
0x101d   :  { %v2161_v53 = vpop.f32.mrf.mxu0 }
0x101e   :  { %v2162_v39 = vadd.f32 %v2643_v29, %v2161_v53 }
0x1020   :  { %v2168_v61 = vmax.f32 %v2162_v39, 0.0 }
0x1022   :  { %2525 = vmatmul.msk.f32.gmra.mxu2 %vm4514_vm1, %v2168_v61 }
0x1049   :  { %v2164_v63 = vpop.f32.mrf.mxu0 }
0x104a   :  { %v2165_v2 = vadd.f32 %v2643_v29, %v2164_v63 }
0x104c   :  { %v2169_v52 = vmax.f32 %v2165_v2, 0.0 }
0x104e   :  { %2526 = vmatmul.msk.f32.gmra.mxu2 %vm4515_vm5, %v2169_v52 }
0x109c   :  { %v2206_v31 = vpop.f32.mrf.mxu2 }
0x10a5   :  { %v2208_v23 = vpop.f32.mrf.mxu2 }
0x10d1   :  { %v2210_v22 = vpop.f32.mrf.mxu2 }
0x10d2   :  { %v2211_v34 = vadd.f32 %v2644_v50, %v2210_v22 }
0x10d4   :  { %v2213_v30 = vadd.f32 %v2211_v34, %v2125_v15 }
0x10d6   :  { %v2216_v20 = vsel %vm4516_vm8, %v2213_v30, 0.0  ;;  %v2220_v41 = vmul.f32 %v2213_v30, %v2213_v30 }
0x10d7   :  { %2217 = vadd.xlane.f32.xlu0 %v2216_v20 }
0x10d8   :  { %v2221_v38 = vsel %vm4517_vm3, %v2220_v41, 0.0 }
0x10d9   :  { %2222 = vadd.xlane.f32.xlu1 %v2221_v38 }
0x114a   :  { %v2218_v46 = vpop.xlane.xlu0 %2217 }
0x114b   :  { %v2219_v40 = vmul.f32 %v2218_v46, %v3795_v27 }
0x114c   :  { %v2223_v5 = vpop.xlane.xlu1 %2222 }
0x114d   :  { %v2225_v21 = vmul.f32 %v2219_v40, %v2219_v40  ;;  %v2224_v32 = vmul.f32 %v2223_v5, %v3795_v27  ;;  %v2227_v56 = vsub.f32 %v2213_v30, %v2219_v40  ;;  %v2645_v27 = vld [vmem:[%s4319_s1 + $0x13] ss:$0 sm:$0xff] }
0x114f   :  { %v2226_v25 = vsub.f32 %v2224_v32, %v2225_v21 }
0x1151   :  { %v2228_v35 = vadd.f32 1e-05, %v2226_v25 }
0x1153   :  { %2764 = vrsqrt.f32 %v2228_v35  ;;  %vm2235_vm11 = vweird.f32 %v2228_v35 }
0x1159   :  { %v2765_v33 = vpop.eup %2764 }
0x115a   :  { %v2230_v51 = vmul.f32 %v2765_v33, %v2228_v35  ;;  %vm2236_vm10 = vweird.f32 %v2765_v33 }
0x115b   :  { %vm2237_vm12 = vmor %vm2235_vm11, %vm2236_vm10 }
0x115c   :  { %v2231_v24 = vmul.f32 %v2765_v33, %v2230_v51 }
0x115e   :  { %v2232_v49 = vmul.f32 0.5, %v2231_v24 }
0x1160   :  { %v2233_v36 = vsub.f32 1.5, %v2232_v49 }
0x1162   :  { %v2234_v9 = vmul.f32 %v2765_v33, %v2233_v36 }
0x1164   :  { %v2238_v28 = vsel %vm2237_vm12, %v2765_v33, %v2234_v9 }
0x1165   :  { %v2239_v54 = vmul.f32 %v2238_v28, %v2227_v56 }
0x1167   :  { %v2241_v48 = vmul.f32 %v2645_v27, %v2239_v54 }
0x1169   :  { %v2243_v19 = vadd.f32 %v2646_v43, %v2241_v48 }
0x116b   :  { %2527 = vmatmul.msk.f32.vlgmr.msrb.gmra.mxu0 %vm4518_vm13, %v2243_v19 }
0x11e8   :  { %v2270_v4 = vpop.f32.mrf.mxu0 }
0x11e9   :  { %v2271_v59 = vadd.f32 %v2647_v1, %v2270_v4 }
0x11eb   :  { %2544 = vmatmul.msk.f32.vlgmr.msrb.gmra.mxu1 %vm4489_vm0, %v2271_v59 }
0x1268   :  { %v2357_v45 = vpop.f32.mrf.mxu1 }
0x1269   :  { %2360 = vst [vmem:[#allocation4] sm:$0xff] %v2357_v45 }
0x126a   :  { %2371 = dma.vmem_to_hbm [thread:$0]  %s2367_s28, 128, %s2369_s6, [#allocation5]  }
0x126b   :  { %2802 = dma.done.wait [#allocation5], 128  }
0x126c   :  { %2803 = vsyncadd [#allocation5], 4294967168 }
0x126d   :  { %2376 = vsyncpa [#allocation5], 1 }

</bundles_post_ra>
